<compile_context>
chip_gen: v6e
topology: v6e:2x2x1
jax: 0.10.0
libtpu: 0.0.40
codegen_flags: <defaults>
</compile_context>

<pallas_src>
import functools
import math

import jax
import jax.numpy as jnp
import numpy as np
from jax.experimental import pallas as pl
from jax.experimental.pallas import tpu as pltpu


# -----------------------------------------------------------------------------
# Positional encoding (sinusoidal, as in the Annotated-Transformer preprocessor)
# -----------------------------------------------------------------------------
def sinusoidal_pe(length, d_model):
    pos = np.arange(length, dtype=np.float32)[:, None]
    div = np.exp(np.arange(0, d_model, 2, dtype=np.float32) * -(math.log(10000.0) / d_model))
    pe = np.zeros((length, d_model), dtype=np.float32)
    pe[:, 0::2] = np.sin(pos * div)
    pe[:, 1::2] = np.cos(pos * div)
    return jnp.asarray(pe)


# -----------------------------------------------------------------------------
# Pallas kernel: grid = (batch, query_tile).  One query tile of TQ rows per step;
# K/V of the full (padded) sequence / memory live in VMEM scratch, computed once
# per batch element at qi == 0 and reused for the remaining tiles.
# NOTE: the qi==0 scratch-init pattern is only correct while the qi axis is
# sequential ("arbitrary") and innermost -- do not mark it "parallel".
# -----------------------------------------------------------------------------
def _decoder_kernel(xf_ref, mem_ref, pef_ref, tmask_ref, cmask_ref,
                    ln_a_ref, ln_b_ref, aw_ref, ab_ref,
                    w1_ref, b1_ref, w2_ref, b2_ref,
                    o_ref,
                    k_self_ref, v_self_ref, k_src_ref, v_src_ref,
                    *, num_heads, eps, causal, kv_blk):
    f32, bf16 = jnp.float32, jnp.bfloat16
    TQ, D = o_ref.shape[1], o_ref.shape[2]
    L = xf_ref.shape[1]
    S = mem_ref.shape[1]
    H = num_heads
    dk = D // H

    qi = pl.program_id(1)
    ln_a = ln_a_ref[...]              # [3, D]
    ln_b = ln_b_ref[...]              # [3, D]

    def layer_norm(v, idx):
        # torch.std() semantics: unbiased (N-1) estimator, eps added to std.
        mean = jnp.mean(v, axis=-1, keepdims=True)
        var = jnp.sum((v - mean) ** 2, axis=-1, keepdims=True) * (1.0 / (D - 1))
        inv = pl.reciprocal(jnp.sqrt(var) + eps)          # exact; one recip/row, then mul
        return ln_a[idx][None, :] * ((v - mean) * inv) + ln_b[idx][None, :]

    def project(v_bf16, widx):
        # bf16 x bf16 matmul on the MXU, f32 accumulation, f32 bias add.
        return (jnp.dot(v_bf16, aw_ref[widx], preferred_element_type=f32)
                + ab_ref[widx][None, :])

    # ---- per-batch K/V precompute: runs once (first query tile), reused by the rest ----
    @pl.when(qi == 0)
    def _():
        xf = xf_ref[0] + pef_ref[...]                     # [L, D] f32 (PE; dropout = identity)
        xn = layer_norm(xf, 0).astype(bf16)
        k_self_ref[...] = project(xn, 1).astype(bf16)     # self-attn K
        v_self_ref[...] = project(xn, 2).astype(bf16)     # self-attn V
        mem_bf = mem_ref[0]                               # already bf16 (pre-cast in wrapper)
        k_src_ref[...] = project(mem_bf, 5).astype(bf16)
        v_src_ref[...] = project(mem_bf, 6).astype(bf16)

    def attention(q_proj_f32, k_ref, v_ref, keep, o_widx):
        # Flash-style online softmax over KV blocks.  The block loop is a static Python
        # loop so every ref slice / mask slice is static; f32 intermediates are bounded
        # to O(H * TQ * kv_blk) instead of O(H * TQ * kv).
        kv = k_ref.shape[0]
        q3 = q_proj_f32.astype(bf16).reshape(TQ, H, dk)   # 1/sqrt(dk) folded into W_q / b_q
        m = jnp.full((H, TQ, 1), -1e30, f32)
        l = jnp.zeros((H, TQ, 1), f32)
        acc = jnp.zeros((H, TQ, dk), f32)
        for start in range(0, kv, kv_blk):
            blk = min(kv_blk, kv - start)
            k3 = k_ref[pl.ds(start, blk), :].reshape(blk, H, dk)
            v3 = v_ref[pl.ds(start, blk), :].reshape(blk, H, dk)
            # batched-head contraction: no per-head Python loop
            s = jnp.einsum('qhd,khd->hqk', q3, k3, preferred_element_type=f32)
            s = jnp.where(keep[None, :, start:start + blk], s, -1e9)
            m_new = jnp.maximum(m, jnp.max(s, axis=-1, keepdims=True))
            alpha = jnp.exp(m - m_new)
            e = jnp.exp(s - m_new)
            l = alpha * l + jnp.sum(e, axis=-1, keepdims=True)
            acc = alpha * acc + jnp.einsum('hqk,khd->hqd', e.astype(bf16), v3,
                                           preferred_element_type=f32)
            m = m_new
        ctx = acc * pl.reciprocal(l, approx=True)             # [H, TQ, dk]
        ctx = jnp.transpose(ctx, (1, 0, 2)).reshape(TQ, D)    # head-concat back to [TQ, D]
        return project(ctx.astype(bf16), o_widx)

    # ---- this query tile (sliced from the resident full-sequence blocks) ----
    q0 = pl.multiple_of(qi * TQ, TQ)
    xq = xf_ref[0, pl.ds(q0, TQ), :] + pef_ref[pl.ds(q0, TQ), :]   # [TQ, D] f32

    # masks: causal part built in-kernel; padding parts are tiny [1,L]/[1,S] int32 vectors
    pad_keep = tmask_ref[0] != 0                          # [1, L] bool
    if causal:
        rows = q0 + jax.lax.broadcasted_iota(jnp.int32, (TQ, L), 0)
        cols = jax.lax.broadcasted_iota(jnp.int32, (TQ, L), 1)
        keep_self = jnp.logical_and(rows >= cols, pad_keep)
    else:
        keep_self = jnp.broadcast_to(pad_keep, (TQ, L))
    keep_src = jnp.broadcast_to(cmask_ref[0] != 0, (TQ, S))

    # sublayer 1: masked self-attention (residual; dropout = identity)
    xn1 = layer_norm(xq, 0).astype(jnp.bfloat16)
    x1 = xq + attention(project(xn1, 0), k_self_ref, v_self_ref, keep_self, 3)
    # sublayer 2: source (cross) attention
    xn2 = layer_norm(x1, 1).astype(jnp.bfloat16)
    x2 = x1 + attention(project(xn2, 4), k_src_ref, v_src_ref, keep_src, 7)
    # sublayer 3: position-wise feed forward
    xn3 = layer_norm(x2, 2).astype(jnp.bfloat16)
    h = jnp.maximum(jnp.dot(xn3, w1_ref[...], preferred_element_type=f32) + b1_ref[...], 0.0)
    x3 = x2 + jnp.dot(h.astype(jnp.bfloat16), w2_ref[...], preferred_element_type=f32) + b2_ref[...]

    o_ref[0] = x3


# -----------------------------------------------------------------------------
# Wrapper (glue): flattening, padding, mask vectors, `step` slicing, weight prep.
# -----------------------------------------------------------------------------
def decoder_layer(params, x, memory, src_mask=None, enable_future_mask=True,
                  target_mask=None, step=None, tq=None, kv_blk=512):
    raw_shape = x.shape
    B, D = raw_shape[0], raw_shape[-1]
    H = params["num_heads"]
    assert D % H == 0
    dk = D // H

    x2 = x.reshape(B, -1, D).astype(jnp.float32)
    # memory's only in-kernel use is bf16 matmul input -> pre-cast (halves DMA + VMEM block)
    mem2 = memory.reshape(memory.shape[0], -1, memory.shape[-1]).astype(jnp.bfloat16)
    T_full = x2.shape[1]
    S = mem2.shape[1]
    pe_full = sinusoidal_pe(T_full, D)

    if target_mask is not None:
        tmask_full = target_mask.reshape(B, -1) != 0
    else:
        tmask_full = jnp.ones((B, T_full), bool)

    if step is not None:
        L = step + 1
        x_run = x2[:, :L, :]
        # PE was applied to the full input before the split, so the tail carries PE too.
        tail = x2[:, L:, :] + pe_full[None, L:, :]
        pe = pe_full[:L]
        tmask = tmask_full[:, :L]
    else:
        L = T_full
        x_run, tail, pe = x2, None, pe_full
        tmask = tmask_full

    # ---- query tiling + padding (pad rows are masked out as keys, discarded as queries) ----
    if tq is None:
        tq = min(256, max(8, -(-L // 8) * 8))
    assert tq % 8 == 0
    Lp = -(-L // tq) * tq
    if Lp != L:
        padL = Lp - L
        x_run = jnp.pad(x_run, ((0, 0), (0, padL), (0, 0)))
        pe = jnp.pad(pe, ((0, padL), (0, 0)))
        tmask = jnp.pad(tmask, ((0, 0), (0, padL)))
    nq = Lp // tq
    kv_blk = max(8, (min(kv_blk, max(Lp, S)) // 8) * 8)

    tmask_i = tmask.astype(jnp.int32).reshape(B, 1, Lp)
    if src_mask is not None:
        cmask_i = (src_mask.reshape(src_mask.shape[0], -1) != 0).astype(jnp.int32)
        cmask_i = jnp.broadcast_to(cmask_i.reshape(-1, 1, S), (B, 1, S))
    else:
        cmask_i = jnp.ones((B, 1, S), jnp.int32)

    # bf16 weights (MXU-native, halves weight DMA/VMEM); 1/sqrt(dk) folded into q-proj W & b.
    q_scale = jnp.array([1.0 / math.sqrt(dk), 1, 1, 1, 1.0 / math.sqrt(dk), 1, 1, 1],
                        jnp.float32)
    aw_bf = (params["attn_w"] * q_scale[:, None, None]).astype(jnp.bfloat16)
    ab_sc = params["attn_b"] * q_scale[:, None]
    w1_bf = params["ff_w1"].astype(jnp.bfloat16)
    w2_bf = params["ff_w2"].astype(jnp.bfloat16)
    DFF = params["ff_w1"].shape[1]

    kernel = functools.partial(_decoder_kernel, num_heads=H, eps=1e-6,
                               causal=bool(enable_future_mask), kv_blk=kv_blk)

    # ---- VMEM budget from actual block sizes, capped by physical capacity per chip ----
    try:
        vmem_cap = int(pltpu.get_tpu_info().vmem_capacity_bytes)
    except Exception:
        vmem_cap = 64 * 2**20
    f32b, bf16b, i32b = 4, 2, 4
    kvb = min(kv_blk, max(Lp, S))
    dbl = 2 * ((Lp * D) * f32b + (S * D) * bf16b + (Lp + S) * i32b + (tq * D) * f32b)
    single = ((Lp * D) * f32b + 6 * D * f32b + 8 * D * D * bf16b + 8 * D * f32b
              + 2 * D * DFF * bf16b + (DFF + D) * f32b)
    scratch = 2 * (Lp + S) * D * bf16b
    interm = 6 * H * tq * kvb * f32b + 8 * tq * max(D, DFF) * f32b + 4 * Lp * D * f32b
    est = dbl + single + scratch + interm + (4 << 20)
    vmem_limit = int(min(vmem_cap - (2 << 20), max(est, 32 << 20)))

    def cspec(shape, imap):
        # constant-index blocks: single-buffered (resident once, no double buffering)
        try:
            return pl.BlockSpec(shape, imap, pipeline_mode=pl.Buffered(1))
        except TypeError:   # older jax without pipeline_mode kwarg
            return pl.BlockSpec(shape, imap)

    out = pl.pallas_call(
        kernel,
        out_shape=jax.ShapeDtypeStruct((B, Lp, D), jnp.float32),
        grid=(B, nq),
        in_specs=[
            pl.BlockSpec((1, Lp, D), lambda b, q: (b, 0, 0)),   # x, full (padded) sequence
            pl.BlockSpec((1, S, D), lambda b, q: (b, 0, 0)),    # memory (bf16)
            cspec((Lp, D), lambda b, q: (0, 0)),                # PE, full sequence
            pl.BlockSpec((1, 1, Lp), lambda b, q: (b, 0, 0)),   # target/padding mask (int32)
            pl.BlockSpec((1, 1, S), lambda b, q: (b, 0, 0)),    # src mask (int32)
            cspec((3, D), lambda b, q: (0, 0)),                 # LN scales
            cspec((3, D), lambda b, q: (0, 0)),                 # LN biases
            cspec((8, D, D), lambda b, q: (0, 0, 0)),           # attn proj weights (bf16)
            cspec((8, D), lambda b, q: (0, 0)),                 # attn proj biases
            cspec((D, DFF), lambda b, q: (0, 0)),               # FFN W1 (bf16)
            cspec((1, DFF), lambda b, q: (0, 0)),               # FFN b1
            cspec((DFF, D), lambda b, q: (0, 0)),               # FFN W2 (bf16)
            cspec((1, D), lambda b, q: (0, 0)),                 # FFN b2
        ],
        out_specs=pl.BlockSpec((1, tq, D), lambda b, q: (b, q, 0)),
        scratch_shapes=[
            pltpu.VMEM((Lp, D), jnp.bfloat16),   # self-attn K
            pltpu.VMEM((Lp, D), jnp.bfloat16),   # self-attn V
            pltpu.VMEM((S, D), jnp.bfloat16),    # src-attn K
            pltpu.VMEM((S, D), jnp.bfloat16),    # src-attn V
        ],
        compiler_params=pltpu.CompilerParams(
            dimension_semantics=("parallel", "arbitrary"),
            vmem_limit_bytes=vmem_limit),
    )(x_run, mem2, pe, tmask_i, cmask_i,
      params["ln_a"], params["ln_b"], aw_bf, ab_sc,
      w1_bf, params["ff_b1"], w2_bf, params["ff_b2"])

    if Lp != L:
        out = out[:, :L, :]
    if tail is not None:
        out = jnp.concatenate([out, tail], axis=1)
    return out.reshape(raw_shape)


# -----------------------------------------------------------------------------
# Pure-JAX reference (correctness check only; f32 HIGHEST precision)
# -----------------------------------------------------------------------------
def _ref_layer_norm(v, a, b, eps=1e-6):
    mean = jnp.mean(v, axis=-1, keepdims=True)
    var = jnp.sum((v - mean) ** 2, axis=-1, keepdims=True) / (v.shape[-1] - 1)
    return a * (v - mean) / (jnp.sqrt(var) + eps) + b


def _ref_mha(q_in, kv_in, mask, aw, ab, base, num_heads):
    hi = jax.lax.Precision.HIGHEST
    D = q_in.shape[-1]
    dk = D // num_heads
    q = jnp.dot(q_in, aw[base + 0], precision=hi) + ab[base + 0]
    k = jnp.dot(kv_in, aw[base + 1], precision=hi) + ab[base + 1]
    v = jnp.dot(kv_in, aw[base + 2], precision=hi) + ab[base + 2]
    heads = []
    for h in range(num_heads):
        qh, kh, vh = (q[:, h * dk:(h + 1) * dk], k[:, h * dk:(h + 1) * dk],
                      v[:, h * dk:(h + 1) * dk])
        s = jnp.dot(qh, kh.T, precision=hi) / math.sqrt(dk)
        s = jnp.where(mask == 0, -1e9, s)
        p = jax.nn.softmax(s, axis=-1)
        heads.append(jnp.dot(p, vh, precision=hi))
    o = jnp.concatenate(heads, axis=-1)
    return jnp.dot(o, aw[base + 3], precision=hi) + ab[base + 3]


def decoder_layer_ref(params, x, memory, src_mask, enable_future_mask, target_mask):
    hi = jax.lax.Precision.HIGHEST
    B, T, D = x.shape
    S = memory.shape[1]
    H = params["num_heads"]
    pe = sinusoidal_pe(T, D)
    fmask = (jnp.tril(jnp.ones((T, T), jnp.float32)) if enable_future_mask
             else jnp.ones((T, T), jnp.float32))
    outs = []
    for b in range(B):
        xb = x[b] + pe
        mb = memory[b]
        if target_mask is not None:
            sm = (fmask.astype(bool) & target_mask[b][None, :].astype(bool)).astype(jnp.float32)
        else:
            sm = fmask
        cm = (src_mask[b][None, :].astype(jnp.float32) if src_mask is not None
              else jnp.ones((1, S), jnp.float32))
        xn = _ref_layer_norm(xb, params["ln_a"][0], params["ln_b"][0])
        xb = xb + _ref_mha(xn, xn, sm, params["attn_w"], params["attn_b"], 0, H)
        xn = _ref_layer_norm(xb, params["ln_a"][1], params["ln_b"][1])
        xb = xb + _ref_mha(xn, mb, cm, params["attn_w"], params["attn_b"], 4, H)
        xn = _ref_layer_norm(xb, params["ln_a"][2], params["ln_b"][2])
        h1 = jnp.maximum(jnp.dot(xn, params["ff_w1"], precision=hi) + params["ff_b1"], 0.0)
        xb = xb + jnp.dot(h1, params["ff_w2"], precision=hi) + params["ff_b2"]
        outs.append(xb)
    return jnp.stack(outs, axis=0)


# -----------------------------------------------------------------------------
if __name__ == "__main__":
    B, T, S, D, H, DFF = 2, 16, 16, 32, 4, 64

    key = jax.random.PRNGKey(0)
    ks = jax.random.split(key, 10)

    def nrm(k, shape, scale=0.05):
        return jax.random.normal(k, shape, jnp.float32) * scale

    params = dict(
        num_heads=H,
        ln_a=jnp.ones((3, D), jnp.float32),
        ln_b=jnp.zeros((3, D), jnp.float32),
        attn_w=nrm(ks[0], (8, D, D)),     # self q,k,v,o then src q,k,v,o (x @ W + b)
        attn_b=nrm(ks[1], (8, D)),
        ff_w1=nrm(ks[2], (D, DFF)),
        ff_b1=nrm(ks[3], (1, DFF)),
        ff_w2=nrm(ks[4], (DFF, D)),
        ff_b2=nrm(ks[5], (1, D)),
    )

    x = jax.random.normal(ks[6], (B, T, D), jnp.float32)
    memory = jax.random.normal(ks[7], (B, S, D), jnp.float32)
    target_mask = jnp.broadcast_to((jnp.arange(T) < 12)[None, :], (B, T)).astype(jnp.float32)
    src_mask = jnp.broadcast_to((jnp.arange(S) < 13)[None, :], (B, S)).astype(jnp.float32)

    # full-sequence path: 2 query tiles of 8 rows, KV blocks of 8 (exercises the qi grid axis,
    # the K/V scratch reuse, and the blocked online-softmax loop)
    out = decoder_layer(params, x, memory, src_mask=src_mask,
                        enable_future_mask=True, target_mask=target_mask,
                        step=None, tq=8, kv_blk=8)
    out = jax.block_until_ready(out)
    ref = decoder_layer_ref(params, x, memory, src_mask, True, target_mask)
    assert out.shape == x.shape
    assert bool(jnp.all(jnp.isfinite(out)))
    err = float(jnp.max(jnp.abs(out - ref)))
    assert err < 2e-2, f"full-path max abs err {err}"

    # incremental (`step`) path: prefix (length 10) padded to a 16-row tile inside the kernel,
    # tail gets PE and is re-attached outside (exercises the L-padding path)
    step = 9
    out_s = jax.block_until_ready(
        decoder_layer(params, x, memory, src_mask=src_mask,
                      enable_future_mask=True, target_mask=target_mask,
                      step=step, kv_blk=8))
    L = step + 1
    ref_s = decoder_layer_ref(params, x[:, :L], memory, src_mask, True, target_mask[:, :L])
    err_s = float(jnp.max(jnp.abs(out_s[:, :L] - ref_s)))
    tail_ref = x[:, L:] + sinusoidal_pe(T, D)[None, L:]
    err_t = float(jnp.max(jnp.abs(out_s[:, L:] - tail_ref)))
    assert err_s < 2e-2 and err_t < 1e-5, f"step-path errs {err_s} {err_t}"

    print("KERNEL_OK")
</pallas_src>

<mosaic_0001>
module attributes {stable_mosaic.version = 11 : i64} {
  func.func @_decoder_kernel(%arg0: i32, %arg1: i32, %arg2: memref<1x16x32xf32, #tpu.memory_space<vmem>>, %arg3: memref<1x16x32xbf16, #tpu.memory_space<vmem>>, %arg4: memref<16x32xf32, #tpu.memory_space<vmem>>, %arg5: memref<1x1x16xi32, #tpu.memory_space<vmem>>, %arg6: memref<1x1x16xi32, #tpu.memory_space<vmem>>, %arg7: memref<3x32xf32, #tpu.memory_space<vmem>>, %arg8: memref<3x32xf32, #tpu.memory_space<vmem>>, %arg9: memref<8x32x32xbf16, #tpu.memory_space<vmem>>, %arg10: memref<8x32xf32, #tpu.memory_space<vmem>>, %arg11: memref<32x64xbf16, #tpu.memory_space<vmem>>, %arg12: memref<1x64xf32, #tpu.memory_space<vmem>>, %arg13: memref<64x32xbf16, #tpu.memory_space<vmem>>, %arg14: memref<1x32xf32, #tpu.memory_space<vmem>>, %arg15: memref<1x8x32xf32, #tpu.memory_space<vmem>>, %arg16: memref<16x32xbf16, #tpu.memory_space<vmem>>, %arg17: memref<16x32xbf16, #tpu.memory_space<vmem>>, %arg18: memref<16x32xbf16, #tpu.memory_space<vmem>>, %arg19: memref<16x32xbf16, #tpu.memory_space<vmem>>) attributes {dimension_semantics = [#tpu.dimension_semantics<parallel>, #tpu.dimension_semantics<arbitrary>], iteration_bounds = array<i64: 2, 2>, scalar_prefetch = 0 : i64, scratch_operands = 4 : i64, tpu.core_type = #tpu.core_type<tc>, window_params = [{transform_indices = @transform_0, window_bounds = array<i64: 1, 16, 32>}, {transform_indices = @transform_1, window_bounds = array<i64: 1, 16, 32>}, {pipeline_mode = #tpu.pipeline_mode<synchronous>, transform_indices = @transform_2, window_bounds = array<i64: 16, 32>}, {transform_indices = @transform_3, window_bounds = array<i64: 1, 1, 16>}, {transform_indices = @transform_4, window_bounds = array<i64: 1, 1, 16>}, {pipeline_mode = #tpu.pipeline_mode<synchronous>, transform_indices = @transform_5, window_bounds = array<i64: 3, 32>}, {pipeline_mode = #tpu.pipeline_mode<synchronous>, transform_indices = @transform_6, window_bounds = array<i64: 3, 32>}, {pipeline_mode = #tpu.pipeline_mode<synchronous>, transform_indices = @transform_7, window_bounds = array<i64: 8, 32, 32>}, {pipeline_mode = #tpu.pipeline_mode<synchronous>, transform_indices = @transform_8, window_bounds = array<i64: 8, 32>}, {pipeline_mode = #tpu.pipeline_mode<synchronous>, transform_indices = @transform_9, window_bounds = array<i64: 32, 64>}, {pipeline_mode = #tpu.pipeline_mode<synchronous>, transform_indices = @transform_10, window_bounds = array<i64: 1, 64>}, {pipeline_mode = #tpu.pipeline_mode<synchronous>, transform_indices = @transform_11, window_bounds = array<i64: 64, 32>}, {pipeline_mode = #tpu.pipeline_mode<synchronous>, transform_indices = @transform_12, window_bounds = array<i64: 1, 32>}, {transform_indices = @transform_13, window_bounds = array<i64: 1, 8, 32>}]} {
    %c0 = arith.constant 0 : index
    %c0_0 = arith.constant 0 : index
    %0 = vector.load %arg7[%c0, %c0_0] : memref<3x32xf32, #tpu.memory_space<vmem>>, vector<3x32xf32>
    %c0_1 = arith.constant 0 : index
    %c0_2 = arith.constant 0 : index
    %1 = vector.load %arg8[%c0_1, %c0_2] : memref<3x32xf32, #tpu.memory_space<vmem>>, vector<3x32xf32>
    %c0_i32 = arith.constant 0 : i32
    %2 = arith.cmpi eq, %arg1, %c0_i32 : i32
    %3 = arith.extui %2 : i1 to i32
    %c0_i32_3 = arith.constant 0 : i32
    %4 = arith.cmpi ne, %3, %c0_i32_3 : i32
    scf.if %4 {
      %c0_105 = arith.constant 0 : index
      %c0_106 = arith.constant 0 : index
      %c0_107 = arith.constant 0 : index
      %305 = vector.load %arg2[%c0_105, %c0_106, %c0_107] : memref<1x16x32xf32, #tpu.memory_space<vmem>>, vector<1x16x32xf32>
      %306 = vector.shape_cast %305 : vector<1x16x32xf32> to vector<16x32xf32>
      %c0_108 = arith.constant 0 : index
      %c0_109 = arith.constant 0 : index
      %307 = vector.load %arg4[%c0_108, %c0_109] : memref<16x32xf32, #tpu.memory_space<vmem>>, vector<16x32xf32>
      %308 = arith.addf %306, %307 : vector<16x32xf32>
      %cst_110 = arith.constant dense<0.000000e+00> : vector<16xf32>
      %309 = vector.multi_reduction <add>, %308, %cst_110 [1] : vector<16x32xf32> to vector<16xf32>
      %310 = vector.shape_cast %309 : vector<16xf32> to vector<16x1xf32>
      %cst_111 = arith.constant 3.200000e+01 : f32
      %311 = vector.broadcast %cst_111 : f32 to vector<16x1xf32>
      %312 = arith.divf %310, %311 : vector<16x1xf32>
      %313 = vector.broadcast %312 : vector<16x1xf32> to vector<16x32xf32>
      %314 = arith.subf %308, %313 : vector<16x32xf32>
      %315 = arith.mulf %314, %314 : vector<16x32xf32>
      %cst_112 = arith.constant dense<0.000000e+00> : vector<16xf32>
      %316 = vector.multi_reduction <add>, %315, %cst_112 [1] : vector<16x32xf32> to vector<16xf32>
      %317 = vector.shape_cast %316 : vector<16xf32> to vector<16x1xf32>
      %cst_113 = arith.constant 0.0322580636 : f32
      %318 = vector.broadcast %cst_113 : f32 to vector<16x1xf32>
      %319 = arith.mulf %317, %318 : vector<16x1xf32>
      %320 = math.sqrt %319 : vector<16x1xf32>
      %cst_114 = arith.constant 9.99999997E-7 : f32
      %321 = vector.broadcast %cst_114 : f32 to vector<16x1xf32>
      %322 = arith.addf %320, %321 : vector<16x1xf32>
      %323 = tpu.reciprocal %322 : vector<16x1xf32> -> vector<16x1xf32>
      %324 = vector.extract_strided_slice %0 {offsets = [0, 0], sizes = [1, 32], strides = [1, 1]} : vector<3x32xf32> to vector<1x32xf32>
      %325 = vector.shape_cast %324 : vector<1x32xf32> to vector<32xf32>
      %326 = vector.shape_cast %325 : vector<32xf32> to vector<1x32xf32>
      %327 = vector.broadcast %312 : vector<16x1xf32> to vector<16x32xf32>
      %328 = arith.subf %308, %327 : vector<16x32xf32>
      %329 = vector.broadcast %323 : vector<16x1xf32> to vector<16x32xf32>
      %330 = arith.mulf %328, %329 : vector<16x32xf32>
      %331 = vector.broadcast %326 : vector<1x32xf32> to vector<16x32xf32>
      %332 = arith.mulf %331, %330 : vector<16x32xf32>
      %333 = vector.extract_strided_slice %1 {offsets = [0, 0], sizes = [1, 32], strides = [1, 1]} : vector<3x32xf32> to vector<1x32xf32>
      %334 = vector.shape_cast %333 : vector<1x32xf32> to vector<32xf32>
      %335 = vector.shape_cast %334 : vector<32xf32> to vector<1x32xf32>
      %336 = vector.broadcast %335 : vector<1x32xf32> to vector<16x32xf32>
      %337 = arith.addf %332, %336 : vector<16x32xf32>
      %338 = arith.truncf %337 : vector<16x32xf32> to vector<16x32xbf16>
      %c1 = arith.constant 1 : index
      %c0_115 = arith.constant 0 : index
      %c0_116 = arith.constant 0 : index
      %339 = vector.load %arg9[%c1, %c0_115, %c0_116] : memref<8x32x32xbf16, #tpu.memory_space<vmem>>, vector<1x32x32xbf16>
      %340 = vector.shape_cast %339 : vector<1x32x32xbf16> to vector<32x32xbf16>
      %cst_117 = arith.constant dense<0.000000e+00> : vector<16x32xf32>
      %341 = tpu.matmul %338, %340, %cst_117 {dimension_numbers = #tpu.dot_dimension_numbers<[1], [0], [0], [1], [0, 0, 1, 1], [], []>} : vector<16x32xbf16>, vector<32x32xbf16>, vector<16x32xf32> -> vector<16x32xf32>
      %c1_118 = arith.constant 1 : index
      %c0_119 = arith.constant 0 : index
      %342 = vector.load %arg10[%c1_118, %c0_119] : memref<8x32xf32, #tpu.memory_space<vmem>>, vector<1x32xf32>
      %343 = vector.shape_cast %342 : vector<1x32xf32> to vector<32xf32>
      %344 = vector.shape_cast %343 : vector<32xf32> to vector<1x32xf32>
      %345 = vector.broadcast %344 : vector<1x32xf32> to vector<16x32xf32>
      %346 = arith.addf %341, %345 : vector<16x32xf32>
      %347 = arith.truncf %346 : vector<16x32xf32> to vector<16x32xbf16>
      %c0_120 = arith.constant 0 : index
      %c0_121 = arith.constant 0 : index
      %348 = vector.load %arg16[%c0_120, %c0_121] : memref<16x32xbf16, #tpu.memory_space<vmem>>, vector<16x32xbf16>
      tpu.vector_store %arg16[%c0_120, %c0_121], %347 {strides = array<i32>} : memref<16x32xbf16, #tpu.memory_space<vmem>>, vector<16x32xbf16>,
      %c2 = arith.constant 2 : index
      %c0_122 = arith.constant 0 : index
      %c0_123 = arith.constant 0 : index
      %349 = vector.load %arg9[%c2, %c0_122, %c0_123] : memref<8x32x32xbf16, #tpu.memory_space<vmem>>, vector<1x32x32xbf16>
      %350 = vector.shape_cast %349 : vector<1x32x32xbf16> to vector<32x32xbf16>
      %cst_124 = arith.constant dense<0.000000e+00> : vector<16x32xf32>
      %351 = tpu.matmul %338, %350, %cst_124 {dimension_numbers = #tpu.dot_dimension_numbers<[1], [0], [0], [1], [0, 0, 1, 1], [], []>} : vector<16x32xbf16>, vector<32x32xbf16>, vector<16x32xf32> -> vector<16x32xf32>
      %c2_125 = arith.constant 2 : index
      %c0_126 = arith.constant 0 : index
      %352 = vector.load %arg10[%c2_125, %c0_126] : memref<8x32xf32, #tpu.memory_space<vmem>>, vector<1x32xf32>
      %353 = vector.shape_cast %352 : vector<1x32xf32> to vector<32xf32>
      %354 = vector.shape_cast %353 : vector<32xf32> to vector<1x32xf32>
      %355 = vector.broadcast %354 : vector<1x32xf32> to vector<16x32xf32>
      %356 = arith.addf %351, %355 : vector<16x32xf32>
      %357 = arith.truncf %356 : vector<16x32xf32> to vector<16x32xbf16>
      %c0_127 = arith.constant 0 : index
      %c0_128 = arith.constant 0 : index
      %358 = vector.load %arg17[%c0_127, %c0_128] : memref<16x32xbf16, #tpu.memory_space<vmem>>, vector<16x32xbf16>
      tpu.vector_store %arg17[%c0_127, %c0_128], %357 {strides = array<i32>} : memref<16x32xbf16, #tpu.memory_space<vmem>>, vector<16x32xbf16>,
      %c0_129 = arith.constant 0 : index
      %c0_130 = arith.constant 0 : index
      %c0_131 = arith.constant 0 : index
      %359 = vector.load %arg3[%c0_129, %c0_130, %c0_131] : memref<1x16x32xbf16, #tpu.memory_space<vmem>>, vector<1x16x32xbf16>
      %360 = vector.shape_cast %359 : vector<1x16x32xbf16> to vector<16x32xbf16>
      %c5 = arith.constant 5 : index
      %c0_132 = arith.constant 0 : index
      %c0_133 = arith.constant 0 : index
      %361 = vector.load %arg9[%c5, %c0_132, %c0_133] : memref<8x32x32xbf16, #tpu.memory_space<vmem>>, vector<1x32x32xbf16>
      %362 = vector.shape_cast %361 : vector<1x32x32xbf16> to vector<32x32xbf16>
      %cst_134 = arith.constant dense<0.000000e+00> : vector<16x32xf32>
      %363 = tpu.matmul %360, %362, %cst_134 {dimension_numbers = #tpu.dot_dimension_numbers<[1], [0], [0], [1], [0, 0, 1, 1], [], []>} : vector<16x32xbf16>, vector<32x32xbf16>, vector<16x32xf32> -> vector<16x32xf32>
      %c5_135 = arith.constant 5 : index
      %c0_136 = arith.constant 0 : index
      %364 = vector.load %arg10[%c5_135, %c0_136] : memref<8x32xf32, #tpu.memory_space<vmem>>, vector<1x32xf32>
      %365 = vector.shape_cast %364 : vector<1x32xf32> to vector<32xf32>
      %366 = vector.shape_cast %365 : vector<32xf32> to vector<1x32xf32>
      %367 = vector.broadcast %366 : vector<1x32xf32> to vector<16x32xf32>
      %368 = arith.addf %363, %367 : vector<16x32xf32>
      %369 = arith.truncf %368 : vector<16x32xf32> to vector<16x32xbf16>
      %c0_137 = arith.constant 0 : index
      %c0_138 = arith.constant 0 : index
      %370 = vector.load %arg18[%c0_137, %c0_138] : memref<16x32xbf16, #tpu.memory_space<vmem>>, vector<16x32xbf16>
      tpu.vector_store %arg18[%c0_137, %c0_138], %369 {strides = array<i32>} : memref<16x32xbf16, #tpu.memory_space<vmem>>, vector<16x32xbf16>,
      %c6 = arith.constant 6 : index
      %c0_139 = arith.constant 0 : index
      %c0_140 = arith.constant 0 : index
      %371 = vector.load %arg9[%c6, %c0_139, %c0_140] : memref<8x32x32xbf16, #tpu.memory_space<vmem>>, vector<1x32x32xbf16>
      %372 = vector.shape_cast %371 : vector<1x32x32xbf16> to vector<32x32xbf16>
      %cst_141 = arith.constant dense<0.000000e+00> : vector<16x32xf32>
      %373 = tpu.matmul %360, %372, %cst_141 {dimension_numbers = #tpu.dot_dimension_numbers<[1], [0], [0], [1], [0, 0, 1, 1], [], []>} : vector<16x32xbf16>, vector<32x32xbf16>, vector<16x32xf32> -> vector<16x32xf32>
      %c6_142 = arith.constant 6 : index
      %c0_143 = arith.constant 0 : index
      %374 = vector.load %arg10[%c6_142, %c0_143] : memref<8x32xf32, #tpu.memory_space<vmem>>, vector<1x32xf32>
      %375 = vector.shape_cast %374 : vector<1x32xf32> to vector<32xf32>
      %376 = vector.shape_cast %375 : vector<32xf32> to vector<1x32xf32>
      %377 = vector.broadcast %376 : vector<1x32xf32> to vector<16x32xf32>
      %378 = arith.addf %373, %377 : vector<16x32xf32>
      %379 = arith.truncf %378 : vector<16x32xf32> to vector<16x32xbf16>
      %c0_144 = arith.constant 0 : index
      %c0_145 = arith.constant 0 : index
      %380 = vector.load %arg19[%c0_144, %c0_145] : memref<16x32xbf16, #tpu.memory_space<vmem>>, vector<16x32xbf16>
      tpu.vector_store %arg19[%c0_144, %c0_145], %379 {strides = array<i32>} : memref<16x32xbf16, #tpu.memory_space<vmem>>, vector<16x32xbf16>,
    } else {
    }
    %c8_i32 = arith.constant 8 : i32
    %5 = arith.muli %arg1, %c8_i32 : i32
    %6 = tpu.assume_multiple %5, 8 : i32
    %c0_4 = arith.constant 0 : index
    %7 = arith.index_cast %6 : i32 to index
    %c0_5 = arith.constant 0 : index
    %8 = vector.load %arg2[%c0_4, %7, %c0_5] : memref<1x16x32xf32, #tpu.memory_space<vmem>>, vector<1x8x32xf32>
    %9 = vector.shape_cast %8 : vector<1x8x32xf32> to vector<8x32xf32>
    %10 = arith.index_cast %6 : i32 to index
    %c0_6 = arith.constant 0 : index
    %11 = vector.load %arg4[%10, %c0_6] : memref<16x32xf32, #tpu.memory_space<vmem>>, vector<8x32xf32>
    %12 = arith.addf %9, %11 : vector<8x32xf32>
    %c0_7 = arith.constant 0 : index
    %c0_8 = arith.constant 0 : index
    %c0_9 = arith.constant 0 : index
    %13 = vector.load %arg5[%c0_7, %c0_8, %c0_9] : memref<1x1x16xi32, #tpu.memory_space<vmem>>, vector<1x1x16xi32>
    %14 = vector.shape_cast %13 : vector<1x1x16xi32> to vector<1x16xi32>
    %c0_i32_10 = arith.constant 0 : i32
    %15 = vector.broadcast %c0_i32_10 : i32 to vector<1x16xi32>
    %16 = arith.cmpi ne, %14, %15 : vector<1x16xi32>
    %17 = tpu.iota {dimensions = array<i32: 0>} : vector<8x16xi32>
    %18 = vector.broadcast %6 : i32 to vector<8x16xi32>
    %19 = arith.addi %18, %17 : vector<8x16xi32>
    %20 = tpu.iota {dimensions = array<i32: 1>} : vector<8x16xi32>
    %21 = arith.cmpi sge, %19, %20 : vector<8x16xi32>
    %22 = vector.broadcast %16 : vector<1x16xi1> to vector<8x16xi1>
    %23 = arith.andi %21, %22 : vector<8x16xi1>
    %c0_11 = arith.constant 0 : index
    %c0_12 = arith.constant 0 : index
    %c0_13 = arith.constant 0 : index
    %24 = vector.load %arg6[%c0_11, %c0_12, %c0_13] : memref<1x1x16xi32, #tpu.memory_space<vmem>>, vector<1x1x16xi32>
    %25 = vector.shape_cast %24 : vector<1x1x16xi32> to vector<1x16xi32>
    %c0_i32_14 = arith.constant 0 : i32
    %26 = vector.broadcast %c0_i32_14 : i32 to vector<1x16xi32>
    %27 = arith.cmpi ne, %25, %26 : vector<1x16xi32>
    %28 = vector.shape_cast %27 : vector<1x16xi1> to vector<1x16xi1>
    %29 = vector.broadcast %28 : vector<1x16xi1> to vector<8x16xi1>
    %cst = arith.constant dense<0.000000e+00> : vector<8xf32>
    %30 = vector.multi_reduction <add>, %12, %cst [1] : vector<8x32xf32> to vector<8xf32>
    %31 = vector.shape_cast %30 : vector<8xf32> to vector<8x1xf32>
    %cst_15 = arith.constant 3.200000e+01 : f32
    %32 = vector.broadcast %cst_15 : f32 to vector<8x1xf32>
    %33 = arith.divf %31, %32 : vector<8x1xf32>
    %34 = vector.broadcast %33 : vector<8x1xf32> to vector<8x32xf32>
    %35 = arith.subf %12, %34 : vector<8x32xf32>
    %36 = arith.mulf %35, %35 : vector<8x32xf32>
    %cst_16 = arith.constant dense<0.000000e+00> : vector<8xf32>
    %37 = vector.multi_reduction <add>, %36, %cst_16 [1] : vector<8x32xf32> to vector<8xf32>
    %38 = vector.shape_cast %37 : vector<8xf32> to vector<8x1xf32>
    %cst_17 = arith.constant 0.0322580636 : f32
    %39 = vector.broadcast %cst_17 : f32 to vector<8x1xf32>
    %40 = arith.mulf %38, %39 : vector<8x1xf32>
    %41 = math.sqrt %40 : vector<8x1xf32>
    %cst_18 = arith.constant 9.99999997E-7 : f32
    %42 = vector.broadcast %cst_18 : f32 to vector<8x1xf32>
    %43 = arith.addf %41, %42 : vector<8x1xf32>
    %44 = tpu.reciprocal %43 : vector<8x1xf32> -> vector<8x1xf32>
    %45 = vector.extract_strided_slice %0 {offsets = [0, 0], sizes = [1, 32], strides = [1, 1]} : vector<3x32xf32> to vector<1x32xf32>
    %46 = vector.shape_cast %45 : vector<1x32xf32> to vector<32xf32>
    %47 = vector.shape_cast %46 : vector<32xf32> to vector<1x32xf32>
    %48 = vector.broadcast %33 : vector<8x1xf32> to vector<8x32xf32>
    %49 = arith.subf %12, %48 : vector<8x32xf32>
    %50 = vector.broadcast %44 : vector<8x1xf32> to vector<8x32xf32>
    %51 = arith.mulf %49, %50 : vector<8x32xf32>
    %52 = vector.broadcast %47 : vector<1x32xf32> to vector<8x32xf32>
    %53 = arith.mulf %52, %51 : vector<8x32xf32>
    %54 = vector.extract_strided_slice %1 {offsets = [0, 0], sizes = [1, 32], strides = [1, 1]} : vector<3x32xf32> to vector<1x32xf32>
    %55 = vector.shape_cast %54 : vector<1x32xf32> to vector<32xf32>
    %56 = vector.shape_cast %55 : vector<32xf32> to vector<1x32xf32>
    %57 = vector.broadcast %56 : vector<1x32xf32> to vector<8x32xf32>
    %58 = arith.addf %53, %57 : vector<8x32xf32>
    %59 = arith.truncf %58 : vector<8x32xf32> to vector<8x32xbf16>
    %c0_19 = arith.constant 0 : index
    %c0_20 = arith.constant 0 : index
    %c0_21 = arith.constant 0 : index
    %60 = vector.load %arg9[%c0_19, %c0_20, %c0_21] : memref<8x32x32xbf16, #tpu.memory_space<vmem>>, vector<1x32x32xbf16>
    %61 = vector.shape_cast %60 : vector<1x32x32xbf16> to vector<32x32xbf16>
    %cst_22 = arith.constant dense<0.000000e+00> : vector<8x32xf32>
    %62 = tpu.matmul %59, %61, %cst_22 {dimension_numbers = #tpu.dot_dimension_numbers<[1], [0], [0], [1], [0, 0, 1, 1], [], []>} : vector<8x32xbf16>, vector<32x32xbf16>, vector<8x32xf32> -> vector<8x32xf32>
    %c0_23 = arith.constant 0 : index
    %c0_24 = arith.constant 0 : index
    %63 = vector.load %arg10[%c0_23, %c0_24] : memref<8x32xf32, #tpu.memory_space<vmem>>, vector<1x32xf32>
    %64 = vector.shape_cast %63 : vector<1x32xf32> to vector<32xf32>
    %65 = vector.shape_cast %64 : vector<32xf32> to vector<1x32xf32>
    %66 = vector.broadcast %65 : vector<1x32xf32> to vector<8x32xf32>
    %67 = arith.addf %62, %66 : vector<8x32xf32>
    %68 = arith.truncf %67 : vector<8x32xf32> to vector<8x32xbf16>
    %69 = vector.shape_cast %68 : vector<8x32xbf16> to vector<8x4x8xbf16>
    %cst_25 = arith.constant -1.000000e+30 : f32
    %70 = vector.broadcast %cst_25 : f32 to vector<4x8x1xf32>
    %cst_26 = arith.constant 0.000000e+00 : f32
    %71 = vector.broadcast %cst_26 : f32 to vector<4x8x1xf32>
    %cst_27 = arith.constant 0.000000e+00 : f32
    %72 = vector.broadcast %cst_27 : f32 to vector<4x8x8xf32>
    %c0_28 = arith.constant 0 : index
    %c0_29 = arith.constant 0 : index
    %73 = vector.load %arg16[%c0_28, %c0_29] : memref<16x32xbf16, #tpu.memory_space<vmem>>, vector<8x32xbf16>
    %74 = vector.shape_cast %73 : vector<8x32xbf16> to vector<8x4x8xbf16>
    %c0_30 = arith.constant 0 : index
    %c0_31 = arith.constant 0 : index
    %75 = vector.load %arg17[%c0_30, %c0_31] : memref<16x32xbf16, #tpu.memory_space<vmem>>, vector<8x32xbf16>
    %76 = vector.shape_cast %75 : vector<8x32xbf16> to vector<8x4x8xbf16>
    "tpu.trace_start"() <{level = 10 : i32, message = "qhd,khd->hqk"}> : () -> ()
    %cst_32 = arith.constant dense<0.000000e+00> : vector<4x8x8xf32>
    %77 = tpu.matmul %69, %74, %cst_32 {dimension_numbers = #tpu.dot_dimension_numbers<[2], [2], [0], [0], [0, 1, 0, 0, 1, 0], [1], [1]>} : vector<8x4x8xbf16>, vector<8x4x8xbf16>, vector<4x8x8xf32> -> vector<4x8x8xf32>
    "tpu.trace_stop"() : () -> ()
    %78 = vector.extract_strided_slice %23 {offsets = [0, 0], sizes = [8, 8], strides = [1, 1]} : vector<8x16xi1> to vector<8x8xi1>
    %79 = vector.shape_cast %78 : vector<8x8xi1> to vector<1x8x8xi1>
    %cst_33 = arith.constant -1.000000e+09 : f32
    %80 = vector.shape_cast %79 : vector<1x8x8xi1> to vector<1x8x8xi1>
    %81 = vector.broadcast %80 : vector<1x8x8xi1> to vector<4x8x8xi1>
    %82 = vector.broadcast %cst_33 : f32 to vector<4x8x8xf32>
    %83 = arith.select %81, %77, %82 : vector<4x8x8xi1>, vector<4x8x8xf32>
    %cst_34 = arith.constant dense<0xFF800000> : vector<4x8xf32>
    %84 = vector.multi_reduction <maximumf>, %83, %cst_34 [2] : vector<4x8x8xf32> to vector<4x8xf32>
    %85 = vector.shape_cast %84 : vector<4x8xf32> to vector<4x8x1xf32>
    %86 = arith.maximumf %70, %85 : vector<4x8x1xf32>
    %87 = arith.subf %70, %86 : vector<4x8x1xf32>
    %88 = math.exp %87 : vector<4x8x1xf32>
    %89 = vector.broadcast %86 : vector<4x8x1xf32> to vector<4x8x8xf32>
    %90 = arith.subf %83, %89 : vector<4x8x8xf32>
    %91 = math.exp %90 : vector<4x8x8xf32>
    %92 = arith.mulf %88, %71 : vector<4x8x1xf32>
    %cst_35 = arith.constant dense<0.000000e+00> : vector<4x8xf32>
    %93 = vector.multi_reduction <add>, %91, %cst_35 [2] : vector<4x8x8xf32> to vector<4x8xf32>
    %94 = vector.shape_cast %93 : vector<4x8xf32> to vector<4x8x1xf32>
    %95 = arith.addf %92, %94 : vector<4x8x1xf32>
    %96 = vector.broadcast %88 : vector<4x8x1xf32> to vector<4x8x8xf32>
    %97 = arith.mulf %96, %72 : vector<4x8x8xf32>
    %98 = arith.truncf %91 : vector<4x8x8xf32> to vector<4x8x8xbf16>
    "tpu.trace_start"() <{level = 10 : i32, message = "hqk,khd->hqd"}> : () -> ()
    %cst_36 = arith.constant dense<0.000000e+00> : vector<4x8x8xf32>
    %99 = tpu.matmul %98, %76, %cst_36 {dimension_numbers = #tpu.dot_dimension_numbers<[2], [0], [1], [2], [0, 0, 0, 1, 1, 2], [0], [1]>} : vector<4x8x8xbf16>, vector<8x4x8xbf16>, vector<4x8x8xf32> -> vector<4x8x8xf32>
    "tpu.trace_stop"() : () -> ()
    %100 = arith.addf %97, %99 : vector<4x8x8xf32>
    %c8 = arith.constant 8 : index
    %c0_37 = arith.constant 0 : index
    %101 = vector.load %arg16[%c8, %c0_37] : memref<16x32xbf16, #tpu.memory_space<vmem>>, vector<8x32xbf16>
    %102 = vector.shape_cast %101 : vector<8x32xbf16> to vector<8x4x8xbf16>
    %c8_38 = arith.constant 8 : index
    %c0_39 = arith.constant 0 : index
    %103 = vector.load %arg17[%c8_38, %c0_39] : memref<16x32xbf16, #tpu.memory_space<vmem>>, vector<8x32xbf16>
    %104 = vector.shape_cast %103 : vector<8x32xbf16> to vector<8x4x8xbf16>
    "tpu.trace_start"() <{level = 10 : i32, message = "qhd,khd->hqk"}> : () -> ()
    %cst_40 = arith.constant dense<0.000000e+00> : vector<4x8x8xf32>
    %105 = tpu.matmul %69, %102, %cst_40 {dimension_numbers = #tpu.dot_dimension_numbers<[2], [2], [0], [0], [0, 1, 0, 0, 1, 0], [1], [1]>} : vector<8x4x8xbf16>, vector<8x4x8xbf16>, vector<4x8x8xf32> -> vector<4x8x8xf32>
    "tpu.trace_stop"() : () -> ()
    %106 = vector.extract_strided_slice %23 {offsets = [0, 8], sizes = [8, 8], strides = [1, 1]} : vector<8x16xi1> to vector<8x8xi1>
    %107 = vector.shape_cast %106 : vector<8x8xi1> to vector<1x8x8xi1>
    %cst_41 = arith.constant -1.000000e+09 : f32
    %108 = vector.shape_cast %107 : vector<1x8x8xi1> to vector<1x8x8xi1>
    %109 = vector.broadcast %108 : vector<1x8x8xi1> to vector<4x8x8xi1>
    %110 = vector.broadcast %cst_41 : f32 to vector<4x8x8xf32>
    %111 = arith.select %109, %105, %110 : vector<4x8x8xi1>, vector<4x8x8xf32>
    %cst_42 = arith.constant dense<0xFF800000> : vector<4x8xf32>
    %112 = vector.multi_reduction <maximumf>, %111, %cst_42 [2] : vector<4x8x8xf32> to vector<4x8xf32>
    %113 = vector.shape_cast %112 : vector<4x8xf32> to vector<4x8x1xf32>
    %114 = arith.maximumf %86, %113 : vector<4x8x1xf32>
    %115 = arith.subf %86, %114 : vector<4x8x1xf32>
    %116 = math.exp %115 : vector<4x8x1xf32>
    %117 = vector.broadcast %114 : vector<4x8x1xf32> to vector<4x8x8xf32>
    %118 = arith.subf %111, %117 : vector<4x8x8xf32>
    %119 = math.exp %118 : vector<4x8x8xf32>
    %120 = arith.mulf %116, %95 : vector<4x8x1xf32>
    %cst_43 = arith.constant dense<0.000000e+00> : vector<4x8xf32>
    %121 = vector.multi_reduction <add>, %119, %cst_43 [2] : vector<4x8x8xf32> to vector<4x8xf32>
    %122 = vector.shape_cast %121 : vector<4x8xf32> to vector<4x8x1xf32>
    %123 = arith.addf %120, %122 : vector<4x8x1xf32>
    %124 = vector.broadcast %116 : vector<4x8x1xf32> to vector<4x8x8xf32>
    %125 = arith.mulf %124, %100 : vector<4x8x8xf32>
    %126 = arith.truncf %119 : vector<4x8x8xf32> to vector<4x8x8xbf16>
    "tpu.trace_start"() <{level = 10 : i32, message = "hqk,khd->hqd"}> : () -> ()
    %cst_44 = arith.constant dense<0.000000e+00> : vector<4x8x8xf32>
    %127 = tpu.matmul %126, %104, %cst_44 {dimension_numbers = #tpu.dot_dimension_numbers<[2], [0], [1], [2], [0, 0, 0, 1, 1, 2], [0], [1]>} : vector<4x8x8xbf16>, vector<8x4x8xbf16>, vector<4x8x8xf32> -> vector<4x8x8xf32>
    "tpu.trace_stop"() : () -> ()
    %128 = arith.addf %125, %127 : vector<4x8x8xf32>
    %129 = tpu.reciprocal %123 {approx = true} : vector<4x8x1xf32> -> vector<4x8x1xf32>
    %130 = vector.broadcast %129 : vector<4x8x1xf32> to vector<4x8x8xf32>
    %131 = arith.mulf %128, %130 : vector<4x8x8xf32>
    %132 = tpu.transpose %131, [1, 0, 2] : vector<4x8x8xf32> -> vector<8x4x8xf32>
    %133 = vector.shape_cast %132 : vector<8x4x8xf32> to vector<8x32xf32>
    %134 = arith.truncf %133 : vector<8x32xf32> to vector<8x32xbf16>
    %c3 = arith.constant 3 : index
    %c0_45 = arith.constant 0 : index
    %c0_46 = arith.constant 0 : index
    %135 = vector.load %arg9[%c3, %c0_45, %c0_46] : memref<8x32x32xbf16, #tpu.memory_space<vmem>>, vector<1x32x32xbf16>
    %136 = vector.shape_cast %135 : vector<1x32x32xbf16> to vector<32x32xbf16>
    %cst_47 = arith.constant dense<0.000000e+00> : vector<8x32xf32>
    %137 = tpu.matmul %134, %136, %cst_47 {dimension_numbers = #tpu.dot_dimension_numbers<[1], [0], [0], [1], [0, 0, 1, 1], [], []>} : vector<8x32xbf16>, vector<32x32xbf16>, vector<8x32xf32> -> vector<8x32xf32>
    %c3_48 = arith.constant 3 : index
    %c0_49 = arith.constant 0 : index
    %138 = vector.load %arg10[%c3_48, %c0_49] : memref<8x32xf32, #tpu.memory_space<vmem>>, vector<1x32xf32>
    %139 = vector.shape_cast %138 : vector<1x32xf32> to vector<32xf32>
    %140 = vector.shape_cast %139 : vector<32xf32> to vector<1x32xf32>
    %141 = vector.broadcast %140 : vector<1x32xf32> to vector<8x32xf32>
    %142 = arith.addf %137, %141 : vector<8x32xf32>
    %143 = arith.addf %12, %142 : vector<8x32xf32>
    %cst_50 = arith.constant dense<0.000000e+00> : vector<8xf32>
    %144 = vector.multi_reduction <add>, %143, %cst_50 [1] : vector<8x32xf32> to vector<8xf32>
    %145 = vector.shape_cast %144 : vector<8xf32> to vector<8x1xf32>
    %cst_51 = arith.constant 3.200000e+01 : f32
    %146 = vector.broadcast %cst_51 : f32 to vector<8x1xf32>
    %147 = arith.divf %145, %146 : vector<8x1xf32>
    %148 = vector.broadcast %147 : vector<8x1xf32> to vector<8x32xf32>
    %149 = arith.subf %143, %148 : vector<8x32xf32>
    %150 = arith.mulf %149, %149 : vector<8x32xf32>
    %cst_52 = arith.constant dense<0.000000e+00> : vector<8xf32>
    %151 = vector.multi_reduction <add>, %150, %cst_52 [1] : vector<8x32xf32> to vector<8xf32>
    %152 = vector.shape_cast %151 : vector<8xf32> to vector<8x1xf32>
    %cst_53 = arith.constant 0.0322580636 : f32
    %153 = vector.broadcast %cst_53 : f32 to vector<8x1xf32>
    %154 = arith.mulf %152, %153 : vector<8x1xf32>
    %155 = math.sqrt %154 : vector<8x1xf32>
    %cst_54 = arith.constant 9.99999997E-7 : f32
    %156 = vector.broadcast %cst_54 : f32 to vector<8x1xf32>
    %157 = arith.addf %155, %156 : vector<8x1xf32>
    %158 = tpu.reciprocal %157 : vector<8x1xf32> -> vector<8x1xf32>
    %159 = vector.extract_strided_slice %0 {offsets = [1, 0], sizes = [1, 32], strides = [1, 1]} : vector<3x32xf32> to vector<1x32xf32>
    %160 = vector.shape_cast %159 : vector<1x32xf32> to vector<32xf32>
    %161 = vector.shape_cast %160 : vector<32xf32> to vector<1x32xf32>
    %162 = vector.broadcast %147 : vector<8x1xf32> to vector<8x32xf32>
    %163 = arith.subf %143, %162 : vector<8x32xf32>
    %164 = vector.broadcast %158 : vector<8x1xf32> to vector<8x32xf32>
    %165 = arith.mulf %163, %164 : vector<8x32xf32>
    %166 = vector.broadcast %161 : vector<1x32xf32> to vector<8x32xf32>
    %167 = arith.mulf %166, %165 : vector<8x32xf32>
    %168 = vector.extract_strided_slice %1 {offsets = [1, 0], sizes = [1, 32], strides = [1, 1]} : vector<3x32xf32> to vector<1x32xf32>
    %169 = vector.shape_cast %168 : vector<1x32xf32> to vector<32xf32>
    %170 = vector.shape_cast %169 : vector<32xf32> to vector<1x32xf32>
    %171 = vector.broadcast %170 : vector<1x32xf32> to vector<8x32xf32>
    %172 = arith.addf %167, %171 : vector<8x32xf32>
    %173 = arith.truncf %172 : vector<8x32xf32> to vector<8x32xbf16>
    %c4 = arith.constant 4 : index
    %c0_55 = arith.constant 0 : index
    %c0_56 = arith.constant 0 : index
    %174 = vector.load %arg9[%c4, %c0_55, %c0_56] : memref<8x32x32xbf16, #tpu.memory_space<vmem>>, vector<1x32x32xbf16>
    %175 = vector.shape_cast %174 : vector<1x32x32xbf16> to vector<32x32xbf16>
    %cst_57 = arith.constant dense<0.000000e+00> : vector<8x32xf32>
    %176 = tpu.matmul %173, %175, %cst_57 {dimension_numbers = #tpu.dot_dimension_numbers<[1], [0], [0], [1], [0, 0, 1, 1], [], []>} : vector<8x32xbf16>, vector<32x32xbf16>, vector<8x32xf32> -> vector<8x32xf32>
    %c4_58 = arith.constant 4 : index
    %c0_59 = arith.constant 0 : index
    %177 = vector.load %arg10[%c4_58, %c0_59] : memref<8x32xf32, #tpu.memory_space<vmem>>, vector<1x32xf32>
    %178 = vector.shape_cast %177 : vector<1x32xf32> to vector<32xf32>
    %179 = vector.shape_cast %178 : vector<32xf32> to vector<1x32xf32>
    %180 = vector.broadcast %179 : vector<1x32xf32> to vector<8x32xf32>
    %181 = arith.addf %176, %180 : vector<8x32xf32>
    %182 = arith.truncf %181 : vector<8x32xf32> to vector<8x32xbf16>
    %183 = vector.shape_cast %182 : vector<8x32xbf16> to vector<8x4x8xbf16>
    %cst_60 = arith.constant -1.000000e+30 : f32
    %184 = vector.broadcast %cst_60 : f32 to vector<4x8x1xf32>
    %cst_61 = arith.constant 0.000000e+00 : f32
    %185 = vector.broadcast %cst_61 : f32 to vector<4x8x1xf32>
    %cst_62 = arith.constant 0.000000e+00 : f32
    %186 = vector.broadcast %cst_62 : f32 to vector<4x8x8xf32>
    %c0_63 = arith.constant 0 : index
    %c0_64 = arith.constant 0 : index
    %187 = vector.load %arg18[%c0_63, %c0_64] : memref<16x32xbf16, #tpu.memory_space<vmem>>, vector<8x32xbf16>
    %188 = vector.shape_cast %187 : vector<8x32xbf16> to vector<8x4x8xbf16>
    %c0_65 = arith.constant 0 : index
    %c0_66 = arith.constant 0 : index
    %189 = vector.load %arg19[%c0_65, %c0_66] : memref<16x32xbf16, #tpu.memory_space<vmem>>, vector<8x32xbf16>
    %190 = vector.shape_cast %189 : vector<8x32xbf16> to vector<8x4x8xbf16>
    "tpu.trace_start"() <{level = 10 : i32, message = "qhd,khd->hqk"}> : () -> ()
    %cst_67 = arith.constant dense<0.000000e+00> : vector<4x8x8xf32>
    %191 = tpu.matmul %183, %188, %cst_67 {dimension_numbers = #tpu.dot_dimension_numbers<[2], [2], [0], [0], [0, 1, 0, 0, 1, 0], [1], [1]>} : vector<8x4x8xbf16>, vector<8x4x8xbf16>, vector<4x8x8xf32> -> vector<4x8x8xf32>
    "tpu.trace_stop"() : () -> ()
    %192 = vector.extract_strided_slice %29 {offsets = [0, 0], sizes = [8, 8], strides = [1, 1]} : vector<8x16xi1> to vector<8x8xi1>
    %193 = vector.shape_cast %192 : vector<8x8xi1> to vector<1x8x8xi1>
    %cst_68 = arith.constant -1.000000e+09 : f32
    %194 = vector.shape_cast %193 : vector<1x8x8xi1> to vector<1x8x8xi1>
    %195 = vector.broadcast %194 : vector<1x8x8xi1> to vector<4x8x8xi1>
    %196 = vector.broadcast %cst_68 : f32 to vector<4x8x8xf32>
    %197 = arith.select %195, %191, %196 : vector<4x8x8xi1>, vector<4x8x8xf32>
    %cst_69 = arith.constant dense<0xFF800000> : vector<4x8xf32>
    %198 = vector.multi_reduction <maximumf>, %197, %cst_69 [2] : vector<4x8x8xf32> to vector<4x8xf32>
    %199 = vector.shape_cast %198 : vector<4x8xf32> to vector<4x8x1xf32>
    %200 = arith.maximumf %184, %199 : vector<4x8x1xf32>
    %201 = arith.subf %184, %200 : vector<4x8x1xf32>
    %202 = math.exp %201 : vector<4x8x1xf32>
    %203 = vector.broadcast %200 : vector<4x8x1xf32> to vector<4x8x8xf32>
    %204 = arith.subf %197, %203 : vector<4x8x8xf32>
    %205 = math.exp %204 : vector<4x8x8xf32>
    %206 = arith.mulf %202, %185 : vector<4x8x1xf32>
    %cst_70 = arith.constant dense<0.000000e+00> : vector<4x8xf32>
    %207 = vector.multi_reduction <add>, %205, %cst_70 [2] : vector<4x8x8xf32> to vector<4x8xf32>
    %208 = vector.shape_cast %207 : vector<4x8xf32> to vector<4x8x1xf32>
    %209 = arith.addf %206, %208 : vector<4x8x1xf32>
    %210 = vector.broadcast %202 : vector<4x8x1xf32> to vector<4x8x8xf32>
    %211 = arith.mulf %210, %186 : vector<4x8x8xf32>
    %212 = arith.truncf %205 : vector<4x8x8xf32> to vector<4x8x8xbf16>
    "tpu.trace_start"() <{level = 10 : i32, message = "hqk,khd->hqd"}> : () -> ()
    %cst_71 = arith.constant dense<0.000000e+00> : vector<4x8x8xf32>
    %213 = tpu.matmul %212, %190, %cst_71 {dimension_numbers = #tpu.dot_dimension_numbers<[2], [0], [1], [2], [0, 0, 0, 1, 1, 2], [0], [1]>} : vector<4x8x8xbf16>, vector<8x4x8xbf16>, vector<4x8x8xf32> -> vector<4x8x8xf32>
    "tpu.trace_stop"() : () -> ()
    %214 = arith.addf %211, %213 : vector<4x8x8xf32>
    %c8_72 = arith.constant 8 : index
    %c0_73 = arith.constant 0 : index
    %215 = vector.load %arg18[%c8_72, %c0_73] : memref<16x32xbf16, #tpu.memory_space<vmem>>, vector<8x32xbf16>
    %216 = vector.shape_cast %215 : vector<8x32xbf16> to vector<8x4x8xbf16>
    %c8_74 = arith.constant 8 : index
    %c0_75 = arith.constant 0 : index
    %217 = vector.load %arg19[%c8_74, %c0_75] : memref<16x32xbf16, #tpu.memory_space<vmem>>, vector<8x32xbf16>
    %218 = vector.shape_cast %217 : vector<8x32xbf16> to vector<8x4x8xbf16>
    "tpu.trace_start"() <{level = 10 : i32, message = "qhd,khd->hqk"}> : () -> ()
    %cst_76 = arith.constant dense<0.000000e+00> : vector<4x8x8xf32>
    %219 = tpu.matmul %183, %216, %cst_76 {dimension_numbers = #tpu.dot_dimension_numbers<[2], [2], [0], [0], [0, 1, 0, 0, 1, 0], [1], [1]>} : vector<8x4x8xbf16>, vector<8x4x8xbf16>, vector<4x8x8xf32> -> vector<4x8x8xf32>
    "tpu.trace_stop"() : () -> ()
    %220 = vector.extract_strided_slice %29 {offsets = [0, 8], sizes = [8, 8], strides = [1, 1]} : vector<8x16xi1> to vector<8x8xi1>
    %221 = vector.shape_cast %220 : vector<8x8xi1> to vector<1x8x8xi1>
    %cst_77 = arith.constant -1.000000e+09 : f32
    %222 = vector.shape_cast %221 : vector<1x8x8xi1> to vector<1x8x8xi1>
    %223 = vector.broadcast %222 : vector<1x8x8xi1> to vector<4x8x8xi1>
    %224 = vector.broadcast %cst_77 : f32 to vector<4x8x8xf32>
    %225 = arith.select %223, %219, %224 : vector<4x8x8xi1>, vector<4x8x8xf32>
    %cst_78 = arith.constant dense<0xFF800000> : vector<4x8xf32>
    %226 = vector.multi_reduction <maximumf>, %225, %cst_78 [2] : vector<4x8x8xf32> to vector<4x8xf32>
    %227 = vector.shape_cast %226 : vector<4x8xf32> to vector<4x8x1xf32>
    %228 = arith.maximumf %200, %227 : vector<4x8x1xf32>
    %229 = arith.subf %200, %228 : vector<4x8x1xf32>
    %230 = math.exp %229 : vector<4x8x1xf32>
    %231 = vector.broadcast %228 : vector<4x8x1xf32> to vector<4x8x8xf32>
    %232 = arith.subf %225, %231 : vector<4x8x8xf32>
    %233 = math.exp %232 : vector<4x8x8xf32>
    %234 = arith.mulf %230, %209 : vector<4x8x1xf32>
    %cst_79 = arith.constant dense<0.000000e+00> : vector<4x8xf32>
    %235 = vector.multi_reduction <add>, %233, %cst_79 [2] : vector<4x8x8xf32> to vector<4x8xf32>
    %236 = vector.shape_cast %235 : vector<4x8xf32> to vector<4x8x1xf32>
    %237 = arith.addf %234, %236 : vector<4x8x1xf32>
    %238 = vector.broadcast %230 : vector<4x8x1xf32> to vector<4x8x8xf32>
    %239 = arith.mulf %238, %214 : vector<4x8x8xf32>
    %240 = arith.truncf %233 : vector<4x8x8xf32> to vector<4x8x8xbf16>
    "tpu.trace_start"() <{level = 10 : i32, message = "hqk,khd->hqd"}> : () -> ()
    %cst_80 = arith.constant dense<0.000000e+00> : vector<4x8x8xf32>
    %241 = tpu.matmul %240, %218, %cst_80 {dimension_numbers = #tpu.dot_dimension_numbers<[2], [0], [1], [2], [0, 0, 0, 1, 1, 2], [0], [1]>} : vector<4x8x8xbf16>, vector<8x4x8xbf16>, vector<4x8x8xf32> -> vector<4x8x8xf32>
    "tpu.trace_stop"() : () -> ()
    %242 = arith.addf %239, %241 : vector<4x8x8xf32>
    %243 = tpu.reciprocal %237 {approx = true} : vector<4x8x1xf32> -> vector<4x8x1xf32>
    %244 = vector.broadcast %243 : vector<4x8x1xf32> to vector<4x8x8xf32>
    %245 = arith.mulf %242, %244 : vector<4x8x8xf32>
    %246 = tpu.transpose %245, [1, 0, 2] : vector<4x8x8xf32> -> vector<8x4x8xf32>
    %247 = vector.shape_cast %246 : vector<8x4x8xf32> to vector<8x32xf32>
    %248 = arith.truncf %247 : vector<8x32xf32> to vector<8x32xbf16>
    %c7 = arith.constant 7 : index
    %c0_81 = arith.constant 0 : index
    %c0_82 = arith.constant 0 : index
    %249 = vector.load %arg9[%c7, %c0_81, %c0_82] : memref<8x32x32xbf16, #tpu.memory_space<vmem>>, vector<1x32x32xbf16>
    %250 = vector.shape_cast %249 : vector<1x32x32xbf16> to vector<32x32xbf16>
    %cst_83 = arith.constant dense<0.000000e+00> : vector<8x32xf32>
    %251 = tpu.matmul %248, %250, %cst_83 {dimension_numbers = #tpu.dot_dimension_numbers<[1], [0], [0], [1], [0, 0, 1, 1], [], []>} : vector<8x32xbf16>, vector<32x32xbf16>, vector<8x32xf32> -> vector<8x32xf32>
    %c7_84 = arith.constant 7 : index
    %c0_85 = arith.constant 0 : index
    %252 = vector.load %arg10[%c7_84, %c0_85] : memref<8x32xf32, #tpu.memory_space<vmem>>, vector<1x32xf32>
    %253 = vector.shape_cast %252 : vector<1x32xf32> to vector<32xf32>
    %254 = vector.shape_cast %253 : vector<32xf32> to vector<1x32xf32>
    %255 = vector.broadcast %254 : vector<1x32xf32> to vector<8x32xf32>
    %256 = arith.addf %251, %255 : vector<8x32xf32>
    %257 = arith.addf %143, %256 : vector<8x32xf32>
    %cst_86 = arith.constant dense<0.000000e+00> : vector<8xf32>
    %258 = vector.multi_reduction <add>, %257, %cst_86 [1] : vector<8x32xf32> to vector<8xf32>
    %259 = vector.shape_cast %258 : vector<8xf32> to vector<8x1xf32>
    %cst_87 = arith.constant 3.200000e+01 : f32
    %260 = vector.broadcast %cst_87 : f32 to vector<8x1xf32>
    %261 = arith.divf %259, %260 : vector<8x1xf32>
    %262 = vector.broadcast %261 : vector<8x1xf32> to vector<8x32xf32>
    %263 = arith.subf %257, %262 : vector<8x32xf32>
    %264 = arith.mulf %263, %263 : vector<8x32xf32>
    %cst_88 = arith.constant dense<0.000000e+00> : vector<8xf32>
    %265 = vector.multi_reduction <add>, %264, %cst_88 [1] : vector<8x32xf32> to vector<8xf32>
    %266 = vector.shape_cast %265 : vector<8xf32> to vector<8x1xf32>
    %cst_89 = arith.constant 0.0322580636 : f32
    %267 = vector.broadcast %cst_89 : f32 to vector<8x1xf32>
    %268 = arith.mulf %266, %267 : vector<8x1xf32>
    %269 = math.sqrt %268 : vector<8x1xf32>
    %cst_90 = arith.constant 9.99999997E-7 : f32
    %270 = vector.broadcast %cst_90 : f32 to vector<8x1xf32>
    %271 = arith.addf %269, %270 : vector<8x1xf32>
    %272 = tpu.reciprocal %271 : vector<8x1xf32> -> vector<8x1xf32>
    %273 = vector.extract_strided_slice %0 {offsets = [2, 0], sizes = [1, 32], strides = [1, 1]} : vector<3x32xf32> to vector<1x32xf32>
    %274 = vector.shape_cast %273 : vector<1x32xf32> to vector<32xf32>
    %275 = vector.shape_cast %274 : vector<32xf32> to vector<1x32xf32>
    %276 = vector.broadcast %261 : vector<8x1xf32> to vector<8x32xf32>
    %277 = arith.subf %257, %276 : vector<8x32xf32>
    %278 = vector.broadcast %272 : vector<8x1xf32> to vector<8x32xf32>
    %279 = arith.mulf %277, %278 : vector<8x32xf32>
    %280 = vector.broadcast %275 : vector<1x32xf32> to vector<8x32xf32>
    %281 = arith.mulf %280, %279 : vector<8x32xf32>
    %282 = vector.extract_strided_slice %1 {offsets = [2, 0], sizes = [1, 32], strides = [1, 1]} : vector<3x32xf32> to vector<1x32xf32>
    %283 = vector.shape_cast %282 : vector<1x32xf32> to vector<32xf32>
    %284 = vector.shape_cast %283 : vector<32xf32> to vector<1x32xf32>
    %285 = vector.broadcast %284 : vector<1x32xf32> to vector<8x32xf32>
    %286 = arith.addf %281, %285 : vector<8x32xf32>
    %287 = arith.truncf %286 : vector<8x32xf32> to vector<8x32xbf16>
    %c0_91 = arith.constant 0 : index
    %c0_92 = arith.constant 0 : index
    %288 = vector.load %arg11[%c0_91, %c0_92] : memref<32x64xbf16, #tpu.memory_space<vmem>>, vector<32x64xbf16>
    %cst_93 = arith.constant dense<0.000000e+00> : vector<8x64xf32>
    %289 = tpu.matmul %287, %288, %cst_93 {dimension_numbers = #tpu.dot_dimension_numbers<[1], [0], [0], [1], [0, 0, 1, 1], [], []>} : vector<8x32xbf16>, vector<32x64xbf16>, vector<8x64xf32> -> vector<8x64xf32>
    %c0_94 = arith.constant 0 : index
    %c0_95 = arith.constant 0 : index
    %290 = vector.load %arg12[%c0_94, %c0_95] : memref<1x64xf32, #tpu.memory_space<vmem>>, vector<1x64xf32>
    %291 = vector.broadcast %290 : vector<1x64xf32> to vector<8x64xf32>
    %292 = arith.addf %289, %291 : vector<8x64xf32>
    %cst_96 = arith.constant 0.000000e+00 : f32
    %293 = vector.broadcast %cst_96 : f32 to vector<8x64xf32>
    %294 = arith.maximumf %292, %293 : vector<8x64xf32>
    %295 = arith.truncf %294 : vector<8x64xf32> to vector<8x64xbf16>
    %c0_97 = arith.constant 0 : index
    %c0_98 = arith.constant 0 : index
    %296 = vector.load %arg13[%c0_97, %c0_98] : memref<64x32xbf16, #tpu.memory_space<vmem>>, vector<64x32xbf16>
    %cst_99 = arith.constant dense<0.000000e+00> : vector<8x32xf32>
    %297 = tpu.matmul %295, %296, %cst_99 {dimension_numbers = #tpu.dot_dimension_numbers<[1], [0], [0], [1], [0, 0, 1, 1], [], []>} : vector<8x64xbf16>, vector<64x32xbf16>, vector<8x32xf32> -> vector<8x32xf32>
    %298 = arith.addf %257, %297 : vector<8x32xf32>
    %c0_100 = arith.constant 0 : index
    %c0_101 = arith.constant 0 : index
    %299 = vector.load %arg14[%c0_100, %c0_101] : memref<1x32xf32, #tpu.memory_space<vmem>>, vector<1x32xf32>
    %300 = vector.broadcast %299 : vector<1x32xf32> to vector<8x32xf32>
    %301 = arith.addf %298, %300 : vector<8x32xf32>
    %c0_102 = arith.constant 0 : index
    %c0_103 = arith.constant 0 : index
    %c0_104 = arith.constant 0 : index
    %302 = vector.load %arg15[%c0_102, %c0_103, %c0_104] : memref<1x8x32xf32, #tpu.memory_space<vmem>>, vector<1x8x32xf32>
    %303 = vector.shape_cast %302 : vector<1x8x32xf32> to vector<8x32xf32>
    %304 = vector.shape_cast %301 : vector<8x32xf32> to vector<1x8x32xf32>
    tpu.vector_store %arg15[%c0_102, %c0_103, %c0_104], %304 {strides = array<i32>} : memref<1x8x32xf32, #tpu.memory_space<vmem>>, vector<1x8x32xf32>,
    return
  }
  func.func @transform_0(%arg0: i32, %arg1: i32) -> (i32, i32, i32) {
    %c0_i32 = arith.constant 0 : i32
    %c0_i32_0 = arith.constant 0 : i32
    %c0_i32_1 = arith.constant 0 : i32
    return %arg0, %c0_i32, %c0_i32_0 : i32, i32, i32
  }
  func.func @transform_1(%arg0: i32, %arg1: i32) -> (i32, i32, i32) {
    %c0_i32 = arith.constant 0 : i32
    %c0_i32_0 = arith.constant 0 : i32
    %c0_i32_1 = arith.constant 0 : i32
    return %arg0, %c0_i32, %c0_i32_0 : i32, i32, i32
  }
  func.func @transform_2(%arg0: i32, %arg1: i32) -> (i32, i32) {
    %c0_i32 = arith.constant 0 : i32
    %c0_i32_0 = arith.constant 0 : i32
    %c0_i32_1 = arith.constant 0 : i32
    return %c0_i32, %c0_i32_0 : i32, i32
  }
  func.func @transform_3(%arg0: i32, %arg1: i32) -> (i32, i32, i32) {
    %c0_i32 = arith.constant 0 : i32
    %c0_i32_0 = arith.constant 0 : i32
    %c0_i32_1 = arith.constant 0 : i32
    return %arg0, %c0_i32, %c0_i32_0 : i32, i32, i32
  }
  func.func @transform_4(%arg0: i32, %arg1: i32) -> (i32, i32, i32) {
    %c0_i32 = arith.constant 0 : i32
    %c0_i32_0 = arith.constant 0 : i32
    %c0_i32_1 = arith.constant 0 : i32
    return %arg0, %c0_i32, %c0_i32_0 : i32, i32, i32
  }
  func.func @transform_5(%arg0: i32, %arg1: i32) -> (i32, i32) {
    %c0_i32 = arith.constant 0 : i32
    %c0_i32_0 = arith.constant 0 : i32
    %c0_i32_1 = arith.constant 0 : i32
    return %c0_i32, %c0_i32_0 : i32, i32
  }
  func.func @transform_6(%arg0: i32, %arg1: i32) -> (i32, i32) {
    %c0_i32 = arith.constant 0 : i32
    %c0_i32_0 = arith.constant 0 : i32
    %c0_i32_1 = arith.constant 0 : i32
    return %c0_i32, %c0_i32_0 : i32, i32
  }
  func.func @transform_7(%arg0: i32, %arg1: i32) -> (i32, i32, i32) {
    %c0_i32 = arith.constant 0 : i32
    %c0_i32_0 = arith.constant 0 : i32
    %c0_i32_1 = arith.constant 0 : i32
    %c0_i32_2 = arith.constant 0 : i32
    return %c0_i32, %c0_i32_0, %c0_i32_1 : i32, i32, i32
  }
  func.func @transform_8(%arg0: i32, %arg1: i32) -> (i32, i32) {
    %c0_i32 = arith.constant 0 : i32
    %c0_i32_0 = arith.constant 0 : i32
    %c0_i32_1 = arith.constant 0 : i32
    return %c0_i32, %c0_i32_0 : i32, i32
  }
  func.func @transform_9(%arg0: i32, %arg1: i32) -> (i32, i32) {
    %c0_i32 = arith.constant 0 : i32
    %c0_i32_0 = arith.constant 0 : i32
    %c0_i32_1 = arith.constant 0 : i32
    return %c0_i32, %c0_i32_0 : i32, i32
  }
  func.func @transform_10(%arg0: i32, %arg1: i32) -> (i32, i32) {
    %c0_i32 = arith.constant 0 : i32
    %c0_i32_0 = arith.constant 0 : i32
    %c0_i32_1 = arith.constant 0 : i32
    return %c0_i32, %c0_i32_0 : i32, i32
  }
  func.func @transform_11(%arg0: i32, %arg1: i32) -> (i32, i32) {
    %c0_i32 = arith.constant 0 : i32
    %c0_i32_0 = arith.constant 0 : i32
    %c0_i32_1 = arith.constant 0 : i32
    return %c0_i32, %c0_i32_0 : i32, i32
  }
  func.func @transform_12(%arg0: i32, %arg1: i32) -> (i32, i32) {
    %c0_i32 = arith.constant 0 : i32
    %c0_i32_0 = arith.constant 0 : i32
    %c0_i32_1 = arith.constant 0 : i32
    return %c0_i32, %c0_i32_0 : i32, i32
  }
  func.func @transform_13(%arg0: i32, %arg1: i32) -> (i32, i32, i32) {
    %c0_i32 = arith.constant 0 : i32
    %c0_i32_0 = arith.constant 0 : i32
    return %arg0, %arg1, %c0_i32 : i32, i32, i32
  }
}

</mosaic_0001>

<bundles_post_ra>
// kernel: tpu_custom_call.1
= control target key start
LH: loop header
LB: loop body
LE: loop exit
PB: predicated region body
PF: predicated region fallthrough
CT: control target
= control target key end

     0   :  { %s6566_s0 = inlined_call_operand.vmem [shape: f32[2,16,32], index: 0, kind: input, shape index: {}]   ;;  %s6567_s1 = inlined_call_operand.vmem [shape: bf16[2,16,32], index: 1, kind: input, shape index: {}]   ;;  %s6568_s2 = inlined_call_operand.hbm [shape: f32[16,32], index: 2, kind: input, shape index: {}]   ;;  %s6569_s3 = inlined_call_operand.hbm [shape: s32[2,1,16], index: 3, kind: input, shape index: {}]   ;;  %s6570_s4 = inlined_call_operand.hbm [shape: s32[2,1,16], index: 4, kind: input, shape index: {}]   ;;  %s6571_s5 = inlined_call_operand.vmem [shape: f32[3,32], index: 5, kind: input, shape index: {}]   ;;  %s6572_s6 = inlined_call_operand.hbm [shape: f32[3,32], index: 6, kind: input, shape index: {}]   ;;  %s6573_s7 = inlined_call_operand.hbm [shape: bf16[8,32,32], index: 7, kind: input, shape index: {}]   ;;  %s6574_s8 = inlined_call_operand.hbm [shape: f32[8,32], index: 8, kind: input, shape index: {}]   ;;  %s6575_s9 = inlined_call_operand.hbm [shape: bf16[32,64], index: 9, kind: input, shape index: {}]   ;;  %s6576_s10 = inlined_call_operand.hbm [shape: f32[1,64], index: 10, kind: input, shape index: {}]   ;;  %s6577_s11 = inlined_call_operand.vmem [shape: bf16[64,32], index: 11, kind: input, shape index: {}]   ;;  %s6578_s12 = inlined_call_operand.vmem [shape: f32[1,32], index: 12, kind: input, shape index: {}]   ;;  %s6579_s13 = inlined_call_operand.hbm [shape: f32[2,16,32], index: 13, kind: output, shape index: {}]  }
   0x1   :  { %6603 = sst [smem:[#allocation37_spill]] %s6566_s0 }
   0x2   :  { %6604 = sst [smem:[#allocation38_spill]] %s6567_s1 }
   0x3   :  { %6605 = sst [smem:[#allocation39_spill]] %s6568_s2 }
   0x4   :  { %6606 = sst [smem:[#allocation40_spill]] %s6571_s5 }
   0x5   :  { %6607 = sst [smem:[#allocation41_spill]] %s6572_s6 }
   0x6   :  { %6608 = sst [smem:[#allocation42_spill]] %s6574_s8 }
   0x7   :  { %6609 = sst [smem:[#allocation43_spill]] %s6577_s11 }
   0x8   :  { %6610 = sst [smem:[#allocation44_spill]] %s6578_s12 }
   0x9   :  { %6611 = sst [smem:[#allocation45_spill]] %s6579_s13 }
   0xa   :  { %18 = vsyncpa [#allocation7], 0 }
   0xb   :  { %19 = vsyncpa [#allocation10], 0 }
   0xc   :  { %21 = vsyncpa [#allocation10 + $0x1], 0 }
   0xd   :  { %22 = vsyncpa [#allocation13], 0 }
   0xe   :  { %23 = vsyncpa [#allocation16], 0 }
   0xf   :  { %24 = vsyncpa [#allocation19], 0 }
  0x10   :  { %25 = vsyncpa [#allocation8], 0 }
  0x11   :  { %27 = vsyncpa [#allocation8 + $0x1], 0  ;;  %s5496_s25 = smov 0   ;;  %s5498_s26 = smov 0  }
  0x12   :  { %s5500_s27 = smov 0   ;;  %s5502_s28 = smov 0  }
  0x13   :  { %s5504_s29 = smov 0   ;;  %s5506_s30 = smov 0  }
  0x14   :  { %s5508_s14 = smov 0   ;;  %s5510_s15 = smov 0  }
  0x15   :  { %s5512_s16 = smov 0   ;;  %s5514_s17 = smov 0  }
  0x16   :  { %s5516_s18 = smov 0  }
  0x17 LB: > { %6612 = sst [smem:[#allocation27_spill]] %s5382_s14  ;;  %s5400_s19 = smov [#allocation12]   ;;  %s5398_s18 = sphi %s5516_s18, %s33_s18   ;;  %s5394_s17 = sphi %s5514_s17, %s6673_s17   ;;  %s5390_s16 = sphi %s5512_s16, %s6672_s16   ;;  %s5386_s15 = sphi %s5510_s15, %s6671_s15   ;;  %s5382_s14 = sphi %s5508_s14, %s6670_s14   ;;  %s5378_s30 = sphi %s5506_s30, %s6679_s30   ;;  %s5374_s29 = sphi %s5504_s29, %s6678_s29   ;;  %s5370_s28 = sphi %s5502_s28, %s6677_s28   ;;  %s5366_s27 = sphi %s5500_s27, %s6676_s27   ;;  %s5362_s26 = sphi %s5498_s26, %s6675_s26   ;;  %s5358_s25 = sphi %s5496_s25, %s6674_s25  }
  0x18   : > { %6613 = sst [smem:[#allocation28_spill]] %s5386_s15  ;;  %s400_s20 = sshll.u32 %s5400_s19, 4  ;;  %s401_s20 = int_to_ptr.vmem [resolvable:$true] %s400_s20 }
  0x19   : > { %6614 = sst [smem:[#allocation29_spill]] %s5390_s16  ;;  %s5552_s21 = sadd.s32 4294967295, %s5398_s18  }
  0x1a   : > { %6615 = sst [smem:[#allocation30_spill]] %s5394_s17  ;;  %p4244_p0 = scmp.ge.s32.totalorder %s5398_s18, 1 }
  0x1b   : > { %p6583_p1 = scmp.eq.s32.totalorder %s5552_s21, 0  ;;  %p371_p2 = scmp.lt.s32.totalorder %s5398_s18, 5 }
  0x1c   : > { %s5401_s23 = smov [#allocation15]   ;;  %s5061_s12 = scalar_lea.vmem %s401_s20, 64 }
  0x1d   : > { %p5557_p3 = pnand %p4244_p0, %p371_p2  ;;  %s424_s24 = sshll.u32 %s5401_s23, 4  ;;  %s425_s24 = int_to_ptr.vmem [resolvable:$true] %s424_s24 }
  0x1e   : > { %p5062_p7 = scmp.ne.s32.totalorder %s401_s20, %s5061_s12  ;;  %p5069_p10 = scmp.lt.s32.totalorder %s401_s20, %s401_s20 }
  0x1f   : > { %s6616_s22 = scalar_select %p5557_p3, 1, 0 }
  0x20   : > { %p4772_p4 = pneg %p5557_p3  ;;  %p5070_p11 = scmp.lt.s32.totalorder %s5061_s12, %s5061_s12 }
  0x22   : > { %p5565_p5 = pnand %p4772_p4, %p6583_p1  ;;  %p5071_p12 = por %p5070_p11, %p5069_p10 }
  0x24   : > { %s6617_s19 = scalar_select %p5565_p5, 1, 0 }
  0x25   : > { %p5571_p6 = pneg %p5565_p5 }
  0x27   : > { %p5064_p8 = pnand %p5062_p7, %p5571_p6 }
  0x29   : > { %p5065_p9 = pneg %p5064_p8 }
  0x2b   : > { %p5072_p13 = pnand %p5071_p12, %p5065_p9 }
  0x2d   : > { %5075 = shalt.err (!%p5072_p13)
}
  0x2e   : > { %s6619_s6 = sld [smem:[#allocation41_spill]]  ;;  %s5087_s14 = scalar_lea.vmem %s425_s24, 128 }
  0x2f   : > { %p5088_p0 = scmp.ne.s32.totalorder %s425_s24, %s5087_s14  ;;  %p5095_p1 = scmp.lt.s32.totalorder %s425_s24, %s425_s24 }
  0x30   : > { %p5096_p7 = scmp.lt.s32.totalorder %s5087_s14, %s5087_s14 }
  0x31   : > { %p5090_p2 = pnand %p5088_p0, %p5571_p6 }
  0x32   : > { %p5097_p8 = por %p5096_p7, %p5095_p1 }
  0x33   : > { %p5091_p4 = pneg %p5090_p2 }
  0x34   : > { %4778 = dma.hbm_to_vmem [thread:$0]  (!%p5565_p5), %s6619_s6, 64, %s401_s20, [#allocation13]  }
  0x35   : > { %p5098_p3 = pnand %p5097_p8, %p5091_p4 }
  0x37   : > { %5101 = shalt.err (!%p5098_p3)
}
  0x38   : > { %s6620_s8 = sld [smem:[#allocation42_spill]]  ;;  %s4243_s11 = sadd.s32 4294967294, %s5398_s18  }
  0x39   : > { %s42_s14 = sadd.s32 1, %s5390_s16  ;;  %s45_s5 = sadd.s32 1, %s5394_s17 }
  0x3a   : > { %p43_p1 = scmp.ge.s32.totalorder %s42_s14, 2  ;;  %s125_s20 = sadd.s32 1, %s5378_s30 }
  0x3b   : > { %p132_p3 = scmp.ne.s32.totalorder %s5378_s30, %s5374_s29  ;;  %p133_p9 = scmp.eq.s32.totalorder %s5398_s18, 0 }
  0x3c   : > { %s6681_s14 = smov (%p43_p1, %s42_s14), 0  ;;  %s6683_s5 = smov (!%p43_p1, %s45_s5), %s5394_s17 }
  0x3d   : > { %6621 = sst [smem:[#allocation31_spill]] %s6681_s14  ;;  %p138_p10 = scmp.ne.s32.totalorder %s5374_s29, %s5370_s28 }
  0x3e   : > { %4784 = dma.hbm_to_vmem [thread:$0]  (!%p5565_p5), %s6620_s8, 128, %s425_s24, [#allocation16]  }
  0x3f   : > { %p47_p11 = scmp.ge.s32.totalorder %s6683_s5, 2  ;;  %s343_s24 = ssub.s32 %s5390_s16, %s6681_s14 }
  0x40   : > { %p5603_p12 = por %p133_p9, %p132_p3  ;;  %p6623_p13 = scmp.eq.s32.totalorder %s5552_s21, 0 }
  0x41   : > { %s6685_s5 = smov (%p47_p11, %s6683_s5), 0  ;;  %s347_s28 = sadd.s32 1, %s5366_s27 }
  0x42   : > { %p5609_p0 = por %p6623_p13, %p138_p10  ;;  %6626 = sst [smem:[#allocation33_spill]] %s6685_s5 }
  0x43   : > { %p357_p2 = scmp.ne.s32.totalorder %s5366_s27, %s5362_s26  ;;  %s122_s6 = ssub.s32 %s5394_s17, %s6685_s5 }
  0x44   : > { %s6624_s12 = scalar_select %p5609_p0, 1, 0 }
  0x45   : > { %p358_p4 = scmp.eq.s32.totalorder %s5552_s21, 3  ;;  %p123_p7 = scmp.eq.s32.totalorder %s122_s6, 0 }
  0x46   : > { %6625 = sst [smem:[#allocation32_spill]] %s6624_s12  ;;  %s344_s8 = sor.u32 %s343_s24, %s122_s6 }
  0x47   : > { %p345_p8 = scmp.eq.s32.totalorder %s344_s8, 0  ;;  %p5621_p1 = por %p358_p4, %p357_p2 }
  0x48   : > { %s5626_s16 = scalar_select %p123_p7, %s5378_s30, %s125_s20  }
  0x49   : > { %s6627_s14 = scalar_select %p5621_p1, 1, 0 }
  0x4a   : > { %6629 = sst [smem:[#allocation35_spill]] %s5626_s16  ;;  %p363_p3 = scmp.ne.s32.totalorder %s5362_s26, %s5358_s25 }
  0x4b   : > { %6628 = sst [smem:[#allocation34_spill]] %s6627_s14  ;;  %p364_p9 = scmp.eq.s32.totalorder %s4243_s11, 3 }
  0x4c   : > { %s5629_s1 = scalar_select %p345_p8, %s5366_s27, %s347_s28  }
  0x4d   : > { %p4808_p10 = scmp.lt.s32.totalorder %s5398_s18, 4  ;;  %s481_s0 = sand.u32 1, %s5398_s18  }
  0x4e   : > { %6630 = sst [smem:[#allocation36_spill]] %s5629_s1  ;;  %p5635_p11 = por %p364_p9, %p363_p3 }
  0x4f   : > { %s6599_s15 = sand.u32 1, %s5378_s30   ;;  %s4252_s12 = sshll.u32 %s5394_s17, 4 }
  0x50   : > { %s6631_s5 = scalar_select %p5635_p11, 1, 0 }
  0x51   : > { %s489_s24 = scalar_lea.hbm %s6569_s3, %s4252_s12  ;;  %s484_s14 = scalar_lea.vmem [#allocation9], %s6599_s15 }
  0x52   : > { %s491_s20 = sshll.u32 %s484_s14, 4  ;;  %p5648_p13 = pnand %p4808_p10, %p5603_p12  ;;  %s492_s20 = int_to_ptr.vmem [resolvable:$true] %s491_s20 }
  0x53   : > { %s5655_s1 = scalar_lea.hbm %s6570_s4, %s4252_s12  ;;  %s5657_s17 = scalar_lea.sflag [#allocation10], %s481_s0 }
  0x54   : > { %s6632_s28 = scalar_select %p5648_p13, 1, 0 }
  0x55   : > { %p6594_p2 = pneg %p5648_p13  ;;  %s5115_s6 = scalar_lea.vmem %s492_s20, 16 }
  0x56   : > { %p5116_p4 = scmp.ne.s32.totalorder %s492_s20, %s5115_s6  ;;  %s5402_s14 = smov [#allocation9]  }
  0x57   : > { %s5120_s23 = sshll.u32 %s5402_s14, 4  ;;  %s5121_s23 = int_to_ptr.vmem [resolvable:$false] %s5120_s23 }
  0x58   : > { %p5118_p12 = pnand %p5116_p4, %p6594_p2  ;;  %s5122_s8 = scalar_lea.vmem %s5121_s23, 32 }
  0x59   : > { %p5123_p8 = scmp.lt.s32.totalorder %s492_s20, %s5121_s23  ;;  %p5124_p3 = scmp.lt.s32.totalorder %s5122_s8, %s5115_s6 }
  0x5a   : > { %p5119_p7 = pneg %p5118_p12 }
  0x5b   : > { %p5125_p9 = por %p5124_p3, %p5123_p8 }
  0x5d   : > { %p5126_p10 = pnand %p5125_p9, %p5119_p7 }
  0x5f   : > { %5129 = shalt.err (!%p5126_p10)
}
  0x60   : > { %4794 = dma.hbm_to_vmem [thread:$0]  (!%p5648_p13), %s489_s24, 16, %s492_s20, %s5657_s17  }
  0x61   : > { %s5403_s0 = smov [#allocation6]  }
  0x62   : > { %s383_s16 = sshll.u32 %s5403_s0, 4  ;;  %s384_s16 = int_to_ptr.vmem [resolvable:$true] %s383_s16 }
  0x63   : > { %s5141_s12 = scalar_lea.vmem %s384_s16, 256  ;;  %p5149_p11 = scmp.lt.s32.totalorder %s384_s16, %s384_s16 }
  0x64   : > { %p5142_p4 = scmp.ne.s32.totalorder %s384_s16, %s5141_s12  ;;  %p5150_p1 = scmp.lt.s32.totalorder %s5141_s12, %s5141_s12 }
  0x66   : > { %p5144_p12 = pnand %p5142_p4, %p5571_p6  ;;  %p5151_p0 = por %p5150_p1, %p5149_p11 }
  0x68   : > { %p5145_p2 = pneg %p5144_p12 }
  0x6a   : > { %p5152_p5 = pnand %p5151_p0, %p5145_p2 }
  0x6c   : > { %5155 = shalt.err (!%p5152_p5)
}
  0x6d   : > { %s5404_s11 = smov 128   ;;  %s5405_s6 = smov 8  }
  0x6e   : > { %p6633_p7 = scmp.ne.s32.totalorder %s6617_s19, 0  ;;  %s6634_s2 = sld [smem:[#allocation39_spill]] }
  0x6f   : > { %s5406_s20 = smov [#allocation14]  }
  0x70   : > { %s410_s23 = sshll.u32 %s5406_s20, 4  ;;  %s411_s23 = int_to_ptr.vmem [resolvable:$true] %s410_s23 }
  0x71   : > { %s5167_s8 = scalar_lea.vmem %s411_s23, 2048  ;;  %p5175_p1 = scmp.lt.s32.totalorder %s411_s23, %s411_s23 }
  0x72   : > { %p5168_p8 = scmp.ne.s32.totalorder %s411_s23, %s5167_s8  ;;  %p5176_p0 = scmp.lt.s32.totalorder %s5167_s8, %s5167_s8 }
  0x74   : > { %4775 = dma.hbm_to_vmem [thread:$0]  (!%p6633_p7), %s6634_s2, 256, %s384_s16, [#allocation7], %s5404_s11, %s5404_s11, %s5405_s6  }
  0x75   : > { %p5170_p3 = pnand %p5168_p8, %p5571_p6  ;;  %p5177_p5 = por %p5176_p0, %p5175_p1 }
  0x77   : > { %p5171_p9 = pneg %p5170_p3 }
  0x79   : > { %p5178_p11 = pnand %p5177_p5, %p5171_p9 }
  0x7b   : > { %5181 = shalt.err (!%p5178_p11)
}
  0x7c   : > { %s5407_s0 = smov 64   ;;  %s5408_s12 = smov 4  }
  0x7d   : > { %4781 = dma.hbm_to_vmem [thread:$0]  (!%p6633_p7), %s6573_s7, 2048, %s411_s23, [#allocation13], %s5407_s0, %s5407_s0, %s5408_s12  }
  0x7e   : > { %s5409_s11 = smov [#allocation17]   ;;  %s5410_s24 = smov [#allocation18]  }
  0x7f   : > { %s434_s6 = sshll.u32 %s5409_s11, 4  ;;  %s448_s20 = sshll.u32 %s5410_s24, 4  ;;  %s435_s6 = int_to_ptr.vmem [resolvable:$true] %s434_s6  ;;  %s449_s20 = int_to_ptr.vmem [resolvable:$true] %s448_s20 }
  0x80   : > { %s5193_s15 = scalar_lea.vmem %s435_s6, 256  ;;  %p5201_p12 = scmp.lt.s32.totalorder %s435_s6, %s435_s6 }
  0x81   : > { %p5194_p2 = scmp.ne.s32.totalorder %s435_s6, %s5193_s15  ;;  %p5202_p8 = scmp.lt.s32.totalorder %s5193_s15, %s5193_s15 }
  0x83   : > { %p5196_p10 = pnand %p5194_p2, %p5571_p6  ;;  %p5203_p3 = por %p5202_p8, %p5201_p12 }
  0x85   : > { %p5197_p4 = pneg %p5196_p10 }
  0x87   : > { %p5204_p9 = pnand %p5203_p3, %p5197_p4 }
  0x89   : > { %5207 = shalt.err (!%p5204_p9)
}
  0x8a   : > { %4787 = dma.hbm_to_vmem [thread:$0]  (!%p6633_p7), %s6575_s9, 256, %s435_s6, [#allocation16], %s5407_s0, %s5407_s0, %s5408_s12  }
  0x8b   : > { %s5219_s14 = scalar_lea.vmem %s449_s20, 16  ;;  %s5226_s16 = scalar_lea.vmem %s449_s20, 32 }
  0x8c   : > { %p5220_p1 = scmp.ne.s32.totalorder %s449_s20, %s5219_s14  ;;  %p5227_p11 = scmp.lt.s32.totalorder %s449_s20, %s449_s20 }
  0x8d   : > { %p5228_p2 = scmp.lt.s32.totalorder %s5226_s16, %s5219_s14 }
  0x8e   : > { %p5222_p0 = pnand %p5220_p1, %p5571_p6 }
  0x8f   : > { %p5229_p10 = por %p5228_p2, %p5227_p11 }
  0x90   : > { %p5223_p5 = pneg %p5222_p0 }
  0x92   : > { %p5230_p13 = pnand %p5229_p10, %p5223_p5 }
  0x94   : > { %5233 = shalt.err (!%p5230_p13)
}
  0x95   : > { %4790 = dma.hbm_to_vmem [thread:$0]  (!%p6633_p7), %s6576_s10, 16, %s449_s20, [#allocation19]  }
  0x96   : > { %s6635_s0 = sand.u32 1, %s5378_s30   ;;  %p6636_p4 = scmp.ne.s32.totalorder %s6632_s28, 0 }
  0x97   : > { %s501_s12 = scalar_lea.vmem [#allocation11], %s6635_s0  ;;  %s5411_s24 = smov [#allocation11]  }
  0x98   : > { %s508_s6 = sshll.u32 %s501_s12, 4  ;;  %p6637_p12 = pneg %p6636_p4  ;;  %s509_s6 = int_to_ptr.vmem [resolvable:$true] %s508_s6 }
  0x99   : > { %s5247_s13 = scalar_lea.vmem %s509_s6, 16  ;;  %s5252_s8 = sshll.u32 %s5411_s24, 4  ;;  %s5253_s8 = int_to_ptr.vmem [resolvable:$false] %s5252_s8 }
  0x9a   : > { %p5248_p6 = scmp.ne.s32.totalorder %s509_s6, %s5247_s13  ;;  %s5254_s19 = scalar_lea.vmem %s5253_s8, 32 }
  0x9b   : > { %p5255_p13 = scmp.lt.s32.totalorder %s509_s6, %s5253_s8  ;;  %p5256_p9 = scmp.lt.s32.totalorder %s5254_s19, %s5247_s13 }
  0x9c   : > { %p5250_p8 = pnand %p5248_p6, %p6637_p12 }
  0x9d   : > { %p5257_p1 = por %p5256_p9, %p5255_p13 }
  0x9e   : > { %p5251_p3 = pneg %p5250_p8 }
  0xa0   : > { %p5258_p0 = pnand %p5257_p1, %p5251_p3 }
  0xa2   : > { %5261 = shalt.err (!%p5258_p0)
}
  0xa3   : > { %4797 = dma.hbm_to_vmem [thread:$0]  (!%p6636_p4), %s5655_s1, 16, %s509_s6, %s5657_s17  }
  0xa4   : > { %p6638_p7 = scmp.ne.s32.totalorder %s6616_s22, 0 }
  0xa5   : > { %p6639_p5 = scmp.eq.s32.totalorder (!%p6638_p7), %s5552_s21, 0 }
  0xa6   : > { %517 = sbr.rel (%p6638_p7) target bundleno = 5827 (0x16c3), region = 72 }
  0xab   : > { %5333 = dma.done.wait (%p6639_p5), [#allocation7], 256   ;;  %p6640_p11 = pmov %p6639_p5 }
  0xac   : > { %s6641_s20 = sld [smem:[#allocation32_spill]]  ;;  %s523_s23 = sand.u32 1, %s5552_s21  }
  0xad   : > { %5335 = vsyncadd (%p6640_p11), [#allocation7], 4294967040  ;;  %s525_s14 = sand.u32 1, %s5374_s29   ;;  %s524_s16 = scalar_lea.sflag [#allocation10], %s523_s23 }
  0xae   : > { %s5712_s15 = scalar_lea.vmem [#allocation9], %s525_s14 }
  0xb2   : > { %p6642_p2 = scmp.ne.s32.totalorder %s6641_s20, 0 }
  0xb4   : > { %5337 = dma.done.wait (%p6642_p2), %s524_s16, 32  }
  0xb5   : > { %5339 = vsyncadd (%p6642_p2), %s524_s16, 4294967264  ;;  %s5718_s1 = scalar_lea.vmem [#allocation11], %s525_s14  ;;  %p6643_p10 = pmov %p6639_p5 }
  0xb6   : > { %p6644_p6 = pmov %p6639_p5 }
  0xb7   : > { %5341 = dma.done.wait (%p6643_p10), [#allocation13], 2112  }
  0xb8   : > { %5343 = vsyncadd (%p6644_p6), [#allocation13], 4294965184  ;;  %p6645_p4 = pmov %p6639_p5 }
  0xba   : > { %5345 = dma.done.wait (%p6645_p4), [#allocation16], 384   ;;  %p6646_p12 = pmov %p6645_p4 }
  0xbb   : > { %p6647_p8 = pmov %p6645_p4 }
  0xbc   : > { %5347 = vsyncadd (%p6646_p12), [#allocation16], 4294966912 }
  0xbd   : > { %5349 = dma.done.wait (%p6647_p8), [#allocation19], 16   ;;  %p6648_p3 = pmov %p6645_p4 }
  0xbe   : > { %s6649_s17 = sld [smem:[#allocation28_spill]]  ;;  %s6602_s22 = sand.u32 1, %s5362_s26   ;;  %v5754_v1 = vld [vmem:[#allocation12] sm:$0x7] }
  0xbf   : > { %5351 = vsyncadd (%p6648_p3), [#allocation19], 4294967280  ;;  %s5736_s28 = sshll.u32 %s6602_s22, 3  ;;  %s6650_s13 = sld [smem:[#allocation37_spill]] }
  0xc0   : > { %s6651_s19 = sld [smem:[#allocation38_spill]]  ;;  %s609_s22 = scalar_lea.vmem [#allocation20], %s5736_s28 }
  0xc1   : > { %s6652_s16 = sld [smem:[#allocation40_spill]] }
  0xc2   : > { %s6653_s2 = sld [smem:[#allocation27_spill]] }
  0xc4   : > { %p610_p13 = scmp.lt.s32.totalorder %s6649_s17, 1 }
  0xc6   : > { %s6687_s17 = smov (!%p610_p13, %s6649_s17), 1 }
  0xc7   : > { %s4360_s11 = sshll.u32 %s6687_s17, 4  ;;  %s4361_s0 = sshll.u32 %s6687_s17, 3  ;;  %v5752_v0 = vld [vmem:[%s6652_s16] sm:$0x7] }
  0xc8   : > { %s5742_s24 = scalar_lea.vmem %s6650_s13, %s4360_s11  ;;  %s5747_s20 = scalar_lea.vmem %s6651_s19, %s4361_s0 }
  0xc9   : > { %p4266_p9 = scmp.ne.s32.totalorder %s6653_s2, 0 }
  0xcb   : > { %626 = sbr.rel (%p4266_p9) target bundleno = 754 (0x2f2), region = 108 }
  0xd0   : > { %v627_v2 = vld [vmem:[%s5742_s24] sm:$0xff]  ;;  %vm633_vm0 = vcmask 261120   ;;  %v628_v4 = vld [vmem:[%s5742_s24 + $0x8] sm:$0xff]  ;;  %v4927_v20 = vld [vmem:[#allocation14 + $0x18] sm:$0xff]   ;;  %v5412_v22 = vmov 0.0   ;;  %vm5413_vm1 = vmmov 0   ;;  %v675_v41 = vlaneseq }
  0xd1   : > { %v629_v3 = vld [vmem:[#allocation6] sm:$0xff]  ;;  %v630_v6 = vld [vmem:[#allocation6 + $0x8] sm:$0xff]  ;;  %4466 = vmatprep.subr.bf16.mxu0 %v5412_v22  ;;  %4474 = vmatprep.subr.bf16.mxu1 %v5412_v22  ;;  %v4930_v24 = vld [vmem:[#allocation14 + $0x20] sm:$0xff]   ;;  %vm762_vm6 = vcmask 257024  }
  0xd2   : > { %v631_v5 = vadd.f32 %v629_v3, %v627_v2  ;;  %v632_v7 = vadd.f32 %v630_v6, %v628_v4  ;;  %v4928_v21 = vld [vmem:[#allocation14 + $0x28] sm:$0xff]   ;;  %4467 = vmatpush3.bf16.msra.mxu0 %v4927_v20  ;;  %v4929_v23 = vld [vmem:[#allocation14 + $0x10] sm:$0xff]   ;;  %4470 = vmatprep.mubr.msk.bf16.mxu0 %vm5413_vm1, %v5412_v22  ;;  %v676_v42 = vshrl.u32 %v675_v41, 7  ;;  %v4931_v54 = vld [vmem:[#allocation14 + $0x58] sm:$0xff]  }
  0xd3   : > { %4475 = vmatpush3.bf16.msra.mxu1 %v4928_v21  ;;  %4468 = vmatprep.subr.bf16.mxu0 %v5412_v22  ;;  %v4932_v55 = vld [vmem:[#allocation14 + $0x68] sm:$0xff]   ;;  %v4933_v57 = vld [vmem:[#allocation14 + $0x50] sm:$0xff]   ;;  %v4934_v58 = vld [vmem:[#allocation14 + $0x60] sm:$0xff]  }
  0xd4   : > { %v634_v8 = vsel %vm633_vm0, %v631_v5, 0.0  ;;  %v637_v9 = vsel %vm633_vm0, %v632_v7, 0.0  ;;  %4476 = vmatprep.subr.bf16.mxu1 %v5412_v22  ;;  %4478 = vmatprep.mubr.msk.bf16.mxu1 %vm5413_vm1, %v5412_v22  ;;  %v677_v43 = vsub.s32 0, %v676_v42  ;;  %v4935_v59 = vld [vmem:[%s5747_s20] sm:$0xff]   ;;  %v4267_v60 = vld [vmem:[#allocation15 + $0x1] ss:$0 sm:$0xff] }
  0xd5   : > { %635 = vadd.xlane.f32.xlu0 %v634_v8  ;;  %v4273_v61 = vld [vmem:[#allocation15 + $0x2] ss:$0 sm:$0xff] }
  0xd6   : > { %4469 = vmatpush3.bf16.msra.mxu0 %v4929_v23  ;;  %v678_v46 = vrot.slane %v5752_v0, %v677_v43  ;;  %v684_v50 = vrot.slane %v5754_v1, %v677_v43 }
  0xd7   : > { %4477 = vmatpush3.bf16.msra.mxu1 %v4930_v24  ;;  %4482 = vmatprep.subr.bf16.mxu0 %v5412_v22 }
  0xd8   : > { %4490 = vmatprep.subr.bf16.mxu1 %v5412_v22 }
  0xd9   : > { %638 = vadd.xlane.f32.xlu0 %v637_v9 }
 0x15e   : > { %v636_v10 = vpop.xlane.xlu0 %635 }
 0x15f   : > { %v641_v11 = vmul.f32 0.03125, %v636_v10 }
 0x161   : > { %v643_v12 = vsub.f32 %v631_v5, %v641_v11 }
 0x162   : > { %v639_v13 = vpop.xlane.xlu0 %638 }
 0x163   : > { %v642_v14 = vmul.f32 0.03125, %v639_v13  ;;  %v645_v15 = vmul.f32 %v643_v12, %v643_v12 }
 0x165   : > { %v644_v16 = vsub.f32 %v632_v7, %v642_v14  ;;  %v647_v17 = vsel %vm633_vm0, %v645_v15, 0.0  ;;  %v4279_v14 = vld [vmem:[#allocation15 + $0x5] ss:$0 sm:$0xff]  ;;  %v4286_v15 = vld [vmem:[#allocation15 + $0x6] ss:$0 sm:$0xff] }
 0x166   : > { %648 = vadd.xlane.f32.xlu1 %v647_v17 }
 0x167   : > { %v646_v18 = vmul.f32 %v644_v16, %v644_v16 }
 0x169   : > { %v650_v19 = vsel %vm633_vm0, %v646_v18, 0.0 }
 0x16a   : > { %651 = vadd.xlane.f32.xlu1 %v650_v19 }
 0x1ef   : > { %v649_v25 = vpop.xlane.xlu1 %648 }
 0x1f0   : > { %v653_v26 = vmul.f32 0.032258064, %v649_v25 }
 0x1f2   : > { %4936 = vrsqrt.f32 %v653_v26  ;;  %vm657_vm2 = vcmp.eq.f32.partialorder %v653_v26, inf  ;;  %v660_v31 = vand.u32 2147483648, %v653_v26  ;;  %vm659_vm3 = vcmp.eq.f32.partialorder %v653_v26, 0.0 }
 0x1f3   : > { %v652_v27 = vpop.xlane.xlu1 %651 }
 0x1f4   : > { %v654_v28 = vmul.f32 0.032258064, %v652_v27 }
 0x1f6   : > { %4938 = vrsqrt.f32 %v654_v28  ;;  %vm664_vm4 = vcmp.eq.f32.partialorder %v654_v28, inf  ;;  %v667_v37 = vand.u32 2147483648, %v654_v28  ;;  %vm666_vm5 = vcmp.eq.f32.partialorder %v654_v28, 0.0 }
 0x1ff   : > { %v4937_v29 = vpop.eup %4936 }
 0x200   : > { %v656_v30 = vmul.f32 %v4937_v29, %v653_v26 }
 0x202   : > { %v658_v32 = vsel %vm657_vm2, %v653_v26, %v656_v30 }
 0x203   : > { %v4939_v33 = vpop.eup %4938  ;;  %v661_v34 = vsel %vm659_vm3, %v660_v31, %v658_v32 }
 0x204   : > { %v669_v35 = vadd.f32 1e-06, %v661_v34  ;;  %v663_v36 = vmul.f32 %v4939_v33, %v654_v28 }
 0x206   : > { %4940 = vrcp.f32 %v669_v35  ;;  %v665_v38 = vsel %vm664_vm4, %v654_v28, %v663_v36 }
 0x207   : > { %v668_v39 = vsel %vm666_vm5, %v667_v37, %v665_v38 }
 0x208   : > { %v670_v40 = vadd.f32 1e-06, %v668_v39 }
 0x20a   : > { %4942 = vrcp.f32 %v670_v40 }
 0x213   : > { %v4941_v44 = vpop.eup %4940 }
 0x214   : > { %v673_v45 = vmul.f32 %v4941_v44, %v643_v12 }
 0x216   : > { %v679_v49 = vmul.f32 %v678_v46, %v673_v45 }
 0x217   : > { %v4943_v47 = vpop.eup %4942 }
 0x218   : > { %v674_v48 = vmul.f32 %v4943_v47, %v644_v16  ;;  %v685_v52 = vadd.f32 %v684_v50, %v679_v49 }
 0x21a   : > { %v680_v51 = vmul.f32 %v678_v46, %v674_v48 }
 0x21c   : > { %v686_v53 = vadd.f32 %v684_v50, %v680_v51 }
 0x21e   : > { %v687_v56 = vpack.c.bf16 %v686_v53, %v685_v52 }
 0x220   : > { %4471 = vmatmul.mubr.msk.bf16.vlgmr.msra.gmra.mxu0 %vm633_vm0, %v687_v56  ;;  %4479 = vmatmul.mubr.msk.bf16.vlgmr.msra.gmra.mxu1 %vm633_vm0, %v687_v56 }
 0x221   : > { %4483 = vmatpush3.bf16.msra.mxu0 %v4931_v54  ;;  %4491 = vmatpush3.bf16.msra.mxu1 %v4932_v55 }
 0x222   : > { %4484 = vmatprep.subr.bf16.mxu0 %v5412_v22  ;;  %4492 = vmatprep.subr.bf16.mxu1 %v5412_v22 }
 0x223   : > { %4486 = vmatprep.mubr.msk.bf16.mxu0 %vm5413_vm1, %v5412_v22  ;;  %4494 = vmatprep.mubr.msk.bf16.mxu1 %vm5413_vm1, %v5412_v22 }
 0x225   : > { %4485 = vmatpush3.bf16.msra.mxu0 %v4933_v57  ;;  %4493 = vmatpush3.bf16.msra.mxu1 %v4934_v58 }
 0x228   : > { %4487 = vmatmul.mubr.msk.bf16.vlgmr.msra.gmra.mxu0 %vm633_vm0, %v4935_v59  ;;  %4495 = vmatmul.mubr.msk.bf16.vlgmr.msra.gmra.mxu1 %vm633_vm0, %v4935_v59 }
 0x2e0   : > { %v747_v62 = vpop.f32.mrf.mxu0  ;;  %v821_v63 = vpop.f32.mrf.mxu1 }
 0x2e1   : > { %v748_v2 = vadd.f32 %v4267_v60, %v747_v62  ;;  %v822_v3 = vadd.f32 %v4273_v61, %v821_v63 }
 0x2e2   : > { %v4472_v4 = vpop.f32.mrf.mxu0  ;;  %v4480_v5 = vpop.f32.mrf.mxu1 }
 0x2e3   : > { %v4362_v6 = vpack.c.bf16 %v748_v2, %v748_v2  ;;  %v4364_v7 = vpack.c.bf16 %v822_v3, %v822_v3 }
 0x2e4   : > { %v750_v8 = vpop.f32.mrf.mxu0  ;;  %v824_v9 = vpop.f32.mrf.mxu1 }
 0x2e5   : > { %763 = vst.msk [vmem:[#allocation2] sm:$0xf] %vm762_vm6, %v4362_v6  ;;  %836 = vst.msk [vmem:[#allocation3] sm:$0xf] %vm762_vm6, %v4364_v7  ;;  %v751_v10 = vadd.f32 %v4267_v60, %v750_v8  ;;  %v825_v11 = vadd.f32 %v4273_v61, %v824_v9 }
 0x2e6   : > { %v4473_v12 = vpop.f32.mrf.mxu0  ;;  %v4481_v13 = vpop.f32.mrf.mxu1 }
 0x2e7   : > { %v4363_v16 = vpack.c.bf16 %v751_v10, %v751_v10  ;;  %v4365_v17 = vpack.c.bf16 %v825_v11, %v825_v11 }
 0x2e8   : > { %v904_v18 = vpop.f32.mrf.mxu0  ;;  %v977_v19 = vpop.f32.mrf.mxu1 }
 0x2e9   : > { %764 = vst.msk [vmem:[#allocation2 + $0x4] sm:$0xf] %vm762_vm6, %v4363_v16  ;;  %837 = vst.msk [vmem:[#allocation3 + $0x4] sm:$0xf] %vm762_vm6, %v4365_v17  ;;  %v905_v20 = vadd.f32 %v4279_v14, %v904_v18  ;;  %v978_v21 = vadd.f32 %v4286_v15, %v977_v19 }
 0x2ea   : > { %v4488_v22 = vpop.f32.mrf.mxu0  ;;  %v4496_v23 = vpop.f32.mrf.mxu1 }
 0x2eb   : > { %v4366_v24 = vpack.c.bf16 %v905_v20, %v905_v20  ;;  %v4368_v25 = vpack.c.bf16 %v978_v21, %v978_v21 }
 0x2ec   : > { %v907_v26 = vpop.f32.mrf.mxu0  ;;  %v980_v27 = vpop.f32.mrf.mxu1 }
 0x2ed   : > { %919 = vst.msk [vmem:[#allocation4] sm:$0xf] %vm762_vm6, %v4366_v24  ;;  %992 = vst.msk [vmem:[#allocation5] sm:$0xf] %vm762_vm6, %v4368_v25  ;;  %v908_v28 = vadd.f32 %v4279_v14, %v907_v26  ;;  %v981_v29 = vadd.f32 %v4286_v15, %v980_v27 }
 0x2ee   : > { %v4489_v30 = vpop.f32.mrf.mxu0  ;;  %v4497_v31 = vpop.f32.mrf.mxu1 }
 0x2ef   : > { %v4367_v32 = vpack.c.bf16 %v908_v28, %v908_v28  ;;  %v4369_v33 = vpack.c.bf16 %v981_v29, %v981_v29 }
 0x2f1   : > { %920 = vst.msk [vmem:[#allocation4 + $0x4] sm:$0xf] %vm762_vm6, %v4367_v32  ;;  %993 = vst.msk [vmem:[#allocation5 + $0x4] sm:$0xf] %vm762_vm6, %v4369_v33 }
 0x2f2 PF: > { %s6654_s2 = sld [smem:[#allocation27_spill]]  ;;  %v1002_v34 = vlaneseq  ;;  %vm1018_vm7 = vcmask 261120   ;;  %v4944_v48 = vld [vmem:[#allocation14 + $0x8] sm:$0xff]   ;;  %v5414_v49 = vmov 0.0   ;;  %vm5415_vm9 = vmmov 0   ;;  %v4945_v50 = vld [vmem:[#allocation14] sm:$0xff]  }
 0x2f3   : > { %4498 = vmatprep.subr.bf16.mxu0 %v5414_v49  ;;  %4502 = vmatprep.mubr.msk.bf16.mxu0 %vm5415_vm9, %v5414_v49  ;;  %v1123_v51 = vld [vmem:[#allocation2] sm:$0xf]  ;;  %s5416_s12 = smov 120   ;;  %s5417_s6 = smov 104   ;;  %vm1210_vm12 = vcmask 1043456   ;;  %vm1206_vm13 = vcmask 64512  }
 0x2f4   : > { %v5797_v38 = vshrl.u32 %v1002_v34, 7  ;;  %v5799_v39 = vand.u32 127, %v1002_v34  ;;  %4499 = vmatpush3.bf16.msra.mxu0 %v4944_v48  ;;  %4506 = vmatprep.subr.bf16.mxu1 %v5414_v49  ;;  %s5418_s13 = smov 112   ;;  %v4293_v10 = vld [vmem:[#allocation15] ss:$0 sm:$0xff]  ;;  %v5419_v29 = vmov 0  }
 0x2f5   : > { %4500 = vmatprep.subr.bf16.mxu0 %v5414_v49  ;;  %4508 = vmatprep.mubr.msk.bf16.mxu1 %vm5415_vm9, %v5414_v49  ;;  %v5847_v17 = vld [vmem:[#allocation2 + $0x4] sm:$0xf]  ;;  %v1000_v28 = vld [vmem:[%s5712_s15] sm:$0x1]  ;;  %s5420_s15 = smov 8   ;;  %vm1925_vm1 = vcmask 130112  }
 0x2f6   : > { %1125 = vrot.lane.b32.xlu1 %v1123_v51, %s5416_s12  ;;  %v5824_v60 = vsub.s32 0, %v5797_v38  ;;  %vm1001_vm14 = vcmp.ne.s32.totalorder %v1000_v28, 0  ;;  %s5424_s21 = smov 24   ;;  %vm2367_vm2 = vcmask 130048   ;;  %vm2369_vm3 = vcmask 195584   ;;  %s6659_s19 = sld [smem:[#allocation43_spill]] }
 0x2f7   : > { %v1009_v30 = vsel %vm1001_vm14, 1, %v5419_v29  ;;  %s4057_s8 = sshll.u32 %s609_s22, 4  ;;  %s6663_s14 = sld [smem:[#allocation45_spill]]  ;;  %s6502_s8 = int_to_ptr.vmem [resolvable:$true] %s4057_s8 }
 0x2f8   : > { %s4292_s17 = sshll.u32 %s6654_s2, 3  ;;  %4501 = vmatpush3.bf16.msra.mxu0 %v4945_v50  ;;  %v1043_v61 = vrot.slane %v5752_v0, %v5824_v60  ;;  %v1048_v2 = vrot.slane %v5754_v1, %v5824_v60  ;;  %v1013_v31 = vrot.slane %v1009_v30, %v5824_v60 }
 0x2f9   : > { %s995_s11 = scalar_lea.vmem %s5742_s24, %s4292_s17  ;;  %v1004_v35 = vstv %s4292_s17  ;;  %s997_s0 = scalar_lea.vmem [#allocation6], %s4292_s17  ;;  %4530 = vmatprep.subr.bf16.mxu0 %v5414_v49 }
 0x2fa   : > { %v996_v36 = vld [vmem:[%s995_s11] sm:$0xff]  ;;  %v5804_v41 = vadd.s32 %v1004_v35, %v5797_v38  ;;  %1128 = vrot.lane.b32.xlu1 %v1123_v51, %s5418_s13  ;;  %vm1014_vm15 = vcmp.eq.s32.totalorder %v1013_v31, 1  ;;  %s5423_s24 = smov 16   ;;  %s6660_s17 = sld [smem:[#allocation28_spill]] }
 0x2fb   : > { %v998_v37 = vld [vmem:[%s997_s0] sm:$0xff]  ;;  %s5262_s0 = scalar_lea.vmem %s6502_s8, 128 }
 0x2fc   : > { %v5801_v40 = vadd.f32 %v998_v37, %v996_v36  ;;  %vm1008_vm8 = vcmp.ge.s32.totalorder %v5804_v41, %v5799_v39  ;;  %p5263_p1 = scmp.ne.s32.totalorder %s6502_s8, %s5262_s0 }
 0x2fd   : > { %vm5885_vm0 = vmand %vm1008_vm8, %vm1014_vm15  ;;  %s6664_s11 = smov %s6663_s14 }
 0x2fe   : > { %v1019_v42 = vsel %vm1018_vm7, %v5801_v40, 0.0 }
 0x2ff   : > { %1020 = vadd.xlane.f32.xlu0 %v1019_v42 }
 0x31d   : > { %1142 = vxpose.xlu1.c.b16.start.end [1/1] (short) (narrow) %v1123_v51, 16 }
 0x368   : > { %v1126_v6 = vpop.permute.xlu1 %1125 }
 0x36c   : > { %v1129_v7 = vpop.permute.xlu1 %1128 }
 0x37f   : > { %v1150_v8 = vpop.trf.xlu1 }
 0x380   : > { %v1212_v9 = vsel %vm1210_vm12, %v1150_v8, 0 }
 0x381   : > { %4507 = vmatpush3.bf16.msra.mxu1 %v1212_v9 }
 0x382   : > { %4512 = vmatprep.subr.bf16.mxu1 %v5414_v49 }
 0x388   : > { %v1021_v43 = vpop.xlane.xlu0 %1020 }
 0x389   : > { %v1023_v44 = vmul.f32 0.03125, %v1021_v43  ;;  %v1134_v43 = vld [vmem:[#allocation3] sm:$0xf] }
 0x38b   : > { %v1024_v45 = vsub.f32 %v5801_v40, %v1023_v44  ;;  %v1466_v44 = vsel %vm1210_vm12, %v1134_v43, 0 }
 0x38d   : > { %v1025_v46 = vmul.f32 %v1024_v45, %v1024_v45 }
 0x38f   : > { %v1026_v47 = vsel %vm1018_vm7, %v1025_v46, 0.0 }
 0x390   : > { %1027 = vadd.xlane.f32.xlu0 %v1026_v47 }
 0x3a6   : > { %1131 = vrot.lane.b32.xlu0 %v1123_v51, %s5417_s6 }
 0x419   : > { %v1028_v52 = vpop.xlane.xlu0 %1027 }
 0x41a   : > { %v1029_v53 = vmul.f32 0.032258064, %v1028_v52 }
 0x41c   : > { %4958 = vrsqrt.f32 %v1029_v53  ;;  %vm1032_vm10 = vcmp.eq.f32.partialorder %v1029_v53, inf  ;;  %v1035_v56 = vand.u32 2147483648, %v1029_v53  ;;  %vm1034_vm11 = vcmp.eq.f32.partialorder %v1029_v53, 0.0 }
 0x41d   : > { %v1132_v18 = vpop.permute.xlu0 %1131 }
 0x429   : > { %v4959_v54 = vpop.eup %4958 }
 0x42a   : > { %v1031_v55 = vmul.f32 %v4959_v54, %v1029_v53 }
 0x42c   : > { %v1033_v57 = vsel %vm1032_vm10, %v1029_v53, %v1031_v55 }
 0x42d   : > { %v1036_v58 = vsel %vm1034_vm11, %v1035_v56, %v1033_v57  ;;  %vm3987_vm11 = vcmask 523264  }
 0x42e   : > { %v1037_v59 = vadd.f32 1e-06, %v1036_v58 }
 0x430   : > { %4960 = vrcp.f32 %v1037_v59 }
 0x43d   : > { %v4961_v62 = vpop.eup %4960 }
 0x43e   : > { %v1039_v63 = vmul.f32 %v4961_v62, %v1024_v45 }
 0x440   : > { %v1044_v3 = vmul.f32 %v1043_v61, %v1039_v63 }
 0x442   : > { %v1049_v4 = vadd.f32 %v1048_v2, %v1044_v3 }
 0x444   : > { %v1050_v5 = vpack.c.bf16 %v1049_v4, %v1049_v4 }
 0x446   : > { %4503 = vmatmul.mubr.msk.bf16.vlgmr.msra.gmra.mxu0 %vm1018_vm7, %v1050_v5 }
 0x447   : > { %4532 = vmatprep.mubr.msk.bf16.mxu0 %vm5415_vm9, %v5414_v49  ;;  %4531 = vmatpush3.bf16.msra.mxu0 %v1466_v44 }
 0x448   : > { %4542 = vmatprep.subr.bf16.mxu0 %v5414_v49 }
 0x506   : > { %v1109_v11 = vpop.f32.mrf.mxu0 }
 0x507   : > { %v1110_v12 = vadd.f32 %v4293_v10, %v1109_v11 }
 0x508   : > { %v4504_v13 = vpop.f32.mrf.mxu0 }
 0x509   : > { %v5835_v14 = vpack.c.bf16 %v1110_v12, %v1110_v12 }
 0x50a   : > { %v1112_v15 = vpop.f32.mrf.mxu0 }
 0x50b   : > { %1121 = vrot.lane.b32.xlu0 %v5835_v14, %s5417_s6  ;;  %1117 = vrot.lane.b32.xlu1 %v5835_v14, %s5416_s12 }
 0x50c   : > { %4509 = vmatmul.mubr.msk.bf16.vlgmr.msra.gmra.mxu1 %vm1206_vm13, %v5835_v14  ;;  %v4505_v16 = vpop.f32.mrf.mxu0 }
 0x50d   : > { %4514 = vmatprep.mubr.msk.bf16.mxu1 %vm5415_vm9, %v5414_v49 }
 0x50f   : > { %1119 = vrot.lane.b32.xlu1 %v5835_v14, %s5418_s13 }
 0x529   : > { %1158 = vxpose.xlu0.c.b16.start.end [1/1] (short) (narrow) %v1126_v6, 16 }
 0x532   : > { %1174 = vxpose.xlu1.c.b16.start.end [1/1] (short) (narrow) %v1129_v7, 16  ;;  %1652 = vrot.lane.b32.xlu0 %v5847_v17, %s5416_s12 }
 0x536   : > { %1190 = vxpose.xlu1.c.b16.start.end [1/1] (short) (narrow) %v1132_v18, 16 }
 0x53a   : > { %1655 = vrot.lane.b32.xlu1 %v5847_v17, %s5418_s13 }
 0x53e   : > { %1658 = vrot.lane.b32.xlu1 %v5847_v17, %s5417_s6 }
 0x57d   : > { %v5855_v19 = vpop.permute.xlu0 %1121  ;;  %v5857_v20 = vpop.permute.xlu1 %1117 }
 0x581   : > { %v5861_v23 = vpop.permute.xlu1 %1119 }
 0x58b   : > { %v1166_v21 = vpop.trf.xlu0 }
 0x58c   : > { %v1258_v22 = vsel %vm1210_vm12, %v1166_v21, 0 }
 0x58d   : > { %4513 = vmatpush3.bf16.msra.mxu1 %v1258_v22 }
 0x58e   : > { %4518 = vmatprep.subr.bf16.mxu1 %v5414_v49 }
 0x590   : > { %4515 = vmatmul.mubr.msk.bf16.vlgmr.msra.gmra.mxu1 %vm1206_vm13, %v5857_v20 }
 0x591   : > { %4520 = vmatprep.mubr.msk.bf16.mxu1 %vm5415_vm9, %v5414_v49 }
 0x594   : > { %v1182_v24 = vpop.trf.xlu1 }
 0x595   : > { %v1304_v25 = vsel %vm1210_vm12, %v1182_v24, 0 }
 0x596   : > { %4519 = vmatpush3.bf16.msra.mxu1 %v1304_v25 }
 0x597   : > { %4524 = vmatprep.subr.bf16.mxu1 %v5414_v49 }
 0x598   : > { %v1198_v26 = vpop.trf.xlu1 }
 0x599   : > { %4521 = vmatmul.mubr.msk.bf16.vlgmr.msra.gmra.mxu1 %vm1206_vm13, %v5861_v23  ;;  %v1350_v27 = vsel %vm1210_vm12, %v1198_v26, 0 }
 0x59a   : > { %4525 = vmatpush3.bf16.msra.mxu1 %v1350_v27  ;;  %4526 = vmatprep.mubr.msk.bf16.mxu1 %vm5415_vm9, %v5414_v49 }
 0x59b   : > { %4536 = vmatprep.subr.bf16.mxu1 %v5414_v49 }
 0x5a1   : > { %4527 = vmatmul.mubr.msk.bf16.vlgmr.msra.gmra.mxu1 %vm1206_vm13, %v5855_v19 }
 0x5a2   : > { %4538 = vmatprep.mubr.msk.bf16.mxu1 %vm5415_vm9, %v5414_v49 }
 0x5a4   : > { %v1653_v9 = vpop.permute.xlu0 %1652 }
 0x5ac   : > { %v1656_v39 = vpop.permute.xlu1 %1655 }
 0x5b0   : > { %v1659_v47 = vpop.permute.xlu1 %1658 }
 0x5cc   : > { %v1248_v33 = vpop.f32.mrf.mxu1 }
 0x5cd   : > { %v1394_v34 = vsel %vm5885_vm0, %v1248_v33, -1e+09 }
 0x5ce   : > { %v4510_v35 = vpop.f32.mrf.mxu1  ;;  %v1398_v36 = vsel %vm1206_vm13, %v1394_v34, -inf }
 0x5cf   : > { %1399 = vmax.xlane.f32.xlu1 %v1398_v36 }
 0x5d0   : > { %v1251_v37 = vpop.f32.mrf.mxu1 }
 0x5d2   : > { %v4511_v42 = vpop.f32.mrf.mxu1 }
 0x650   : > { %v1294_v41 = vpop.f32.mrf.mxu1 }
 0x651   : > { %v1395_v45 = vsel %vm5885_vm0, %v1294_v41, -1e+09 }
 0x652   : > { %v4516_v46 = vpop.f32.mrf.mxu1  ;;  %v1401_v48 = vsel %vm1206_vm13, %v1395_v45, -inf }
 0x653   : > { %1402 = vmax.xlane.f32.xlu0 %v1401_v48 }
 0x654   : > { %v1297_v50 = vpop.f32.mrf.mxu1 }
 0x656   : > { %v4517_v51 = vpop.f32.mrf.mxu1 }
 0x658   : > { %v1400_v52 = vpop.xlane.xlu1 %1399 }
 0x659   : > { %v5897_v53 = vmax.f32 %v1400_v52, -1e+30  ;;  %v1340_v54 = vpop.f32.mrf.mxu1 }
 0x65a   : > { %v1396_v55 = vsel %vm5885_vm0, %v1340_v54, -1e+09 }
 0x65b   : > { %v1426_v56 = vsub.f32 %v1394_v34, %v5897_v53  ;;  %v4522_v57 = vpop.f32.mrf.mxu1  ;;  %v1404_v58 = vsel %vm1206_vm13, %v1396_v55, -inf  ;;  %v1414_v32 = vsub.f32 -1e+30, %v5897_v53 }
 0x65c   : > { %1405 = vmax.xlane.f32.xlu1 %v1404_v58 }
 0x65d   : > { %v1430_v59 = vmul.f32 1.442695, %v1426_v56  ;;  %v1343_v61 = vpop.f32.mrf.mxu1 }
 0x65f   : > { %4962 = vpow2.f32 %v1430_v59  ;;  %v4523_v62 = vpop.f32.mrf.mxu1 }
 0x661   : > { %v1386_v63 = vpop.f32.mrf.mxu1 }
 0x662   : > { %v1397_v2 = vsel %vm5885_vm0, %v1386_v63, -1e+09 }
 0x663   : > { %v4528_v3 = vpop.f32.mrf.mxu1  ;;  %v1407_v4 = vsel %vm1206_vm13, %v1397_v2, -inf }
 0x664   : > { %1408 = vmax.xlane.f32.xlu1 %v1407_v4 }
 0x665   : > { %v1389_v5 = vpop.f32.mrf.mxu1 }
 0x667   : > { %v4529_v6 = vpop.f32.mrf.mxu1 }
 0x669   : > { %1136 = vrot.lane.b32.xlu0 %v1134_v43, %s5416_s12 }
 0x66c   : > { %v5907_v7 = vpop.eup %4962 }
 0x66d   : > { %v1458_v8 = vpack.c.bf16 %v5907_v7, %v5907_v7  ;;  %1140 = vrot.lane.b32.xlu0 %v1134_v43, %s5417_s6 }
 0x66f   : > { %4533 = vmatmul.mubr.msk.bf16.vlgmr.msra.gmra.mxu0 %vm1206_vm13, %v1458_v8 }
 0x670   : > { %4544 = vmatprep.mubr.msk.bf16.mxu0 %vm5415_vm9, %v5414_v49 }
 0x675   : > { %1138 = vrot.lane.b32.xlu1 %v1134_v43, %s5418_s13 }
 0x68b   : > { %1685 = vxpose.xlu0.c.b16.start.end [1/1] (short) (narrow) %v1653_v9, 16 }
 0x68f   : > { %1701 = vxpose.xlu0.c.b16.start.end [1/1] (short) (narrow) %v1656_v39, 16 }
 0x698   : > { %1669 = vxpose.xlu1.c.b16.start.end [1/1] (short) (narrow) %v5847_v17, 16 }
 0x69c   : > { %1717 = vxpose.xlu1.c.b16.start.end [1/1] (short) (narrow) %v1659_v47, 16 }
 0x6dc   : > { %v1403_v10 = vpop.xlane.xlu0 %1402 }
 0x6dd   : > { %v5917_v11 = vmax.f32 %v1403_v10, -1e+30 }
 0x6df   : > { %v1427_v12 = vsub.f32 %v1395_v45, %v5917_v11 }
 0x6e0   : > { %v1137_v13 = vpop.permute.xlu0 %1136 }
 0x6e1   : > { %v1432_v15 = vmul.f32 1.442695, %v1427_v12  ;;  %v1512_v16 = vsel %vm1210_vm12, %v1137_v13, 0 }
 0x6e2   : > { %4537 = vmatpush3.bf16.msra.mxu1 %v1512_v16 }
 0x6e3   : > { %4964 = vpow2.f32 %v1432_v15  ;;  %4548 = vmatprep.subr.bf16.mxu1 %v5414_v49 }
 0x6e4   : > { %v1141_v26 = vpop.permute.xlu0 %1140 }
 0x6e5   : > { %v1406_v18 = vpop.xlane.xlu1 %1405  ;;  %v1604_v33 = vsel %vm1210_vm12, %v1141_v26, 0 }
 0x6e6   : > { %v5922_v21 = vmax.f32 %v1406_v18, -1e+30 }
 0x6e8   : > { %v1428_v22 = vsub.f32 %v1396_v55, %v5922_v21 }
 0x6ea   : > { %v1434_v17 = vmul.f32 1.442695, %v1428_v22 }
 0x6ec   : > { %4966 = vpow2.f32 %v1434_v17 }
 0x6ed   : > { %v1409_v24 = vpop.xlane.xlu1 %1408  ;;  %v1693_v37 = vpop.trf.xlu0 }
 0x6ee   : > { %v5925_v25 = vmax.f32 %v1409_v24, -1e+30  ;;  %v1777_v45 = vsel %vm1210_vm12, %v1693_v37, 0 }
 0x6f0   : > { %v5927_v27 = vpop.eup %4964  ;;  %v1429_v28 = vsub.f32 %v1397_v2, %v5925_v25 }
 0x6f1   : > { %v1139_v30 = vpop.permute.xlu1 %1138  ;;  %v1459_v31 = vpack.c.bf16 %v5927_v27, %v5927_v27  ;;  %v1709_v39 = vpop.trf.xlu0 }
 0x6f2   : > { %v1436_v34 = vmul.f32 1.442695, %v1429_v28  ;;  %v1558_v35 = vsel %vm1210_vm12, %v1139_v30, 0  ;;  %v1820_v47 = vsel %vm1210_vm12, %v1709_v39, 0 }
 0x6f3   : > { %4539 = vmatmul.mubr.msk.bf16.vlgmr.msra.gmra.mxu1 %vm1206_vm13, %v1459_v31  ;;  %4543 = vmatpush3.bf16.msra.mxu0 %v1558_v35 }
 0x6f4   : > { %4968 = vpow2.f32 %v1436_v34  ;;  %4549 = vmatpush3.bf16.msra.mxu1 %v1604_v33  ;;  %4554 = vmatprep.subr.bf16.mxu0 %v5414_v49 }
 0x6f5   : > { %4550 = vmatprep.mubr.msk.bf16.mxu1 %vm5415_vm9, %v5414_v49  ;;  %4560 = vmatprep.subr.bf16.mxu1 %v5414_v49 }
 0x6f9   : > { %v5939_v36 = vpop.eup %4966 }
 0x6fa   : > { %v1460_v42 = vpack.c.bf16 %v5939_v36, %v5939_v36  ;;  %v1677_v43 = vpop.trf.xlu1 }
 0x6fb   : > { %v1734_v44 = vsel %vm1210_vm12, %v1677_v43, 0 }
 0x6fc   : > { %4545 = vmatmul.mubr.msk.bf16.vlgmr.msra.gmra.mxu0 %vm1206_vm13, %v1460_v42 }
 0x6fd   : > { %4555 = vmatpush3.bf16.msra.mxu0 %v1734_v44  ;;  %4556 = vmatprep.mubr.msk.bf16.mxu0 %vm5415_vm9, %v5414_v49 }
 0x6fe   : > { %4566 = vmatprep.subr.bf16.mxu0 %v5414_v49  ;;  %v1725_v48 = vpop.trf.xlu1 }
 0x6ff   : > { %v1863_v50 = vsel %vm1210_vm12, %v1725_v48, 0  ;;  %v1418_v48 = vmul.f32 1.442695, %v1414_v32 }
 0x701   : > { %v5948_v41 = vpop.eup %4968  ;;  %4970 = vpow2.f32 %v1418_v48 }
 0x702   : > { %v1461_v46 = vpack.c.bf16 %v5948_v41, %v5948_v41 }
 0x704   : > { %4551 = vmatmul.mubr.msk.bf16.vlgmr.msra.gmra.mxu1 %vm1206_vm13, %v1461_v46  ;;  %4557 = vmatmul.mubr.msk.bf16.vlgmr.msra.gmra.mxu0 %vm1206_vm13, %v5835_v14  ;;  %v6001_v46 = vld [vmem:[#allocation3 + $0x4] sm:$0xf] }
 0x705   : > { %4561 = vmatpush3.bf16.msra.mxu1 %v1777_v45  ;;  %4567 = vmatpush3.bf16.msra.mxu0 %v1820_v47  ;;  %v2017_v47 = vsel %vm1210_vm12, %v6001_v46, 0 }
 0x706   : > { %4562 = vmatprep.mubr.msk.bf16.mxu1 %vm5415_vm9, %v5414_v49  ;;  %4568 = vmatprep.mubr.msk.bf16.mxu0 %vm5415_vm9, %v5414_v49 }
 0x707   : > { %4572 = vmatprep.subr.bf16.mxu1 %v5414_v49  ;;  %4578 = vmatprep.subr.bf16.mxu0 %v5414_v49 }
 0x70c   : > { %4563 = vmatmul.mubr.msk.bf16.vlgmr.msra.gmra.mxu1 %vm1206_vm13, %v5857_v20  ;;  %4569 = vmatmul.mubr.msk.bf16.vlgmr.msra.gmra.mxu0 %vm1206_vm13, %v5861_v23 }
 0x70d   : > { %4573 = vmatpush3.bf16.msra.mxu1 %v1863_v50  ;;  %4574 = vmatprep.mubr.msk.bf16.mxu1 %vm5415_vm9, %v5414_v49  ;;  %v1415_v50 = vsub.f32 -1e+30, %v5917_v11 }
 0x70e   : > { %4580 = vmatprep.mubr.msk.bf16.mxu0 %vm5415_vm9, %v5414_v49  ;;  %4584 = vmatprep.subr.bf16.mxu1 %v5414_v49 }
 0x70f   : > { %4579 = vmatpush3.bf16.msra.mxu0 %v2017_v47 }
 0x710   : > { %4590 = vmatprep.subr.bf16.mxu0 %v5414_v49 }
 0x714   : > { %4575 = vmatmul.mubr.msk.bf16.vlgmr.msra.gmra.mxu1 %vm1206_vm13, %v5855_v19 }
 0x715   : > { %4586 = vmatprep.mubr.msk.bf16.mxu1 %vm5415_vm9, %v5414_v49 }
 0x72f   : > { %v5977_v14 = vpop.f32.mrf.mxu0 }
 0x731   : > { %v4534_v20 = vpop.f32.mrf.mxu0 }
 0x733   : > { %v1505_v51 = vpop.f32.mrf.mxu0 }
 0x735   : > { %v4535_v23 = vpop.f32.mrf.mxu0 }
 0x7b3   : > { %v5979_v52 = vpop.f32.mrf.mxu1 }
 0x7b5   : > { %v4540_v54 = vpop.f32.mrf.mxu1 }
 0x7b7   : > { %v1551_v55 = vpop.f32.mrf.mxu1 }
 0x7b8   : > { %v1420_v55 = vmul.f32 1.442695, %v1415_v50 }
 0x7b9   : > { %v4541_v56 = vpop.f32.mrf.mxu1 }
 0x7ba   : > { %v1416_v56 = vsub.f32 -1e+30, %v5922_v21 }
 0x7bc   : > { %v5981_v57 = vpop.f32.mrf.mxu0 }
 0x7be   : > { %v4546_v58 = vpop.f32.mrf.mxu0 }
 0x7c0   : > { %v1597_v59 = vpop.f32.mrf.mxu0 }
 0x7c2   : > { %v4547_v61 = vpop.f32.mrf.mxu0 }
 0x7c3   : > { %v1417_v61 = vsub.f32 -1e+30, %v5925_v25 }
 0x7c4   : > { %v5983_v62 = vpop.f32.mrf.mxu1  ;;  %v1770_v19 = vpop.f32.mrf.mxu0 }
 0x7c5   : > { %1909 = vrot.lane.b32.xlu0 %v1770_v19, %s5420_s15 }
 0x7c6   : > { %v4552_v63 = vpop.f32.mrf.mxu1  ;;  %v4558_v2 = vpop.f32.mrf.mxu0 }
 0x7c7   : > { %v1422_v63 = vmul.f32 1.442695, %v1416_v56 }
 0x7c8   : > { %v1643_v3 = vpop.f32.mrf.mxu1  ;;  %v1773_v4 = vpop.f32.mrf.mxu0 }
 0x7c9   : > { %v1424_v3 = vmul.f32 1.442695, %v1417_v61  ;;  %v1451_v61 = vsel %vm1206_vm13, %v5948_v41, 0.0 }
 0x7ca   : > { %v4553_v5 = vpop.f32.mrf.mxu1  ;;  %v4559_v6 = vpop.f32.mrf.mxu0 }
 0x7cb   : > { %v4971_v6 = vpop.eup %4970 }
 0x7cc   : > { %v1813_v8 = vpop.f32.mrf.mxu1  ;;  %v1856_v9 = vpop.f32.mrf.mxu0 }
 0x7cd   : > { %1911 = vrot.lane.b32.xlu1 %v1813_v8, %s5420_s15 }
 0x7ce   : > { %v4564_v10 = vpop.f32.mrf.mxu1  ;;  %v4570_v12 = vpop.f32.mrf.mxu0 }
 0x7d0   : > { %v1816_v13 = vpop.f32.mrf.mxu1  ;;  %v1859_v15 = vpop.f32.mrf.mxu0 }
 0x7d1   : > { %1913 = vrot.lane.b32.xlu1 %v1856_v9, %s5420_s15  ;;  %v6020_v15 = vmul.f32 0.0, %v4971_v6 }
 0x7d2   : > { %v4565_v16 = vpop.f32.mrf.mxu1  ;;  %v4571_v18 = vpop.f32.mrf.mxu0 }
 0x7d4   : > { %v1899_v22 = vpop.f32.mrf.mxu1 }
 0x7d5   : > { %1915 = vrot.lane.b32.xlu0 %v1899_v22, %s5420_s15 }
 0x7d6   : > { %v4576_v17 = vpop.f32.mrf.mxu1 }
 0x7d8   : > { %v1902_v24 = vpop.f32.mrf.mxu1 }
 0x7da   : > { %v4577_v26 = vpop.f32.mrf.mxu1 }
 0x7db   : > { %v1646_v26 = vadd.f32 %v5977_v14, %v6020_v15 }
 0x837   : > { %v1910_v28 = vpop.permute.xlu0 %1909 }
 0x838   : > { %v1921_v30 = vsel %vm5885_vm0, %v1910_v28, -1e+09 }
 0x839   : > { %v1926_v31 = vsel %vm1925_vm1, %v1921_v30, -inf }
 0x83a   : > { %1927 = vmax.xlane.f32.xlu1 %v1926_v31 }
 0x83f   : > { %v1912_v33 = vpop.permute.xlu1 %1911 }
 0x840   : > { %v1922_v34 = vsel %vm5885_vm0, %v1912_v33, -1e+09 }
 0x841   : > { %v1929_v35 = vsel %vm1925_vm1, %v1922_v34, -inf }
 0x842   : > { %1930 = vmax.xlane.f32.xlu0 %v1929_v35 }
 0x843   : > { %v1914_v37 = vpop.permute.xlu1 %1913 }
 0x844   : > { %v1923_v42 = vsel %vm5885_vm0, %v1914_v37, -1e+09 }
 0x845   : > { %v1932_v43 = vsel %vm1925_vm1, %v1923_v42, -inf }
 0x846   : > { %1933 = vmax.xlane.f32.xlu0 %v1932_v43 }
 0x847   : > { %v1916_v44 = vpop.permute.xlu0 %1915 }
 0x848   : > { %v1924_v39 = vsel %vm5885_vm0, %v1916_v44, -1e+09 }
 0x849   : > { %v1935_v45 = vsel %vm1925_vm1, %v1924_v39, -inf }
 0x84a   : > { %1936 = vmax.xlane.f32.xlu1 %v1935_v45 }
 0x85c   : > { %1663 = vrot.lane.b32.xlu0 %v6001_v46, %s5416_s12 }
 0x860   : > { %1665 = vrot.lane.b32.xlu0 %v6001_v46, %s5418_s13 }
 0x8c3   : > { %v1928_v20 = vpop.xlane.xlu1 %1927 }
 0x8c4   : > { %v1938_v51 = vmax.f32 %v5897_v53, %v1928_v20 }
 0x8c6   : > { %v1942_v23 = vsub.f32 %v5897_v53, %v1938_v51  ;;  %v1954_v54 = vsub.f32 %v1921_v30, %v1938_v51 }
 0x8c8   : > { %v1946_v58 = vmul.f32 1.442695, %v1942_v23  ;;  %v1958_v59 = vmul.f32 1.442695, %v1954_v54 }
 0x8ca   : > { %4972 = vpow2.f32 %v1946_v58 }
 0x8cb   : > { %4974 = vpow2.f32 %v1958_v59  ;;  %v1931_v19 = vpop.xlane.xlu0 %1930 }
 0x8cc   : > { %4976 = vpow2.f32 %v1420_v55  ;;  %v1939_v2 = vmax.f32 %v5917_v11, %v1931_v19  ;;  %v1445_v19 = vsel %vm1206_vm13, %v5927_v27, 0.0 }
 0x8cd   : > { %4978 = vpow2.f32 %v1422_v63 }
 0x8ce   : > { %v1943_v4 = vsub.f32 %v5917_v11, %v1939_v2  ;;  %v1955_v5 = vsub.f32 %v1922_v34, %v1939_v2  ;;  %4980 = vpow2.f32 %v1424_v3 }
 0x8cf   : > { %v1934_v53 = vpop.xlane.xlu0 %1933 }
 0x8d0   : > { %v1948_v8 = vmul.f32 1.442695, %v1943_v4  ;;  %v1960_v9 = vmul.f32 1.442695, %v1955_v5  ;;  %v1940_v10 = vmax.f32 %v5922_v21, %v1934_v53 }
 0x8d2   : > { %4982 = vpow2.f32 %v1948_v8  ;;  %v1944_v12 = vsub.f32 %v5922_v21, %v1940_v10  ;;  %v1956_v13 = vsub.f32 %v1923_v42, %v1940_v10 }
 0x8d3   : > { %4984 = vpow2.f32 %v1960_v9  ;;  %v1937_v16 = vpop.xlane.xlu1 %1936  ;;  %v1664_v18 = vpop.permute.xlu0 %1663 }
 0x8d4   : > { %v1950_v22 = vmul.f32 1.442695, %v1944_v12  ;;  %v1962_v11 = vmul.f32 1.442695, %v1956_v13  ;;  %v1941_v17 = vmax.f32 %v5925_v25, %v1937_v16  ;;  %v2066_v24 = vsel %vm1210_vm12, %v1664_v18, 0 }
 0x8d5   : > { %4585 = vmatpush3.bf16.msra.mxu1 %v2066_v24 }
 0x8d6   : > { %4986 = vpow2.f32 %v1950_v22  ;;  %v1945_v28 = vsub.f32 %v5925_v25, %v1941_v17  ;;  %v1957_v21 = vsub.f32 %v1924_v39, %v1941_v17  ;;  %4596 = vmatprep.subr.bf16.mxu1 %v5414_v49 }
 0x8d7   : > { %v6028_v30 = vpop.eup %4972  ;;  %4988 = vpow2.f32 %v1962_v11  ;;  %v1666_v63 = vpop.permute.xlu0 %1665 }
 0x8d8   : > { %v4975_v31 = vpop.eup %4974  ;;  %v1952_v33 = vmul.f32 1.442695, %v1945_v28  ;;  %v1964_v34 = vmul.f32 1.442695, %v1957_v21  ;;  %v6031_v35 = vmul.f32 %v6028_v30, %v1646_v26  ;;  %v2115_v2 = vsel %vm1210_vm12, %v1666_v63, 0 }
 0x8d9   : > { %v4977_v37 = vpop.eup %4976  ;;  %v2006_v42 = vpack.c.bf16 %v4975_v31, %v4975_v31 }
 0x8da   : > { %4990 = vpow2.f32 %v1952_v33  ;;  %v6034_v14 = vmul.f32 0.0, %v4977_v37  ;;  %v4979_v25 = vpop.eup %4978 }
 0x8db   : > { %4992 = vpow2.f32 %v1964_v34  ;;  %2011 = vrot.lane.b32.xlu1 %v2006_v42, %s5416_s12  ;;  %v4981_v43 = vpop.eup %4980  ;;  %v6040_v47 = vmul.f32 0.0, %v4979_v25 }
 0x8dc   : > { %v1647_v44 = vadd.f32 %v5979_v52, %v6034_v14  ;;  %v6050_v23 = vmul.f32 0.0, %v4981_v43 }
 0x8dd   : > { %v1648_v50 = vadd.f32 %v5981_v57, %v6040_v47 }
 0x8de   : > { %v1649_v55 = vadd.f32 %v5983_v62, %v6050_v23  ;;  %v1442_v62 = vsel %vm1206_vm13, %v5907_v7, 0.0 }
 0x8df   : > { %v6038_v39 = vpop.eup %4982 }
 0x8e0   : > { %v4985_v45 = vpop.eup %4984  ;;  %v6043_v32 = vmul.f32 %v6038_v39, %v1647_v44 }
 0x8e1   : > { %v2007_v48 = vpack.c.bf16 %v4985_v45, %v4985_v45 }
 0x8e3   : > { %v6047_v20 = vpop.eup %4986  ;;  %2060 = vrot.lane.b32.xlu1 %v2007_v48, %s5416_s12 }
 0x8e4   : > { %v4989_v51 = vpop.eup %4988  ;;  %v6053_v52 = vmul.f32 %v6047_v20, %v1648_v50 }
 0x8e5   : > { %v2008_v54 = vpack.c.bf16 %v4989_v51, %v4989_v51 }
 0x8e7   : > { %v6057_v56 = vpop.eup %4990  ;;  %1667 = vrot.lane.b32.xlu1 %v6001_v46, %s5417_s6  ;;  %2109 = vrot.lane.b32.xlu0 %v2008_v54, %s5416_s12  ;;  %v1448_v46 = vsel %vm1206_vm13, %v5939_v36, 0.0 }
 0x8e8   : > { %v4993_v57 = vpop.eup %4992  ;;  %v6063_v58 = vmul.f32 %v6057_v56, %v1649_v55 }
 0x8e9   : > { %v2009_v59 = vpack.c.bf16 %v4993_v57, %v4993_v57 }
 0x8eb   : > { %2158 = vrot.lane.b32.xlu1 %v2009_v59, %s5416_s12  ;;  %1974 = vrot.lane.b32.xlu0 %v4975_v31, %s5416_s12  ;;  %v5421_v59 = vmov 1983009808  }
 0x8ef   : > { %1976 = vrot.lane.b32.xlu1 %v4985_v45, %s5416_s12  ;;  %1978 = vrot.lane.b32.xlu0 %v4989_v51, %s5416_s12 }
 0x8f3   : > { %1980 = vrot.lane.b32.xlu1 %v4993_v57, %s5416_s12 }
 0x90e   : > { %1443 = vadd.xlane.f32.xlu0 %v1442_v62  ;;  %v2221_v62 = vunpack.c.l.s4 %v5421_v59 }
 0x912   : > { %1449 = vadd.xlane.f32.xlu0 %v1448_v46 }
 0x916   : > { %1452 = vadd.xlane.f32.xlu0 %v1451_v61 }
 0x917   : > { %1446 = vadd.xlane.f32.xlu1 %v1445_v19 }
 0x94d   : > { %v2012_v3 = vpop.permute.xlu1 %2011 }
 0x94e   : > { %4581 = vmatmul.mubr.msk.bf16.vlgmr.msra.gmra.mxu0 %vm1206_vm13, %v2012_v3 }
 0x94f   : > { %4591 = vmatpush3.bf16.msra.mxu0 %v2115_v2  ;;  %4592 = vmatprep.mubr.msk.bf16.mxu0 %vm5415_vm9, %v5414_v49 }
 0x950   : > { %4602 = vmatprep.subr.bf16.mxu0 %v5414_v49 }
 0x955   : > { %v2061_v7 = vpop.permute.xlu1 %2060 }
 0x956   : > { %4587 = vmatmul.mubr.msk.bf16.vlgmr.msra.gmra.mxu1 %vm1206_vm13, %v2061_v7 }
 0x957   : > { %4598 = vmatprep.mubr.msk.bf16.mxu1 %vm5415_vm9, %v5414_v49 }
 0x959   : > { %v1668_v27 = vpop.permute.xlu1 %1667  ;;  %v2110_v36 = vpop.permute.xlu0 %2109 }
 0x95a   : > { %v2164_v41 = vsel %vm1210_vm12, %v1668_v27, 0  ;;  %4593 = vmatmul.mubr.msk.bf16.vlgmr.msra.gmra.mxu0 %vm1206_vm13, %v2110_v36  ;;  %v2222_v27 = vunpack.c.0.s8 %v2221_v62 }
 0x95b   : > { %4597 = vmatpush3.bf16.msra.mxu1 %v2164_v41  ;;  %4606 = vmatprep.mubr.msk.bf16.mxu0 %vm5415_vm9, %v5414_v49 }
 0x95c   : > { %4610 = vmatprep.subr.bf16.mxu1 %v5414_v49 }
 0x95d   : > { %v2159_v4 = vpop.permute.xlu1 %2158  ;;  %v1975_v5 = vpop.permute.xlu0 %1974 }
 0x95e   : > { %4599 = vmatmul.mubr.msk.bf16.vlgmr.msra.gmra.mxu1 %vm1206_vm13, %v2159_v4  ;;  %v1986_v53 = vsel %vm1206_vm13, %v1975_v5, 0.0 }
 0x95f   : > { %1987 = vadd.xlane.f32.xlu1 %v1986_v53  ;;  %4614 = vmatprep.mubr.msk.bf16.mxu1 %vm5415_vm9, %v5414_v49 }
 0x961   : > { %v1977_v6 = vpop.permute.xlu1 %1976  ;;  %v1979_v8 = vpop.permute.xlu0 %1978 }
 0x962   : > { %v1989_v9 = vsel %vm1206_vm13, %v1977_v6, 0.0  ;;  %v1992_v10 = vsel %vm1206_vm13, %v1979_v8, 0.0 }
 0x963   : > { %1990 = vadd.xlane.f32.xlu0 %v1989_v9  ;;  %1993 = vadd.xlane.f32.xlu1 %v1992_v10 }
 0x965   : > { %v1981_v12 = vpop.permute.xlu1 %1980 }
 0x966   : > { %v1995_v13 = vsel %vm1206_vm13, %v1981_v12, 0.0  ;;  %v6111_v12 = vsub.s32 %v2222_v27, %v5797_v38 }
 0x967   : > { %1996 = vadd.xlane.f32.xlu0 %v1995_v13 }
 0x997   : > { %v1444_v16 = vpop.xlane.xlu0 %1443 }
 0x998   : > { %v1454_v22 = vadd.f32 %v1444_v16, %v6020_v15 }
 0x99a   : > { %v1966_v24 = vmul.f32 %v6028_v30, %v1454_v22 }
 0x99b   : > { %v1450_v11 = vpop.xlane.xlu0 %1449 }
 0x99c   : > { %v1456_v33 = vadd.f32 %v1450_v11, %v6040_v47 }
 0x99e   : > { %v1968_v15 = vmul.f32 %v6047_v20, %v1456_v33 }
 0x99f   : > { %v1453_v28 = vpop.xlane.xlu0 %1452 }
 0x9a0   : > { %v1447_v18 = vpop.xlane.xlu1 %1446  ;;  %v1457_v25 = vadd.f32 %v1453_v28, %v6050_v23 }
 0x9a1   : > { %v1455_v21 = vadd.f32 %v1447_v18, %v6034_v14 }
 0x9a2   : > { %v1969_v30 = vmul.f32 %v6057_v56, %v1457_v25 }
 0x9a3   : > { %v1967_v34 = vmul.f32 %v6038_v39, %v1455_v21 }
 0x9e8   : > { %v1988_v17 = vpop.xlane.xlu1 %1987 }
 0x9e9   : > { %v1998_v26 = vadd.f32 %v1988_v17, %v1966_v24 }
 0x9eb   : > { %4994 = vrcp.f32 %v1998_v26 }
 0x9ec   : > { %v1991_v31 = vpop.xlane.xlu0 %1990  ;;  %v1994_v42 = vpop.xlane.xlu1 %1993 }
 0x9ed   : > { %v1999_v37 = vadd.f32 %v1991_v31, %v1967_v34  ;;  %v2000_v43 = vadd.f32 %v1994_v42, %v1968_v15  ;;  %v4946_v34 = vld [vmem:[#allocation14 + $0x38] sm:$0xff]  }
 0x9ee   : > { %4603 = vmatpush3.bf16.msra.mxu0 %v4946_v34 }
 0x9ef   : > { %4996 = vrcp.f32 %v1999_v37  ;;  %4604 = vmatprep.subr.bf16.mxu0 %v5414_v49 }
 0x9f0   : > { %v1997_v44 = vpop.xlane.xlu0 %1996  ;;  %4998 = vrcp.f32 %v2000_v43 }
 0x9f1   : > { %v2001_v14 = vadd.f32 %v1997_v44, %v1969_v30 }
 0x9f3   : > { %5000 = vrcp.f32 %v2001_v14  ;;  %v4947_v14 = vld [vmem:[#allocation14 + $0x30] sm:$0xff]  }
 0x9f4   : > { %4605 = vmatpush3.bf16.msra.mxu0 %v4947_v14 }
 0x9f5   : > { %4618 = vmatprep.subr.bf16.mxu0 %v5414_v49 }
 0x9f8   : > { %v4995_v50 = vpop.eup %4994 }
 0x9fc   : > { %v4997_v20 = vpop.eup %4996 }
 0x9fd   : > { %v4999_v63 = vpop.eup %4998 }
 0xa00   : > { %v5001_v6 = vpop.eup %5000 }
 0xa0e   : > { %v2053_v45 = vpop.f32.mrf.mxu0 }
 0xa0f   : > { %v2206_v48 = vadd.f32 %v2053_v45, %v6031_v35  ;;  %v5422_v35 = vmov 1934713408  }
 0xa10   : > { %v4582_v47 = vpop.f32.mrf.mxu0  ;;  %v2253_v2 = vunpack.c.l.s4 %v5422_v35 }
 0xa11   : > { %v2214_v51 = vmul.f32 %v4995_v50, %v2206_v48 }
 0xa12   : > { %v2056_v39 = vpop.f32.mrf.mxu0  ;;  %v2254_v8 = vunpack.c.0.s8 %v2253_v2 }
 0xa14   : > { %v4583_v54 = vpop.f32.mrf.mxu0  ;;  %v6114_v22 = vsub.s32 %v2254_v8, %v5797_v38 }
 0xa16   : > { %v2102_v55 = vpop.f32.mrf.mxu1 }
 0xa17   : > { %v2207_v23 = vadd.f32 %v2102_v55, %v6043_v32 }
 0xa18   : > { %v4588_v57 = vpop.f32.mrf.mxu1 }
 0xa19   : > { %v2215_v46 = vmul.f32 %v4997_v20, %v2207_v23 }
 0xa1a   : > { %v2105_v56 = vpop.f32.mrf.mxu1  ;;  %v2151_v61 = vpop.f32.mrf.mxu0 }
 0xa1b   : > { %v2208_v19 = vadd.f32 %v2151_v61, %v6053_v52 }
 0xa1c   : > { %v4589_v3 = vpop.f32.mrf.mxu1  ;;  %v4594_v7 = vpop.f32.mrf.mxu0 }
 0xa1d   : > { %v2216_v36 = vmul.f32 %v4999_v63, %v2208_v19 }
 0xa1e   : > { %v2154_v41 = vpop.f32.mrf.mxu0  ;;  %v2200_v4 = vpop.f32.mrf.mxu1 }
 0xa1f   : > { %v2218_v5 = vcombine.low %v2214_v51, %v2216_v36  ;;  %v2219_v32 = vcombine.high %v2214_v51, %v2216_v36  ;;  %v2209_v53 = vadd.f32 %v2200_v4, %v6063_v58  ;;  %v4315_v41 = vld [vmem:[#allocation15 + $0x3] ss:$0 sm:$0xff] }
 0xa20   : > { %v4595_v9 = vpop.f32.mrf.mxu0  ;;  %v4600_v10 = vpop.f32.mrf.mxu1 }
 0xa21   : > { %v2217_v52 = vmul.f32 %v5001_v6, %v2209_v53  ;;  %v2226_v17 = vrot.slane %v2218_v5, %v6111_v12  ;;  %v2233_v24 = vrot.slane %v2219_v32, %v6111_v12 }
 0xa22   : > { %v2203_v13 = vpop.f32.mrf.mxu1 }
 0xa23   : > { %v2234_v16 = vcombine.low %v2215_v46, %v2217_v52  ;;  %v2235_v18 = vcombine.high %v2215_v46, %v2217_v52 }
 0xa24   : > { %v4601_v11 = vpop.f32.mrf.mxu1 }
 0xa25   : > { %v2242_v58 = vrot.slane %v2234_v16, %v6111_v12  ;;  %v2249_v26 = vrot.slane %v2235_v18, %v6111_v12  ;;  %v4948_v11 = vld [vmem:[#allocation14 + $0x48] sm:$0xff]  }
 0xa26   : > { %4611 = vmatpush3.bf16.msra.mxu1 %v4948_v11 }
 0xa27   : > { %v2250_v28 = vcombine.low %v2226_v17, %v2242_v58  ;;  %v2251_v21 = vcombine.high %v2226_v17, %v2242_v58  ;;  %v2266_v31 = vcombine.low %v2233_v24, %v2249_v26  ;;  %v2267_v33 = vcombine.high %v2233_v24, %v2249_v26  ;;  %v4949_v17 = vld [vmem:[#allocation14 + $0x40] sm:$0xff]   ;;  %4612 = vmatprep.subr.bf16.mxu1 %v5414_v49 }
 0xa29   : > { %v2258_v37 = vrot.slane %v2250_v28, %v6114_v22  ;;  %v2265_v42 = vrot.slane %v2251_v21, %v6114_v22  ;;  %v2274_v25 = vrot.slane %v2266_v31, %v6114_v22  ;;  %v2281_v15 = vrot.slane %v2267_v33, %v6114_v22 }
 0xa2a   : > { %4613 = vmatpush3.bf16.msra.mxu1 %v4949_v17 }
 0xa2b   : > { %v2286_v43 = vcombine.low %v2258_v37, %v2265_v42  ;;  %v4313_v44 = vcombine.high %v2258_v37, %v2265_v42  ;;  %v2302_v30 = vcombine.low %v2274_v25, %v2281_v15  ;;  %v4314_v45 = vcombine.high %v2274_v25, %v2281_v15  ;;  %4624 = vmatprep.subr.bf16.mxu1 %v5414_v49 }
 0xa2c   : > { %v2460_v37 = vsub.s32 1, %v5797_v38 }
 0xa2d   : > { %v2293_v48 = vrot.slane %v2286_v43, %v6111_v12  ;;  %v2301_v50 = vrot.slane %v4313_v44, %v6111_v12  ;;  %v2309_v47 = vrot.slane %v2302_v30, %v6111_v12  ;;  %v2317_v51 = vrot.slane %v4314_v45, %v6111_v12 }
 0xa2e   : > { %v2461_v25 = vrot.slane %v5752_v0, %v2460_v37  ;;  %v2466_v44 = vrot.slane %v5754_v1, %v2460_v37 }
 0xa2f   : > { %v2319_v39 = vcombine.high %v2293_v48, %v2301_v50  ;;  %v2335_v54 = vcombine.high %v2309_v47, %v2317_v51  ;;  %v2318_v55 = vcombine.low %v2293_v48, %v2301_v50  ;;  %v2334_v23 = vcombine.low %v2309_v47, %v2317_v51 }
 0xa31   : > { %v2333_v20 = vrot.slane %v2319_v39, %v6114_v22  ;;  %v2349_v57 = vrot.slane %v2335_v54, %v6114_v22  ;;  %v2326_v59 = vrot.slane %v2318_v55, %v6114_v22  ;;  %v2342_v62 = vrot.slane %v2334_v23, %v6114_v22  ;;  %v4319_v55 = vld [vmem:[#allocation15 + $0x4] ss:$0 sm:$0xff] }
 0xa33   : > { %v2352_v46 = vcombine.low %v2333_v20, %v2349_v57  ;;  %v2351_v56 = vcombine.high %v2326_v59, %v2342_v62  ;;  %v2353_v61 = vcombine.high %v2333_v20, %v2349_v57  ;;  %v2350_v19 = vcombine.low %v2326_v59, %v2342_v62 }
 0xa35   : > { %2359 = vrot.lane.b32.xlu0 %v2352_v46, %s5423_s24  ;;  %2355 = vrot.lane.b32.xlu1 %v2351_v56, %s5420_s15  ;;  %v6177_v56 = vld [vmem:[#allocation4 + $0x4] sm:$0xf] }
 0xa39   : > { %2363 = vrot.lane.b32.xlu1 %v2353_v61, %s5424_s21 }
 0xaa7   : > { %v2356_v63 = vpop.permute.xlu1 %2355  ;;  %v2360_v35 = vpop.permute.xlu0 %2359 }
 0xaa8   : > { %v2366_v2 = vsel %vm1206_vm13, %v2350_v19, %v2356_v63 }
 0xaa9   : > { %v2368_v7 = vsel %vm2367_vm2, %v2366_v2, %v2360_v35 }
 0xaab   : > { %v2364_v3 = vpop.permute.xlu1 %2363 }
 0xaac   : > { %v2370_v27 = vsel %vm2369_vm3, %v2368_v7, %v2364_v3 }
 0xaad   : > { %v2371_v36 = vpack.c.bf16 %v2370_v27, %v2370_v27  ;;  %v1016_v27 = vld [vmem:[%s5718_s1] sm:$0x1] }
 0xaae   : > { %vm1017_vm6 = vcmp.ne.s32.totalorder %v1016_v27, 0 }
 0xaaf   : > { %4607 = vmatmul.mubr.msk.bf16.vlgmr.msra.gmra.mxu0 %vm1018_vm7, %v2371_v36  ;;  %v2809_v36 = vsel %vm1017_vm6, 1, %v5419_v29 }
 0xab0   : > { %4620 = vmatprep.mubr.msk.bf16.mxu0 %vm5415_vm9, %v5414_v49 }
 0xb6f   : > { %v2431_v4 = vpop.f32.mrf.mxu0 }
 0xb70   : > { %v2432_v5 = vadd.f32 %v4315_v41, %v2431_v4  ;;  %v2813_v41 = vrot.slane %v2809_v36, %v5824_v60 }
 0xb71   : > { %v4608_v32 = vpop.f32.mrf.mxu0 }
 0xb72   : > { %v6144_v53 = vadd.f32 %v2432_v5, %v5801_v40  ;;  %v2542_v40 = vld [vmem:[#allocation4] sm:$0xf]  ;;  %vm6210_vm8 = vcmp.eq.s32.totalorder %v2813_v41, 1 }
 0xb73   : > { %v2434_v6 = vpop.f32.mrf.mxu0 }
 0xb74   : > { %v2438_v8 = vsel %vm1018_vm7, %v6144_v53, 0.0 }
 0xb75   : > { %2439 = vadd.xlane.f32.xlu1 %v2438_v8  ;;  %v4609_v9 = vpop.f32.mrf.mxu0 }
 0xb86   : > { %2547 = vrot.lane.b32.xlu1 %v2542_v40, %s5418_s13 }
 0xb8a   : > { %2550 = vrot.lane.b32.xlu1 %v2542_v40, %s5417_s6 }
 0xbad   : > { %2561 = vxpose.xlu1.c.b16.start.end [1/1] (short) (narrow) %v2542_v40, 16 }
 0xbfe   : > { %v2440_v10 = vpop.xlane.xlu1 %2439 }
 0xbff   : > { %v2441_v52 = vmul.f32 0.03125, %v2440_v10 }
 0xc01   : > { %v2442_v13 = vsub.f32 %v6144_v53, %v2441_v52  ;;  %v2553_v52 = vld [vmem:[#allocation5] sm:$0xf] }
 0xc02   : > { %v2548_v48 = vpop.permute.xlu1 %2547 }
 0xc03   : > { %v2443_v16 = vmul.f32 %v2442_v13, %v2442_v13 }
 0xc05   : > { %v2444_v18 = vsel %vm1018_vm7, %v2443_v16, 0.0 }
 0xc06   : > { %2445 = vadd.xlane.f32.xlu0 %v2444_v18  ;;  %v2551_v50 = vpop.permute.xlu1 %2550 }
 0xc0f   : > { %v2569_v47 = vpop.trf.xlu1 }
 0xc10   : > { %v2629_v51 = vsel %vm1210_vm12, %v2569_v47, 0 }
 0xc11   : > { %4619 = vmatpush3.bf16.msra.mxu0 %v2629_v51 }
 0xc12   : > { %4630 = vmatprep.subr.bf16.mxu0 %v5414_v49 }
 0xc1c   : > { %2544 = vrot.lane.b32.xlu0 %v2542_v40, %s5416_s12 }
 0xc8f   : > { %v2446_v24 = vpop.xlane.xlu0 %2445 }
 0xc90   : > { %v2447_v58 = vmul.f32 0.032258064, %v2446_v24 }
 0xc92   : > { %5002 = vrsqrt.f32 %v2447_v58  ;;  %vm2450_vm4 = vcmp.eq.f32.partialorder %v2447_v58, inf  ;;  %v2453_v21 = vand.u32 2147483648, %v2447_v58  ;;  %vm2452_vm5 = vcmp.eq.f32.partialorder %v2447_v58, 0.0 }
 0xc93   : > { %v2545_v42 = vpop.permute.xlu0 %2544 }
 0xc94   : > { %2577 = vxpose.xlu0.c.b16.start.end [1/1] (short) (narrow) %v2545_v42, 16 }
 0xc9f   : > { %v5003_v26 = vpop.eup %5002 }
 0xca0   : > { %v2449_v28 = vmul.f32 %v5003_v26, %v2447_v58 }
 0xca2   : > { %v2451_v31 = vsel %vm2450_vm4, %v2447_v58, %v2449_v28 }
 0xca3   : > { %v2454_v33 = vsel %vm2452_vm5, %v2453_v21, %v2451_v31 }
 0xca4   : > { %v2455_v34 = vadd.f32 1e-06, %v2454_v33 }
 0xca6   : > { %5004 = vrcp.f32 %v2455_v34 }
 0xcb3   : > { %v5005_v15 = vpop.eup %5004 }
 0xcb4   : > { %v2457_v43 = vmul.f32 %v5005_v15, %v2442_v13  ;;  %v2887_v13 = vsel %vm1210_vm12, %v2553_v52, 0 }
 0xcb6   : > { %v2462_v30 = vmul.f32 %v2461_v25, %v2457_v43 }
 0xcb8   : > { %v2467_v45 = vadd.f32 %v2466_v44, %v2462_v30 }
 0xcba   : > { %v2468_v14 = vpack.c.bf16 %v2467_v45, %v2467_v45 }
 0xcbc   : > { %4615 = vmatmul.mubr.msk.bf16.vlgmr.msra.gmra.mxu1 %vm1018_vm7, %v2468_v14 }
 0xcbd   : > { %4626 = vmatprep.mubr.msk.bf16.mxu1 %vm5415_vm9, %v5414_v49 }
 0xcf6   : > { %v2585_v39 = vpop.trf.xlu0 }
 0xcf7   : > { %v2675_v54 = vsel %vm1210_vm12, %v2585_v39, 0 }
 0xcf8   : > { %4625 = vmatpush3.bf16.msra.mxu1 %v2675_v54 }
 0xcf9   : > { %4636 = vmatprep.subr.bf16.mxu1 %v5414_v49 }
 0xd7c   : > { %v2528_v23 = vpop.f32.mrf.mxu1 }
 0xd7d   : > { %v2529_v20 = vadd.f32 %v4319_v55, %v2528_v23 }
 0xd7e   : > { %v4616_v57 = vpop.f32.mrf.mxu1 }
 0xd7f   : > { %v6165_v59 = vpack.c.bf16 %v2529_v20, %v2529_v20 }
 0xd80   : > { %v2531_v62 = vpop.f32.mrf.mxu1 }
 0xd81   : > { %2538 = vrot.lane.b32.xlu1 %v6165_v59, %s5418_s13  ;;  %2536 = vrot.lane.b32.xlu0 %v6165_v59, %s5416_s12 }
 0xd82   : > { %4621 = vmatmul.mubr.msk.bf16.vlgmr.msra.gmra.mxu0 %vm1206_vm13, %v6165_v59  ;;  %v4617_v46 = vpop.f32.mrf.mxu1 }
 0xd83   : > { %4632 = vmatprep.mubr.msk.bf16.mxu0 %vm5415_vm9, %v5414_v49 }
 0xd85   : > { %2540 = vrot.lane.b32.xlu0 %v6165_v59, %s5417_s6 }
 0xda3   : > { %2593 = vxpose.xlu0.c.b16.start.end [1/1] (short) (narrow) %v2548_v48, 16 }
 0xda4   : > { %2609 = vxpose.xlu1.c.b16.start.end [1/1] (short) (narrow) %v2551_v50, 16 }
 0xda8   : > { %3076 = vrot.lane.b32.xlu1 %v6177_v56, %s5418_s13 }
 0xdac   : > { %3073 = vrot.lane.b32.xlu0 %v6177_v56, %s5416_s12  ;;  %3079 = vrot.lane.b32.xlu1 %v6177_v56, %s5417_s6 }
 0xdf3   : > { %v6185_v61 = vpop.permute.xlu0 %2536  ;;  %v6193_v63 = vpop.permute.xlu1 %2538 }
 0xdf4   : > { %4627 = vmatmul.mubr.msk.bf16.vlgmr.msra.gmra.mxu1 %vm1206_vm13, %v6185_v61 }
 0xdf5   : > { %4638 = vmatprep.mubr.msk.bf16.mxu1 %vm5415_vm9, %v5414_v49 }
 0xdf7   : > { %v6191_v19 = vpop.permute.xlu0 %2540 }
 0xe05   : > { %v2601_v35 = vpop.trf.xlu0 }
 0xe06   : > { %v2721_v2 = vsel %vm1210_vm12, %v2601_v35, 0  ;;  %v2617_v3 = vpop.trf.xlu1 }
 0xe07   : > { %v2767_v7 = vsel %vm1210_vm12, %v2617_v3, 0  ;;  %4631 = vmatpush3.bf16.msra.mxu0 %v2721_v2 }
 0xe08   : > { %4637 = vmatpush3.bf16.msra.mxu1 %v2767_v7  ;;  %4642 = vmatprep.subr.bf16.mxu0 %v5414_v49 }
 0xe09   : > { %4648 = vmatprep.subr.bf16.mxu1 %v5414_v49 }
 0xe0a   : > { %4633 = vmatmul.mubr.msk.bf16.vlgmr.msra.gmra.mxu0 %vm1206_vm13, %v6193_v63 }
 0xe0b   : > { %4639 = vmatmul.mubr.msk.bf16.vlgmr.msra.gmra.mxu1 %vm1206_vm13, %v6191_v19  ;;  %4644 = vmatprep.mubr.msk.bf16.mxu0 %vm5415_vm9, %v5414_v49 }
 0xe0c   : > { %4650 = vmatprep.mubr.msk.bf16.mxu1 %vm5415_vm9, %v5414_v49  ;;  %4643 = vmatpush3.bf16.msra.mxu0 %v2887_v13 }
 0xe0d   : > { %4654 = vmatprep.subr.bf16.mxu0 %v5414_v49 }
 0xe1a   : > { %v3077_v51 = vpop.permute.xlu1 %3076 }
 0xe1e   : > { %v3074_v40 = vpop.permute.xlu0 %3073  ;;  %v3080_v39 = vpop.permute.xlu1 %3079 }
 0xe42   : > { %v2665_v5 = vpop.f32.mrf.mxu0 }
 0xe43   : > { %v2815_v32 = vsel %vm6210_vm8, %v2665_v5, -1e+09 }
 0xe44   : > { %v4622_v6 = vpop.f32.mrf.mxu0  ;;  %v2819_v8 = vsel %vm1206_vm13, %v2815_v32, -inf }
 0xe45   : > { %2820 = vmax.xlane.f32.xlu0 %v2819_v8 }
 0xe46   : > { %v2668_v9 = vpop.f32.mrf.mxu0 }
 0xe48   : > { %v4623_v10 = vpop.f32.mrf.mxu0 }
 0xe5b   : > { %2555 = vrot.lane.b32.xlu0 %v2553_v52, %s5416_s12 }
 0xeb4   : > { %v2711_v60 = vpop.f32.mrf.mxu1 }
 0xeb5   : > { %v2816_v29 = vsel %vm6210_vm8, %v2711_v60, -1e+09 }
 0xeb6   : > { %v4628_v16 = vpop.f32.mrf.mxu1  ;;  %v2822_v18 = vsel %vm1206_vm13, %v2816_v29, -inf }
 0xeb7   : > { %2823 = vmax.xlane.f32.xlu1 %v2822_v18 }
 0xeb8   : > { %v2714_v11 = vpop.f32.mrf.mxu1 }
 0xeba   : > { %v4629_v17 = vpop.f32.mrf.mxu1 }
 0xeca   : > { %v2757_v24 = vpop.f32.mrf.mxu0 }
 0xecb   : > { %v2817_v58 = vsel %vm6210_vm8, %v2757_v24, -1e+09  ;;  %v2803_v26 = vpop.f32.mrf.mxu1 }
 0xecc   : > { %v2818_v28 = vsel %vm6210_vm8, %v2803_v26, -1e+09  ;;  %v4634_v21 = vpop.f32.mrf.mxu0  ;;  %v2825_v31 = vsel %vm1206_vm13, %v2817_v58, -inf }
 0xecd   : > { %v4640_v33 = vpop.f32.mrf.mxu1  ;;  %2826 = vmax.xlane.f32.xlu0 %v2825_v31  ;;  %v2828_v34 = vsel %vm1206_vm13, %v2818_v28, -inf }
 0xece   : > { %v2821_v37 = vpop.xlane.xlu0 %2820  ;;  %2829 = vmax.xlane.f32.xlu1 %v2828_v34  ;;  %v2760_v42 = vpop.f32.mrf.mxu0 }
 0xecf   : > { %v6229_v25 = vmax.f32 %v2821_v37, -1e+30  ;;  %v2806_v15 = vpop.f32.mrf.mxu1 }
 0xed0   : > { %v4635_v43 = vpop.f32.mrf.mxu0 }
 0xed1   : > { %v2847_v44 = vsub.f32 %v2815_v32, %v6229_v25  ;;  %v4641_v30 = vpop.f32.mrf.mxu1  ;;  %v2835_v4 = vsub.f32 -1e+30, %v6229_v25 }
 0xed2   : > { %v2556_v45 = vpop.permute.xlu0 %2555 }
 0xed3   : > { %v2851_v14 = vmul.f32 1.442695, %v2847_v44  ;;  %v2933_v48 = vsel %vm1210_vm12, %v2556_v45, 0 }
 0xed4   : > { %4649 = vmatpush3.bf16.msra.mxu1 %v2933_v48 }
 0xed5   : > { %5006 = vpow2.f32 %v2851_v14  ;;  %4660 = vmatprep.subr.bf16.mxu1 %v5414_v49 }
 0xedf   : > { %2557 = vrot.lane.b32.xlu1 %v2553_v52, %s5418_s13 }
 0xee2   : > { %v6235_v50 = vpop.eup %5006 }
 0xee3   : > { %2559 = vrot.lane.b32.xlu0 %v2553_v52, %s5417_s6  ;;  %v2879_v47 = vpack.c.bf16 %v6235_v50, %v6235_v50 }
 0xee5   : > { %4645 = vmatmul.mubr.msk.bf16.vlgmr.msra.gmra.mxu0 %vm1206_vm13, %v2879_v47 }
 0xee6   : > { %4656 = vmatprep.mubr.msk.bf16.mxu0 %vm5415_vm9, %v5414_v49 }
 0xf01   : > { %3106 = vxpose.xlu0.c.b16.start.end [1/1] (short) (narrow) %v3074_v40, 16 }
 0xf02   : > { %3090 = vxpose.xlu1.c.b16.start.end [1/1] (short) (narrow) %v6177_v56, 16 }
 0xf05   : > { %3122 = vxpose.xlu0.c.b16.start.end [1/1] (short) (narrow) %v3077_v51, 16 }
 0xf06   : > { %3138 = vxpose.xlu1.c.b16.start.end [1/1] (short) (narrow) %v3080_v39, 16 }
 0xf40   : > { %v2824_v54 = vpop.xlane.xlu1 %2823 }
 0xf41   : > { %v6244_v55 = vmax.f32 %v2824_v54, -1e+30 }
 0xf43   : > { %v2848_v23 = vsub.f32 %v2816_v29, %v6244_v55 }
 0xf45   : > { %v2853_v20 = vmul.f32 1.442695, %v2848_v23 }
 0xf47   : > { %5008 = vpow2.f32 %v2853_v20 }
 0xf54   : > { %v6247_v57 = vpop.eup %5008 }
 0xf55   : > { %v2880_v62 = vpack.c.bf16 %v6247_v57, %v6247_v57 }
 0xf56   : > { %v2827_v46 = vpop.xlane.xlu0 %2826 }
 0xf57   : > { %v6251_v35 = vmax.f32 %v2827_v46, -1e+30  ;;  %v2830_v2 = vpop.xlane.xlu1 %2829  ;;  %4651 = vmatmul.mubr.msk.bf16.vlgmr.msra.gmra.mxu1 %vm1206_vm13, %v2880_v62 }
 0xf58   : > { %v6254_v56 = vmax.f32 %v2830_v2, -1e+30  ;;  %4662 = vmatprep.mubr.msk.bf16.mxu1 %vm5415_vm9, %v5414_v49 }
 0xf59   : > { %v2849_v3 = vsub.f32 %v2817_v58, %v6251_v35 }
 0xf5a   : > { %v2850_v7 = vsub.f32 %v2818_v28, %v6254_v56  ;;  %v2560_v27 = vpop.permute.xlu0 %2559 }
 0xf5b   : > { %v2855_v36 = vmul.f32 1.442695, %v2849_v3  ;;  %v2558_v41 = vpop.permute.xlu1 %2557  ;;  %v3025_v5 = vsel %vm1210_vm12, %v2560_v27, 0 }
 0xf5c   : > { %v2857_v32 = vmul.f32 1.442695, %v2850_v7  ;;  %v2979_v6 = vsel %vm1210_vm12, %v2558_v41, 0  ;;  %4661 = vmatpush3.bf16.msra.mxu1 %v3025_v5 }
 0xf5d   : > { %5010 = vpow2.f32 %v2855_v36  ;;  %4655 = vmatpush3.bf16.msra.mxu0 %v2979_v6  ;;  %4672 = vmatprep.subr.bf16.mxu1 %v5414_v49 }
 0xf5e   : > { %5012 = vpow2.f32 %v2857_v32  ;;  %4666 = vmatprep.subr.bf16.mxu0 %v5414_v49 }
 0xf63   : > { %v3114_v9 = vpop.trf.xlu0 }
 0xf64   : > { %v3098_v8 = vpop.trf.xlu1  ;;  %v3198_v16 = vsel %vm1210_vm12, %v3114_v9, 0 }
 0xf65   : > { %v3155_v60 = vsel %vm1210_vm12, %v3098_v8, 0 }
 0xf67   : > { %v3130_v18 = vpop.trf.xlu0 }
 0xf68   : > { %v3146_v11 = vpop.trf.xlu1  ;;  %v3241_v17 = vsel %vm1210_vm12, %v3130_v18, 0  ;;  %v6326_v18 = vld [vmem:[#allocation5 + $0x4] sm:$0xf] }
 0xf69   : > { %v3284_v40 = vsel %vm1210_vm12, %v3146_v11, 0  ;;  %v3437_v11 = vsel %vm1210_vm12, %v6326_v18, 0 }
 0xf6a   : > { %v6264_v10 = vpop.eup %5010 }
 0xf6b   : > { %v6266_v52 = vpop.eup %5012  ;;  %v2881_v13 = vpack.c.bf16 %v6264_v10, %v6264_v10 }
 0xf6c   : > { %v2882_v29 = vpack.c.bf16 %v6266_v52, %v6266_v52 }
 0xf6d   : > { %4657 = vmatmul.mubr.msk.bf16.vlgmr.msra.gmra.mxu0 %vm1206_vm13, %v2881_v13 }
 0xf6e   : > { %4663 = vmatmul.mubr.msk.bf16.vlgmr.msra.gmra.mxu1 %vm1206_vm13, %v2882_v29  ;;  %4667 = vmatpush3.bf16.msra.mxu0 %v3155_v60 }
 0xf6f   : > { %4673 = vmatpush3.bf16.msra.mxu1 %v3198_v16  ;;  %4668 = vmatprep.mubr.msk.bf16.mxu0 %vm5415_vm9, %v5414_v49 }
 0xf70   : > { %4674 = vmatprep.mubr.msk.bf16.mxu1 %vm5415_vm9, %v5414_v49  ;;  %4678 = vmatprep.subr.bf16.mxu0 %v5414_v49 }
 0xf71   : > { %4684 = vmatprep.subr.bf16.mxu1 %v5414_v49 }
 0xf75   : > { %4669 = vmatmul.mubr.msk.bf16.vlgmr.msra.gmra.mxu0 %vm1206_vm13, %v6165_v59 }
 0xf76   : > { %4675 = vmatmul.mubr.msk.bf16.vlgmr.msra.gmra.mxu1 %vm1206_vm13, %v6185_v61  ;;  %4679 = vmatpush3.bf16.msra.mxu0 %v3241_v17  ;;  %v2836_v17 = vsub.f32 -1e+30, %v6244_v55 }
 0xf77   : > { %4685 = vmatpush3.bf16.msra.mxu1 %v3284_v40  ;;  %4680 = vmatprep.mubr.msk.bf16.mxu0 %vm5415_vm9, %v5414_v49  ;;  %v2839_v40 = vmul.f32 1.442695, %v2835_v4 }
 0xf78   : > { %4686 = vmatprep.mubr.msk.bf16.mxu1 %vm5415_vm9, %v5414_v49  ;;  %4690 = vmatprep.subr.bf16.mxu0 %v5414_v49 }
 0xf79   : > { %4696 = vmatprep.subr.bf16.mxu1 %v5414_v49  ;;  %5014 = vpow2.f32 %v2839_v40 }
 0xf7d   : > { %4681 = vmatmul.mubr.msk.bf16.vlgmr.msra.gmra.mxu0 %vm1206_vm13, %v6193_v63 }
 0xf7e   : > { %4687 = vmatmul.mubr.msk.bf16.vlgmr.msra.gmra.mxu1 %vm1206_vm13, %v6191_v19  ;;  %4692 = vmatprep.mubr.msk.bf16.mxu0 %vm5415_vm9, %v5414_v49 }
 0xf7f   : > { %4698 = vmatprep.mubr.msk.bf16.mxu1 %vm5415_vm9, %v5414_v49  ;;  %4691 = vmatpush3.bf16.msra.mxu0 %v3437_v11 }
 0xf80   : > { %4702 = vmatprep.subr.bf16.mxu0 %v5414_v49 }
 0xfa5   : > { %v6302_v59 = vpop.f32.mrf.mxu0 }
 0xfa7   : > { %v4646_v61 = vpop.f32.mrf.mxu0 }
 0xfa8   : > { %v2837_v61 = vsub.f32 -1e+30, %v6251_v35 }
 0xfa9   : > { %v2926_v24 = vpop.f32.mrf.mxu0 }
 0xfaa   : > { %v2841_v24 = vmul.f32 1.442695, %v2836_v17 }
 0xfab   : > { %v4647_v58 = vpop.f32.mrf.mxu0 }
 0xfac   : > { %5016 = vpow2.f32 %v2841_v24 }
0x1017   : > { %v6304_v26 = vpop.f32.mrf.mxu1 }
0x1019   : > { %v4652_v28 = vpop.f32.mrf.mxu1 }
0x101b   : > { %v2972_v21 = vpop.f32.mrf.mxu1 }
0x101d   : > { %v4653_v31 = vpop.f32.mrf.mxu1 }
0x101e   : > { %v2843_v31 = vmul.f32 1.442695, %v2837_v61 }
0x1020   : > { %5018 = vpow2.f32 %v2843_v31 }
0x102d   : > { %v6306_v63 = vpop.f32.mrf.mxu0 }
0x102e   : > { %v6308_v33 = vpop.f32.mrf.mxu1 }
0x102f   : > { %v4658_v19 = vpop.f32.mrf.mxu0 }
0x1030   : > { %v4664_v34 = vpop.f32.mrf.mxu1 }
0x1031   : > { %v3018_v37 = vpop.f32.mrf.mxu0  ;;  %v2838_v34 = vsub.f32 -1e+30, %v6254_v56 }
0x1032   : > { %v3064_v42 = vpop.f32.mrf.mxu1 }
0x1033   : > { %v4659_v15 = vpop.f32.mrf.mxu0 }
0x1034   : > { %v4665_v43 = vpop.f32.mrf.mxu1 }
0x1035   : > { %v3191_v44 = vpop.f32.mrf.mxu0 }
0x1036   : > { %v3234_v30 = vpop.f32.mrf.mxu1  ;;  %3330 = vrot.lane.b32.xlu0 %v3191_v44, %s5420_s15 }
0x1037   : > { %3332 = vrot.lane.b32.xlu1 %v3234_v30, %s5420_s15  ;;  %v4670_v45 = vpop.f32.mrf.mxu0 }
0x1038   : > { %v4676_v14 = vpop.f32.mrf.mxu1 }
0x1039   : > { %v3194_v48 = vpop.f32.mrf.mxu0 }
0x103a   : > { %v3237_v47 = vpop.f32.mrf.mxu1  ;;  %v2845_v48 = vmul.f32 1.442695, %v2838_v34 }
0x103b   : > { %v4671_v51 = vpop.f32.mrf.mxu0 }
0x103c   : > { %v4677_v39 = vpop.f32.mrf.mxu1 }
0x103d   : > { %v3277_v54 = vpop.f32.mrf.mxu0 }
0x103e   : > { %v3320_v23 = vpop.f32.mrf.mxu1  ;;  %3334 = vrot.lane.b32.xlu1 %v3277_v54, %s5420_s15 }
0x103f   : > { %3336 = vrot.lane.b32.xlu0 %v3320_v23, %s5420_s15  ;;  %v4682_v20 = vpop.f32.mrf.mxu0 }
0x1040   : > { %v4688_v62 = vpop.f32.mrf.mxu1 }
0x1041   : > { %v3280_v46 = vpop.f32.mrf.mxu0 }
0x1042   : > { %v3323_v2 = vpop.f32.mrf.mxu1 }
0x1043   : > { %v4683_v3 = vpop.f32.mrf.mxu0 }
0x1044   : > { %v4689_v7 = vpop.f32.mrf.mxu1 }
0x1045   : > { %v5015_v7 = vpop.eup %5014 }
0x10a8   : > { %v3331_v27 = vpop.permute.xlu0 %3330 }
0x10a9   : > { %v3342_v36 = vsel %vm6210_vm8, %v3331_v27, -1e+09  ;;  %v3333_v41 = vpop.permute.xlu1 %3332 }
0x10aa   : > { %v3343_v5 = vsel %vm6210_vm8, %v3333_v41, -1e+09  ;;  %v3346_v32 = vsel %vm1925_vm1, %v3342_v36, -inf  ;;  %v5017_v41 = vpop.eup %5016 }
0x10ab   : > { %3347 = vmax.xlane.f32.xlu1 %v3346_v32  ;;  %v3349_v6 = vsel %vm1925_vm1, %v3343_v5, -inf  ;;  %v6353_v32 = vmul.f32 0.0, %v5017_v41 }
0x10ac   : > { %3350 = vmax.xlane.f32.xlu0 %v3349_v6 }
0x10b0   : > { %v3335_v8 = vpop.permute.xlu1 %3334 }
0x10b1   : > { %v3344_v9 = vsel %vm6210_vm8, %v3335_v8, -1e+09  ;;  %v3337_v13 = vpop.permute.xlu0 %3336 }
0x10b2   : > { %v3345_v60 = vsel %vm6210_vm8, %v3337_v13, -1e+09  ;;  %v3352_v29 = vsel %vm1925_vm1, %v3344_v9, -inf }
0x10b3   : > { %3353 = vmax.xlane.f32.xlu0 %v3352_v29  ;;  %v3355_v16 = vsel %vm1925_vm1, %v3345_v60, -inf }
0x10b4   : > { %3356 = vmax.xlane.f32.xlu1 %v3355_v16 }
0x10c9   : > { %3084 = vrot.lane.b32.xlu0 %v6326_v18, %s5416_s12 }
0x10cd   : > { %3086 = vrot.lane.b32.xlu0 %v6326_v18, %s5418_s13  ;;  %s6661_s13 = sld [smem:[#allocation34_spill]] }
0x10d3   : > { %p6666_p0 = scmp.ne.s32.totalorder %s6661_s13, 0 }
0x10d5   : > { %p5264_p7 = pnand %p5263_p1, %p6666_p0 }
0x10d7   : > { %p5265_p5 = pneg %p5264_p7 }
0x1134   : > { %v3348_v58 = vpop.xlane.xlu1 %3347 }
0x1135   : > { %v3358_v28 = vmax.f32 %v6229_v25, %v3348_v58  ;;  %v3351_v21 = vpop.xlane.xlu0 %3350 }
0x1136   : > { %v3359_v19 = vmax.f32 %v6244_v55, %v3351_v21 }
0x1137   : > { %v3362_v37 = vsub.f32 %v6229_v25, %v3358_v28  ;;  %v3374_v42 = vsub.f32 %v3342_v36, %v3358_v28 }
0x1138   : > { %v3363_v15 = vsub.f32 %v6244_v55, %v3359_v19  ;;  %v3375_v43 = vsub.f32 %v3343_v5, %v3359_v19  ;;  %v6349_v5 = vmul.f32 0.0, %v5015_v7 }
0x1139   : > { %v3366_v44 = vmul.f32 1.442695, %v3362_v37  ;;  %v3378_v30 = vmul.f32 1.442695, %v3374_v42  ;;  %v2869_v37 = vsel %vm1206_vm13, %v6264_v10, 0.0  ;;  %v2866_v42 = vsel %vm1206_vm13, %v6247_v57, 0.0 }
0x113a   : > { %v3368_v45 = vmul.f32 1.442695, %v3363_v15  ;;  %v3380_v14 = vmul.f32 1.442695, %v3375_v43 }
0x113b   : > { %5020 = vpow2.f32 %v3366_v44 }
0x113c   : > { %5022 = vpow2.f32 %v3378_v30  ;;  %v3354_v47 = vpop.xlane.xlu0 %3353 }
0x113d   : > { %5024 = vpow2.f32 %v3368_v45  ;;  %v3360_v51 = vmax.f32 %v6251_v35, %v3354_v47  ;;  %v3357_v39 = vpop.xlane.xlu1 %3356 }
0x113e   : > { %5026 = vpow2.f32 %v3380_v14  ;;  %v3361_v25 = vmax.f32 %v6254_v56, %v3357_v39 }
0x113f   : > { %5028 = vpow2.f32 %v2845_v48  ;;  %v3364_v55 = vsub.f32 %v6251_v35, %v3360_v51  ;;  %v3376_v54 = vsub.f32 %v3344_v9, %v3360_v51  ;;  %v5019_v35 = vpop.eup %5018  ;;  %v3068_v9 = vadd.f32 %v6304_v26, %v6353_v32 }
0x1140   : > { %v3365_v23 = vsub.f32 %v6254_v56, %v3361_v25  ;;  %v3377_v20 = vsub.f32 %v3345_v60, %v3361_v25  ;;  %v3085_v62 = vpop.permute.xlu0 %3084  ;;  %v3067_v56 = vadd.f32 %v6302_v59, %v6349_v5  ;;  %v6368_v59 = vmul.f32 0.0, %v5019_v35 }
0x1141   : > { %v3370_v46 = vmul.f32 1.442695, %v3364_v55  ;;  %v3382_v2 = vmul.f32 1.442695, %v3376_v54  ;;  %v3486_v3 = vsel %vm1210_vm12, %v3085_v62, 0 }
0x1142   : > { %v3372_v27 = vmul.f32 1.442695, %v3365_v23  ;;  %v3384_v36 = vmul.f32 1.442695, %v3377_v20  ;;  %4697 = vmatpush3.bf16.msra.mxu1 %v3486_v3  ;;  %v3069_v40 = vadd.f32 %v6306_v63, %v6368_v59 }
0x1143   : > { %5030 = vpow2.f32 %v3370_v46  ;;  %4708 = vmatprep.subr.bf16.mxu1 %v5414_v49 }
0x1144   : > { %5032 = vpow2.f32 %v3382_v2  ;;  %v3087_v15 = vpop.permute.xlu0 %3086 }
0x1145   : > { %5034 = vpow2.f32 %v3372_v27  ;;  %v3535_v43 = vsel %vm1210_vm12, %v3087_v15, 0 }
0x1146   : > { %5036 = vpow2.f32 %v3384_v36 }
0x1148   : > { %v6355_v6 = vpop.eup %5020 }
0x1149   : > { %v5023_v8 = vpop.eup %5022  ;;  %v6360_v13 = vmul.f32 %v6355_v6, %v3067_v56 }
0x114a   : > { %v6362_v60 = vpop.eup %5024  ;;  %v3426_v29 = vpack.c.bf16 %v5023_v8, %v5023_v8 }
0x114b   : > { %v5027_v16 = vpop.eup %5026  ;;  %v6365_v11 = vmul.f32 %v6362_v60, %v3068_v9 }
0x114c   : > { %v5029_v4 = vpop.eup %5028  ;;  %3431 = vrot.lane.b32.xlu1 %v3426_v29, %s5416_s12  ;;  %v3427_v17 = vpack.c.bf16 %v5027_v16, %v5027_v16 }
0x114d   : > { %v6372_v26 = vmul.f32 0.0, %v5029_v4 }
0x114f   : > { %v3070_v58 = vadd.f32 %v6308_v33, %v6372_v26  ;;  %v2863_v33 = vsel %vm1206_vm13, %v6235_v50, 0.0 }
0x1150   : > { %v6374_v61 = vpop.eup %5030  ;;  %3480 = vrot.lane.b32.xlu1 %v3427_v17, %s5416_s12 }
0x1151   : > { %v5033_v24 = vpop.eup %5032  ;;  %v6380_v28 = vmul.f32 %v6374_v61, %v3069_v40 }
0x1152   : > { %v6382_v21 = vpop.eup %5034  ;;  %v3428_v31 = vpack.c.bf16 %v5033_v24, %v5033_v24 }
0x1153   : > { %v5037_v19 = vpop.eup %5036  ;;  %v6385_v34 = vmul.f32 %v6382_v21, %v3070_v58 }
0x1154   : > { %3529 = vrot.lane.b32.xlu0 %v3428_v31, %s5416_s12  ;;  %3088 = vrot.lane.b32.xlu1 %v6326_v18, %s5417_s6  ;;  %v3429_v63 = vpack.c.bf16 %v5037_v19, %v5037_v19  ;;  %v2872_v18 = vsel %vm1206_vm13, %v6266_v52, 0.0 }
0x1158   : > { %3394 = vrot.lane.b32.xlu0 %v5023_v8, %s5416_s12  ;;  %3578 = vrot.lane.b32.xlu1 %v3429_v63, %s5416_s12 }
0x115c   : > { %3398 = vrot.lane.b32.xlu0 %v5033_v24, %s5416_s12  ;;  %3396 = vrot.lane.b32.xlu1 %v5027_v16, %s5416_s12 }
0x1160   : > { %3400 = vrot.lane.b32.xlu1 %v5037_v19, %s5416_s12  ;;  %s4356_s12 = sshll.u32 %s6660_s17, 1 }
0x1161   : > { %s4053_s6 = sadd.s32 %s6654_s2, %s4356_s12  ;;  %s6665_s2 = sand.u32 1, %s5362_s26  }
0x1162   : > { %s4357_s1 = sshll.u32 %s4053_s6, 7  ;;  %s4042_s17 = scalar_lea.sflag [#allocation8], %s6665_s2 }
0x1163   : > { %s6500_s16 = scalar_lea.hbm %s6663_s14, %s4357_s1  ;;  %s5425_s12 = smov [#allocation20]  }
0x1164   : > { %s5266_s6 = sshll.u32 %s5425_s12, 4  ;;  %s5267_s6 = int_to_ptr.vmem [resolvable:$false] %s5266_s6 }
0x1165   : > { %p5269_p11 = scmp.lt.s32.totalorder %s6502_s8, %s5267_s6 }
0x117b   : > { %2864 = vadd.xlane.f32.xlu0 %v2863_v33 }
0x117f   : > { %2870 = vadd.xlane.f32.xlu0 %v2869_v37 }
0x1183   : > { %2873 = vadd.xlane.f32.xlu0 %v2872_v18 }
0x1184   : > { %2867 = vadd.xlane.f32.xlu1 %v2866_v42 }
0x11be   : > { %v3432_v44 = vpop.permute.xlu1 %3431 }
0x11bf   : > { %4693 = vmatmul.mubr.msk.bf16.vlgmr.msra.gmra.mxu0 %vm1206_vm13, %v3432_v44 }
0x11c0   : > { %4703 = vmatpush3.bf16.msra.mxu0 %v3535_v43  ;;  %4704 = vmatprep.mubr.msk.bf16.mxu0 %vm5415_vm9, %v5414_v49 }
0x11c1   : > { %4714 = vmatprep.subr.bf16.mxu0 %v5414_v49 }
0x11c2   : > { %v3481_v50 = vpop.permute.xlu1 %3480 }
0x11c3   : > { %4699 = vmatmul.mubr.msk.bf16.vlgmr.msra.gmra.mxu1 %vm1206_vm13, %v3481_v50 }
0x11c4   : > { %4710 = vmatprep.mubr.msk.bf16.mxu1 %vm5415_vm9, %v5414_v49 }
0x11c6   : > { %v3530_v57 = vpop.permute.xlu0 %3529  ;;  %v3089_v10 = vpop.permute.xlu1 %3088 }
0x11c7   : > { %v3584_v52 = vsel %vm1210_vm12, %v3089_v10, 0  ;;  %4705 = vmatmul.mubr.msk.bf16.vlgmr.msra.gmra.mxu0 %vm1206_vm13, %v3530_v57 }
0x11c8   : > { %4709 = vmatpush3.bf16.msra.mxu1 %v3584_v52  ;;  %4718 = vmatprep.mubr.msk.bf16.mxu0 %vm5415_vm9, %v5414_v49 }
0x11c9   : > { %4722 = vmatprep.subr.bf16.mxu1 %v5414_v49 }
0x11ca   : > { %v3395_v30 = vpop.permute.xlu0 %3394  ;;  %v3579_v45 = vpop.permute.xlu1 %3578 }
0x11cb   : > { %v3406_v14 = vsel %vm1206_vm13, %v3395_v30, 0.0  ;;  %4711 = vmatmul.mubr.msk.bf16.vlgmr.msra.gmra.mxu1 %vm1206_vm13, %v3579_v45 }
0x11cc   : > { %3407 = vadd.xlane.f32.xlu1 %v3406_v14  ;;  %4726 = vmatprep.mubr.msk.bf16.mxu1 %vm5415_vm9, %v5414_v49 }
0x11ce   : > { %v3399_v48 = vpop.permute.xlu0 %3398  ;;  %v3397_v47 = vpop.permute.xlu1 %3396 }
0x11cf   : > { %v3412_v51 = vsel %vm1206_vm13, %v3399_v48, 0.0  ;;  %v3409_v39 = vsel %vm1206_vm13, %v3397_v47, 0.0 }
0x11d0   : > { %3413 = vadd.xlane.f32.xlu1 %v3412_v51  ;;  %3410 = vadd.xlane.f32.xlu0 %v3409_v39 }
0x11d2   : > { %v3401_v25 = vpop.permute.xlu1 %3400 }
0x11d3   : > { %v3415_v55 = vsel %vm1206_vm13, %v3401_v25, 0.0 }
0x11d4   : > { %3416 = vadd.xlane.f32.xlu0 %v3415_v55 }
0x1204   : > { %v2865_v54 = vpop.xlane.xlu0 %2864 }
0x1205   : > { %v2875_v62 = vadd.f32 %v2865_v54, %v6349_v5 }
0x1207   : > { %v3386_v7 = vmul.f32 %v6355_v6, %v2875_v62  ;;  %v4950_v62 = vld [vmem:[#allocation14 + $0x78] sm:$0xff]  }
0x1208   : > { %v2871_v23 = vpop.xlane.xlu0 %2870  ;;  %4715 = vmatpush3.bf16.msra.mxu0 %v4950_v62 }
0x1209   : > { %v2877_v41 = vadd.f32 %v2871_v23, %v6368_v59  ;;  %4716 = vmatprep.subr.bf16.mxu0 %v5414_v49 }
0x120b   : > { %v3388_v29 = vmul.f32 %v6374_v61, %v2877_v41 }
0x120c   : > { %v2874_v46 = vpop.xlane.xlu0 %2873 }
0x120d   : > { %v2868_v20 = vpop.xlane.xlu1 %2867  ;;  %v2878_v9 = vadd.f32 %v2874_v46, %v6372_v26 }
0x120e   : > { %v2876_v3 = vadd.f32 %v2868_v20, %v6353_v32 }
0x120f   : > { %v3389_v32 = vmul.f32 %v6382_v21, %v2878_v9 }
0x1210   : > { %v3387_v35 = vmul.f32 %v6362_v60, %v2876_v3 }
0x1255   : > { %v3408_v2 = vpop.xlane.xlu1 %3407 }
0x1256   : > { %v3418_v27 = vadd.f32 %v3408_v2, %v3386_v7 }
0x1258   : > { %5038 = vrcp.f32 %v3418_v27 }
0x1259   : > { %v3411_v36 = vpop.xlane.xlu0 %3410  ;;  %v3414_v8 = vpop.xlane.xlu1 %3413 }
0x125a   : > { %v3419_v56 = vadd.f32 %v3411_v36, %v3387_v35  ;;  %v3420_v5 = vadd.f32 %v3414_v8, %v3388_v29 }
0x125c   : > { %5040 = vrcp.f32 %v3419_v56  ;;  %v4951_v56 = vld [vmem:[#allocation14 + $0x70] sm:$0xff]  }
0x125d   : > { %v3417_v16 = vpop.xlane.xlu0 %3416  ;;  %5042 = vrcp.f32 %v3420_v5  ;;  %4717 = vmatpush3.bf16.msra.mxu0 %v4951_v56 }
0x125e   : > { %v3421_v6 = vadd.f32 %v3417_v16, %v3389_v32  ;;  %4730 = vmatprep.subr.bf16.mxu0 %v5414_v49 }
0x1260   : > { %5044 = vrcp.f32 %v3421_v6 }
0x1265   : > { %v5039_v17 = vpop.eup %5038 }
0x1269   : > { %v5041_v31 = vpop.eup %5040 }
0x126a   : > { %v5043_v18 = vpop.eup %5042 }
0x126d   : > { %v5045_v52 = vpop.eup %5044 }
0x127f   : > { %v3473_v4 = vpop.f32.mrf.mxu0 }
0x1280   : > { %v3626_v59 = vadd.f32 %v3473_v4, %v6360_v13 }
0x1281   : > { %v4694_v60 = vpop.f32.mrf.mxu0 }
0x1282   : > { %v3634_v40 = vmul.f32 %v5039_v17, %v3626_v59 }
0x1283   : > { %v3476_v24 = vpop.f32.mrf.mxu0  ;;  %v3522_v58 = vpop.f32.mrf.mxu1 }
0x1284   : > { %v3627_v26 = vadd.f32 %v3522_v58, %v6365_v11 }
0x1285   : > { %v4695_v61 = vpop.f32.mrf.mxu0  ;;  %v4700_v19 = vpop.f32.mrf.mxu1 }
0x1286   : > { %v3635_v63 = vmul.f32 %v5041_v31, %v3627_v26 }
0x1287   : > { %v3525_v33 = vpop.f32.mrf.mxu1  ;;  %v3571_v37 = vpop.f32.mrf.mxu0 }
0x1288   : > { %v3628_v21 = vadd.f32 %v3571_v37, %v6380_v28 }
0x1289   : > { %v4701_v42 = vpop.f32.mrf.mxu1  ;;  %v4706_v15 = vpop.f32.mrf.mxu0 }
0x128a   : > { %v3636_v43 = vmul.f32 %v5043_v18, %v3628_v21  ;;  %v4341_v21 = vld [vmem:[#allocation15 + $0x7] ss:$0 sm:$0xff] }
0x128b   : > { %v3574_v13 = vpop.f32.mrf.mxu0  ;;  %v3620_v44 = vpop.f32.mrf.mxu1 }
0x128c   : > { %v3638_v50 = vcombine.low %v3634_v40, %v3636_v43  ;;  %v3639_v57 = vcombine.high %v3634_v40, %v3636_v43  ;;  %v3629_v10 = vadd.f32 %v3620_v44, %v6385_v34 }
0x128d   : > { %v4707_v11 = vpop.f32.mrf.mxu0  ;;  %v4712_v30 = vpop.f32.mrf.mxu1 }
0x128e   : > { %v3637_v45 = vmul.f32 %v5045_v52, %v3629_v10  ;;  %v3646_v28 = vrot.slane %v3638_v50, %v6111_v12  ;;  %v3653_v39 = vrot.slane %v3639_v57, %v6111_v12 }
0x128f   : > { %v3623_v14 = vpop.f32.mrf.mxu1 }
0x1290   : > { %v3654_v48 = vcombine.low %v3635_v63, %v3637_v45  ;;  %v3655_v47 = vcombine.high %v3635_v63, %v3637_v45  ;;  %v4952_v45 = vld [vmem:[#allocation17 + $0x8] sm:$0xff]   ;;  %v4953_v14 = vld [vmem:[#allocation17] sm:$0xff]  }
0x1291   : > { %v4713_v51 = vpop.f32.mrf.mxu1  ;;  %4723 = vmatpush3.bf16.msra.mxu1 %v4952_v45 }
0x1292   : > { %v3662_v25 = vrot.slane %v3654_v48, %v6111_v12  ;;  %v3669_v55 = vrot.slane %v3655_v47, %v6111_v12  ;;  %4724 = vmatprep.subr.bf16.mxu1 %v5414_v49  ;;  %v4955_v48 = vld [vmem:[%s6659_s19 + $0x10] sm:$0xff]  }
0x1294   : > { %v3670_v54 = vcombine.low %v3646_v28, %v3662_v25  ;;  %v3671_v23 = vcombine.high %v3646_v28, %v3662_v25  ;;  %v3686_v20 = vcombine.low %v3653_v39, %v3669_v55  ;;  %v3687_v34 = vcombine.high %v3653_v39, %v3669_v55 }
0x1295   : > { %4725 = vmatpush3.bf16.msra.mxu1 %v4953_v14 }
0x1296   : > { %v3678_v46 = vrot.slane %v3670_v54, %v6114_v22  ;;  %v3685_v2 = vrot.slane %v3671_v23, %v6114_v22  ;;  %v3694_v3 = vrot.slane %v3686_v20, %v6114_v22  ;;  %v3701_v7 = vrot.slane %v3687_v34, %v6114_v22 }
0x1297   : > { %v3878_v20 = vsub.s32 2, %v5797_v38 }
0x1298   : > { %v3706_v27 = vcombine.low %v3678_v46, %v3685_v2  ;;  %v4339_v36 = vcombine.high %v3678_v46, %v3685_v2  ;;  %v3722_v41 = vcombine.low %v3694_v3, %v3701_v7  ;;  %v4340_v35 = vcombine.high %v3694_v3, %v3701_v7 }
0x1299   : > { %v3879_v34 = vrot.slane %v5752_v0, %v3878_v20  ;;  %v3884_v2 = vrot.slane %v5754_v1, %v3878_v20  ;;  %v4957_v0 = vld [vmem:[%s6659_s19] sm:$0xff]   ;;  %v4345_v1 = vld [vmem:[#allocation18] ss:$0 sm:$0xff] }
0x129a   : > { %v3713_v8 = vrot.slane %v3706_v27, %v6111_v12  ;;  %v3721_v9 = vrot.slane %v4339_v36, %v6111_v12  ;;  %v3729_v29 = vrot.slane %v3722_v41, %v6111_v12  ;;  %v3737_v5 = vrot.slane %v4340_v35, %v6111_v12  ;;  %v4956_v36 = vld [vmem:[%s6659_s19 + $0x8] sm:$0xff]  }
0x129c   : > { %v3739_v16 = vcombine.high %v3713_v8, %v3721_v9  ;;  %v3755_v32 = vcombine.high %v3729_v29, %v3737_v5  ;;  %v3738_v6 = vcombine.low %v3713_v8, %v3721_v9  ;;  %v3754_v4 = vcombine.low %v3729_v29, %v3737_v5 }
0x129e   : > { %v3753_v59 = vrot.slane %v3739_v16, %v6114_v22  ;;  %v3769_v17 = vrot.slane %v3755_v32, %v6114_v22  ;;  %v3746_v60 = vrot.slane %v3738_v6, %v6114_v22  ;;  %v3762_v40 = vrot.slane %v3754_v4, %v6114_v22 }
0x12a0   : > { %v3772_v24 = vcombine.low %v3753_v59, %v3769_v17  ;;  %v3771_v58 = vcombine.high %v3746_v60, %v3762_v40  ;;  %v3773_v26 = vcombine.high %v3753_v59, %v3769_v17  ;;  %v3770_v31 = vcombine.low %v3746_v60, %v3762_v40 }
0x12a2   : > { %3779 = vrot.lane.b32.xlu0 %v3772_v24, %s5423_s24  ;;  %3775 = vrot.lane.b32.xlu1 %v3771_v58, %s5420_s15  ;;  %s5268_s15 = scalar_lea.vmem %s5267_s6, 256 }
0x12a3   : > { %p5270_p2 = scmp.lt.s32.totalorder %s5268_s15, %s5262_s0 }
0x12a5   : > { %p5271_p10 = por %p5270_p2, %p5269_p11 }
0x12a6   : > { %3783 = vrot.lane.b32.xlu1 %v3773_v26, %s5424_s21  ;;  %s6662_s21 = sld [smem:[#allocation44_spill]] }
0x12a7   : > { %p5272_p6 = pnand %p5271_p10, %p5265_p5 }
0x12ac   : > { %v4354_v5 = vld [vmem:[%s6662_s21] ss:$0 sm:$0xff] }
0x1314   : > { %v3776_v12 = vpop.permute.xlu1 %3775  ;;  %v3780_v61 = vpop.permute.xlu0 %3779 }
0x1315   : > { %v3786_v19 = vsel %vm1206_vm13, %v3770_v31, %v3776_v12 }
0x1316   : > { %v3787_v33 = vsel %vm2367_vm2, %v3786_v19, %v3780_v61 }
0x1318   : > { %v3784_v63 = vpop.permute.xlu1 %3783 }
0x1319   : > { %v3788_v37 = vsel %vm2369_vm3, %v3787_v33, %v3784_v63 }
0x131a   : > { %v3789_v22 = vpack.c.bf16 %v3788_v37, %v3788_v37 }
0x131c   : > { %4719 = vmatmul.mubr.msk.bf16.vlgmr.msra.gmra.mxu0 %vm1018_vm7, %v3789_v22 }
0x131d   : > { %4738 = vmatprep.mubr.msk.bf16.mxu0 %vm5415_vm9, %v5414_v49 }
0x13dc   : > { %v3849_v18 = vpop.f32.mrf.mxu0 }
0x13dd   : > { %v3850_v42 = vadd.f32 %v4341_v21, %v3849_v18 }
0x13de   : > { %v4720_v15 = vpop.f32.mrf.mxu0 }
0x13df   : > { %v6463_v43 = vadd.f32 %v3850_v42, %v6144_v53  ;;  %v4954_v53 = vld [vmem:[%s6659_s19 + $0x18] sm:$0xff]  }
0x13e0   : > { %v3852_v13 = vpop.f32.mrf.mxu0  ;;  %4731 = vmatpush3.bf16.msra.mxu0 %v4954_v53 }
0x13e1   : > { %v3856_v44 = vsel %vm1018_vm7, %v6463_v43, 0.0  ;;  %4732 = vmatprep.subr.bf16.mxu0 %v5414_v49 }
0x13e2   : > { %3857 = vadd.xlane.f32.xlu1 %v3856_v44  ;;  %v4721_v50 = vpop.f32.mrf.mxu0 }
0x13e4   : > { %4733 = vmatpush3.bf16.msra.mxu0 %v4955_v48 }
0x13e5   : > { %4734 = vmatprep.subr.bf16.mxu0 %v5414_v49 }
0x13e8   : > { %4735 = vmatpush3.bf16.msra.mxu0 %v4956_v36 }
0x13e9   : > { %4736 = vmatprep.subr.bf16.mxu0 %v5414_v49 }
0x13ec   : > { %4737 = vmatpush3.bf16.msra.mxu0 %v4957_v0 }
0x146b   : > { %v3858_v57 = vpop.xlane.xlu1 %3857 }
0x146c   : > { %v3859_v10 = vmul.f32 0.03125, %v3858_v57 }
0x146e   : > { %v3860_v52 = vsub.f32 %v6463_v43, %v3859_v10 }
0x1470   : > { %v3861_v11 = vmul.f32 %v3860_v52, %v3860_v52 }
0x1472   : > { %v3862_v30 = vsel %vm1018_vm7, %v3861_v11, 0.0 }
0x1473   : > { %3863 = vadd.xlane.f32.xlu0 %v3862_v30 }
0x14fc   : > { %v3864_v47 = vpop.xlane.xlu0 %3863 }
0x14fd   : > { %v3865_v51 = vmul.f32 0.032258064, %v3864_v47 }
0x14ff   : > { %5046 = vrsqrt.f32 %v3865_v51  ;;  %vm3868_vm9 = vcmp.eq.f32.partialorder %v3865_v51, inf  ;;  %v3871_v25 = vand.u32 2147483648, %v3865_v51  ;;  %vm3870_vm10 = vcmp.eq.f32.partialorder %v3865_v51, 0.0 }
0x150c   : > { %v5047_v28 = vpop.eup %5046 }
0x150d   : > { %v3867_v39 = vmul.f32 %v5047_v28, %v3865_v51 }
0x150f   : > { %v3869_v55 = vsel %vm3868_vm9, %v3865_v51, %v3867_v39 }
0x1510   : > { %v3872_v54 = vsel %vm3870_vm10, %v3871_v25, %v3869_v55 }
0x1511   : > { %v3873_v23 = vadd.f32 1e-06, %v3872_v54 }
0x1513   : > { %5048 = vrcp.f32 %v3873_v23 }
0x1520   : > { %v5049_v62 = vpop.eup %5048 }
0x1521   : > { %v3875_v46 = vmul.f32 %v5049_v62, %v3860_v52 }
0x1523   : > { %v3880_v3 = vmul.f32 %v3879_v34, %v3875_v46 }
0x1525   : > { %v3885_v7 = vadd.f32 %v3884_v2, %v3880_v3 }
0x1527   : > { %v3886_v27 = vpack.c.bf16 %v3885_v7, %v3885_v7 }
0x1529   : > { %4727 = vmatmul.mubr.msk.bf16.vlgmr.msra.gmra.mxu1 %vm1018_vm7, %v3886_v27 }
0x15e9   : > { %v3947_v38 = vpop.f32.mrf.mxu1 }
0x15ea   : > { %v3948_v41 = vadd.f32 %v4345_v1, %v3947_v38 }
0x15eb   : > { %v4728_v35 = vpop.f32.mrf.mxu1 }
0x15ec   : > { %v3953_v56 = vmax.f32 %v3948_v41, 0.0 }
0x15ed   : > { %v3950_v8 = vpop.f32.mrf.mxu1 }
0x15ee   : > { %v3954_v9 = vpack.c.bf16 %v3953_v56, %v3953_v56 }
0x15ef   : > { %v4729_v29 = vpop.f32.mrf.mxu1 }
0x15f0   : > { %4739 = vmatmul.mubr.msk.bf16.vlgmr.msra.gmra.mxu0 %vm3987_vm11, %v3954_v9 }
0x16b0   : > { %v4025_v49 = vpop.f32.mrf.mxu0 }
0x16b1   : > { %v4031_v16 = vadd.f32 %v4025_v49, %v6463_v43 }
0x16b2   : > { %v4740_v32 = vpop.f32.mrf.mxu0 }
0x16b3   : > { %v4039_v6 = vadd.f32 %v4354_v5, %v4031_v16 }
0x16b4   : > { %v4028_v4 = vpop.f32.mrf.mxu0 }
0x16b5   : > { %4040 = vst.msk [vmem:[%s609_s22] sm:$0xff] %vm1018_vm7, %v4039_v6 }
0x16b6   : > { %v4741_v59 = vpop.f32.mrf.mxu0 }
0x16b7   : > { %5275 = shalt.err (!%p5272_p6)
}
0x16b8   : > { %s5276_s22 = scalar_lea.hbm %s6500_s16, 128  ;;  %s5280_s21 = scalar_lea.hbm %s6664_s11, 512 }
0x16b9   : > { %p5277_p4 = scmp.ne.s32.totalorder %s6500_s16, %s5276_s22  ;;  %p5281_p3 = scmp.lt.s32.totalorder %s6500_s16, %s6664_s11 }
0x16ba   : > { %p5282_p13 = scmp.lt.s32.totalorder %s5280_s21, %s5276_s22 }
0x16bb   : > { %p5278_p12 = pnand %p5277_p4, %p6666_p0 }
0x16bc   : > { %p5283_p9 = por %p5282_p13, %p5281_p3 }
0x16bd   : > { %p5279_p8 = pneg %p5278_p12 }
0x16bf   : > { %p5284_p1 = pnand %p5283_p9, %p5279_p8 }
0x16c1   : > { %5287 = shalt.err (!%p5284_p1)
}
0x16c2   : > { %4770 = dma.vmem_to_hbm [thread:$0]  (%p6666_p0), %s6502_s8, 128, %s6500_s16, %s4042_s17  }
0x16c3 PF: > { %p4815_p7 = scmp.ge.s32.totalorder %s5398_s18, 2  ;;  %s4069_s23 = sand.u32 1, %s5358_s25  }
0x16c4   : > { %p6667_p5 = scmp.ne.s32.totalorder %s6631_s5, 0  ;;  %s4070_s14 = scalar_lea.sflag [#allocation8], %s4069_s23 }
0x16c6   : > { %p4799_p11 = pnand %p4815_p7, %p6667_p5 }
0x16c8   : > { %p4800_p2 = pneg %p4799_p11 }
0x16ca   : > { %5353 = dma.done.wait (%p4800_p2), %s4070_s14, 128  }
0x16cb   : > { %5355 = vsyncadd (%p4800_p2), %s4070_s14, 4294967168  ;;  %s33_s18 = sadd.s32 1, %s5398_s18   ;;  %s6668_s13 = sld [smem:[#allocation36_spill]] }
0x16cc   : > { %p30_p10 = scmp.ge.s32.totalorder %s33_s18, 6   ;;  %s6669_s8 = sld [smem:[#allocation35_spill]] }
0x16cd   : > { %s6670_s14 = sld [smem:[#allocation29_spill]]  ;;  %s6674_s25 = smov %s5362_s26 }
0x16ce   : > { %s6671_s15 = sld [smem:[#allocation30_spill]]  ;;  %s6675_s26 = smov %s5366_s27 }
0x16cf   : > { %s6672_s16 = sld [smem:[#allocation31_spill]]  ;;  %s6677_s28 = smov %s5374_s29 }
0x16d0   : > { %s6673_s17 = sld [smem:[#allocation33_spill]]  ;;  %s6678_s29 = smov %s5378_s30 }
0x16d1   : > { %s6676_s27 = smov %s6668_s13  ;;  %32 = sbr.rel (!%p30_p10) target bundleno = 23 (0x17), region = 172 }
0x16d2   : > { %s6679_s30 = smov %s6669_s8 }
0x16d6   :  { %4075 = vsyncpa [#allocation7], 1 }
0x16d7   :  { %4077 = vsyncpa [#allocation7 + $0x1], 1 }
0x16d8   :  { %4078 = vsyncpa [#allocation10], 1 }
0x16d9   :  { %4080 = vsyncpa [#allocation10 + $0x1], 1 }
0x16da   :  { %4081 = vsyncpa [#allocation13], 1 }
0x16db   :  { %4082 = vsyncpa [#allocation16], 1 }
0x16dc   :  { %4083 = vsyncpa [#allocation19], 1 }
0x16dd   :  { %4084 = vsyncpa [#allocation8], 1 }
0x16de   :  { %4086 = vsyncpa [#allocation8 + $0x1], 1 }

</bundles_post_ra>
